<compile_context>
chip_gen: v6e
topology: v6e:2x2x1
jax: 0.10.0
libtpu: 0.0.40
codegen_flags: <defaults>
</compile_context>

<pallas_src>
import functools
import math

import jax
import jax.numpy as jnp
from jax.experimental import pallas as pl
from jax.experimental.pallas import tpu as pltpu

LANE = 128     # lane width: packed feature dims are made multiples of this
SUBLANE = 8    # row tiles are multiples of the sublane count


# --------------------------------------------------------------------------
# Kernel: full MLP forward for one tile of (packed) rows.
# --------------------------------------------------------------------------
def _policy_kernel(n_hidden_layers, *refs):
    """refs = (x_ref, w0, b0, ..., w{L-1}, b{L-1}, w_out, b_out, o_ref)."""
    x_ref = refs[0]
    o_ref = refs[-1]
    param_refs = refs[1:-1]

    h = x_ref[...].astype(jnp.float32)

    # Hidden Linear + tanh stack (MXU matmuls; tanh lands on the EUP slot).
    # Weights may be bf16 (MXU-native) -- accumulation stays f32, bias-add
    # and tanh stay f32 (mandatory on v5e: no bf16 VPU/EUP there).
    for layer in range(n_hidden_layers):
        w = param_refs[2 * layer][...]
        b = param_refs[2 * layer + 1][...]                     # f32 bias
        h = jnp.tanh(
            jnp.dot(h.astype(w.dtype), w, preferred_element_type=jnp.float32) + b
        )

    # Final projection + tanh; output block is lane-dense -> unmasked vst.
    w_out = param_refs[2 * n_hidden_layers][...]
    b_out = param_refs[2 * n_hidden_layers + 1][...]
    out = jnp.tanh(
        jnp.dot(h.astype(w_out.dtype), w_out, preferred_element_type=jnp.float32)
        + b_out
    )
    o_ref[...] = out.astype(o_ref.dtype)


# --------------------------------------------------------------------------
# Host-side helpers
# --------------------------------------------------------------------------
def _round_up(v, m):
    return ((v + m - 1) // m) * m


def _choose_pack(H, A, max_packed_dim=1024):
    """Pick P logical rows per lane row so P*H (and ideally P*A) hit full lanes."""
    p_h = LANE // math.gcd(H, LANE)                 # smallest P with P*H % 128 == 0
    p_a = LANE // math.gcd(A, LANE)                 # smallest P with P*A % 128 == 0
    p_full = p_h * p_a // math.gcd(p_h, p_a)        # lcm: both dims lane-dense
    for P in (p_full, p_h, 1):
        if P * H <= max_packed_dim and P * A <= max_packed_dim:
            return P
    return 1


def _block_diag(w, P):
    """[din, dout] -> [P*din, P*dout] block-diagonal with P copies of w."""
    if P == 1:
        return w
    din, dout = w.shape
    bd = jnp.zeros((P * din, P * dout), w.dtype)
    for p in range(P):
        bd = bd.at[p * din:(p + 1) * din, p * dout:(p + 1) * dout].set(w)
    return bd


def _vmem_capacity_bytes():
    """Physical VMEM of the local chip; conservative (v7x-sized) fallback."""
    try:
        info = pltpu.get_tpu_info()
        cap = getattr(info, "vmem_capacity_bytes", None)
        if cap:
            return int(cap)
    except Exception:
        pass
    return 64 << 20


# --------------------------------------------------------------------------
# Wrapper
# --------------------------------------------------------------------------
def policy_net_forward(x, hidden_params, out_params, *,
                       weight_dtype=jnp.float32, max_row_tile=None):
    """Run PolicyNet forward.

    x:             [N, H] float32
    hidden_params: list of (W [H, H], b [1, H]) for each hidden Linear
    out_params:    (W_out [H, A], b_out [1, A])
    weight_dtype:  f32 (exact) or bf16 (MXU-native operands, f32 accumulation)
    Returns [N, A].
    """
    N, H = x.shape
    A = out_params[0].shape[1]
    n_hidden = len(hidden_params)
    isz = 4  # f32 activations

    # ---- Lane packing: P logical rows per 128-lane row (block-diag weights).
    P = _choose_pack(H, A)
    H_p = P * H
    A_pack = P * A
    A_pad = _round_up(A_pack, LANE)       # padded only when A_pack % 128 != 0

    flat_params = []
    for w, b in hidden_params:
        flat_params.append(_block_diag(w, P).astype(weight_dtype))
        flat_params.append(jnp.tile(b, (1, P)).astype(jnp.float32))   # f32 bias
    w_out, b_out = out_params
    w_out_p = _block_diag(w_out, P)
    b_out_p = jnp.tile(b_out, (1, P))
    if A_pad != A_pack:
        w_out_p = jnp.pad(w_out_p, ((0, 0), (0, A_pad - A_pack)))
        b_out_p = jnp.pad(b_out_p, ((0, 0), (0, A_pad - A_pack)))
    flat_params.append(w_out_p.astype(weight_dtype))
    flat_params.append(b_out_p.astype(jnp.float32))

    param_bytes = sum(int(p.size) * p.dtype.itemsize for p in flat_params)

    # ---- Generation-aware VMEM budget & row tile.
    vmem_cap = _vmem_capacity_bytes()
    usable = max(vmem_cap - (12 << 20), 24 << 20)         # leave compiler headroom
    if max_row_tile is None:
        # 128 MiB parts (v5e/v6e) can afford bigger tiles; v7x (64 MiB) smaller.
        max_row_tile = 2048 if vmem_cap >= (100 << 20) else 1024

    Np = -(-N // P)                                        # packed rows needed
    # Give both v7x TensorCores work whenever there is enough of it.
    target_steps = 2 if Np >= 2 * SUBLANE else 1
    row_tile = min(max_row_tile, _round_up(-(-Np // target_steps), SUBLANE))

    def _tile_bytes(rt):                                   # double-buffered x/out tiles
        return 2 * rt * (H_p + A_pad) * isz

    while row_tile > SUBLANE and (_tile_bytes(row_tile) + 2 * param_bytes
                                  + (2 << 20)) > usable:
        row_tile = max(SUBLANE, _round_up(row_tile // 2, SUBLANE))

    Np_pad = _round_up(Np, row_tile)
    N_pad = Np_pad * P
    grid = (Np_pad // row_tile,)

    need = _tile_bytes(row_tile) + 2 * param_bytes + (2 << 20)
    vmem_limit = int(min(max(int(1.25 * need), 32 << 20), usable))

    # ---- Pack x: pad rows, fold P logical rows into each lane row.
    x_packed = x
    if N_pad != N:
        x_packed = jnp.pad(x_packed, ((0, N_pad - N), (0, 0)))
    x_packed = x_packed.reshape(Np_pad, H_p)

    x_spec = pl.BlockSpec((row_tile, H_p), lambda i: (i, 0))
    out_spec = pl.BlockSpec((row_tile, A_pad), lambda i: (i, 0))

    # ---- Advisory cost estimate (packed dims) so XLA can overlap this call.
    flops = 2 * Np_pad * (n_hidden * H_p * H_p + H_p * A_pad)
    transc = Np_pad * (n_hidden * H_p + A_pad)
    bytes_acc = Np_pad * (H_p + A_pad) * isz + param_bytes

    kernel = functools.partial(_policy_kernel, n_hidden)

    def _run(single_buffer_params, fuse_input):
        if single_buffer_params:
            # Grid-invariant weights/biases: one resident copy, no double buffer.
            param_specs = [
                pl.BlockSpec(p.shape, lambda i: (0, 0),
                             pipeline_mode=pl.Buffered(1))
                for p in flat_params
            ]
        else:
            param_specs = [pl.BlockSpec(p.shape, lambda i: (0, 0))
                           for p in flat_params]
        cp_kwargs = dict(dimension_semantics=("parallel",),
                         vmem_limit_bytes=vmem_limit)
        if fuse_input:
            # Let XLA fuse the wrapper-side pad/reshape of x into the input DMA
            # instead of materializing a second HBM copy.
            cp_kwargs["allow_input_fusion"] = [True] + [False] * len(flat_params)
        return pl.pallas_call(
            kernel,
            out_shape=jax.ShapeDtypeStruct((Np_pad, A_pad), x.dtype),
            grid_spec=pltpu.PrefetchScalarGridSpec(
                num_scalar_prefetch=0,
                grid=grid,
                in_specs=[x_spec] + param_specs,
                out_specs=out_spec,
            ),
            compiler_params=pltpu.CompilerParams(**cp_kwargs),
            cost_estimate=pl.CostEstimate(
                flops=int(flops),
                transcendentals=int(transc),
                bytes_accessed=int(bytes_acc),
            ),
        )(x_packed, *flat_params)

    # TODO(synk): for very large hidden_neurons (resident weight bytes nearing
    # ~half of usable VMEM, e.g. H=2048 x 3 layers ~= 50 MiB f32 on v7x): first
    # use weight_dtype=bf16 + Buffered(1); past that, keep weights in
    # memory_space=pl.ANY and stream K-tiles per layer with pltpu.emit_pipeline
    # rather than shrinking row_tile (which re-exposes per-step overhead).
    try:
        out_padded = _run(True, True)
    except Exception:
        # Older jax / unsupported Buffered(1) or allow_input_fusion:
        # fall back to default double-buffered resident params.
        out_padded = _run(False, False)

    # Unpack (layout plumbing only): drop padded lanes, unfold P rows, drop
    # padded rows.
    return out_padded[:, :A_pack].reshape(N_pad, A)[:N]


# --------------------------------------------------------------------------
# Synthetic params + pure-JAX reference
# --------------------------------------------------------------------------
def init_params(key, hidden_neurons, action_vector_size, n_lin_policy):
    """Deterministic synthetic parameter init (shapes match the nn.Module)."""
    keys = jax.random.split(key, 2 * (n_lin_policy + 1))
    hidden_params = []
    k_idx = 0
    scale = 1.0 / jnp.sqrt(hidden_neurons)
    for _ in range(n_lin_policy):
        w = jax.random.uniform(
            keys[k_idx], (hidden_neurons, hidden_neurons),
            minval=-scale, maxval=scale, dtype=jnp.float32)
        b = jax.random.uniform(
            keys[k_idx + 1], (1, hidden_neurons),
            minval=-scale, maxval=scale, dtype=jnp.float32)
        hidden_params.append((w, b))
        k_idx += 2
    w_out = jax.random.uniform(
        keys[k_idx], (hidden_neurons, action_vector_size),
        minval=-scale, maxval=scale, dtype=jnp.float32)
    b_out = jax.random.uniform(
        keys[k_idx + 1], (1, action_vector_size),
        minval=-scale, maxval=scale, dtype=jnp.float32)
    return hidden_params, (w_out, b_out)


def reference_forward(x, hidden_params, out_params):
    """Pure-JAX reference mirroring the PyTorch forward exactly."""
    h = x
    for w, b in hidden_params:
        h = jnp.tanh(h @ w + b)
    h = jnp.tanh(h @ out_params[0] + out_params[1])
    return h


if __name__ == "__main__":
    # Shapes consistent with the module: hidden=32, n_lin_policy=2,
    # action_vector_size=8.
    HIDDEN = 32
    ACTION = 8
    N_LIN_POLICY = 2

    key = jax.random.PRNGKey(0)
    k_x, k_p = jax.random.split(key)
    hidden_params, out_params = init_params(k_p, HIDDEN, ACTION, N_LIN_POLICY)

    # edge_index_* inputs of the PyTorch forward are unused; omitted here.

    # Case 1: small batch (packed rows pad up to one sublane-aligned tile).
    N = 16
    x = jax.random.normal(k_x, (N, HIDDEN), dtype=jnp.float32)
    out = jax.block_until_ready(policy_net_forward(x, hidden_params, out_params))
    ref = reference_forward(x, hidden_params, out_params)
    assert out.shape == (N, ACTION)
    assert jnp.allclose(out, ref, atol=1e-5, rtol=1e-5)

    # Case 2: ragged batch (row padding + wrapper-side unpack / slice).
    N2 = 13
    x2 = jax.random.normal(jax.random.PRNGKey(7), (N2, HIDDEN), dtype=jnp.float32)
    out2 = jax.block_until_ready(policy_net_forward(x2, hidden_params, out_params))
    ref2 = reference_forward(x2, hidden_params, out_params)
    assert out2.shape == (N2, ACTION)
    assert jnp.allclose(out2, ref2, atol=1e-5, rtol=1e-5)

    # Case 3: larger batch (>= 2 grid steps, exercises the v7x megacore split)
    # with bf16 MXU operands (f32 accumulation / bias / tanh) — looser tol.
    N3 = 300
    x3 = jax.random.normal(jax.random.PRNGKey(11), (N3, HIDDEN), dtype=jnp.float32)
    out3 = jax.block_until_ready(
        policy_net_forward(x3, hidden_params, out_params,
                           weight_dtype=jnp.bfloat16))
    ref3 = reference_forward(x3, hidden_params, out_params)
    assert out3.shape == (N3, ACTION)
    assert jnp.allclose(out3, ref3, atol=5e-2, rtol=0)

    print("KERNEL_OK")
</pallas_src>

<mosaic_0001>
module attributes {stable_mosaic.version = 11 : i64} {
  func.func @_policy_kernel(%arg0: i32, %arg1: memref<8x512xf32, #tpu.memory_space<vmem>>, %arg2: memref<512x512xf32, #tpu.memory_space<vmem>>, %arg3: memref<1x512xf32, #tpu.memory_space<vmem>>, %arg4: memref<512x512xf32, #tpu.memory_space<vmem>>, %arg5: memref<1x512xf32, #tpu.memory_space<vmem>>, %arg6: memref<512x128xf32, #tpu.memory_space<vmem>>, %arg7: memref<1x128xf32, #tpu.memory_space<vmem>>, %arg8: memref<8x128xf32, #tpu.memory_space<vmem>>) attributes {dimension_semantics = [#tpu.dimension_semantics<parallel>], iteration_bounds = array<i64: 1>, scalar_prefetch = 0 : i64, scratch_operands = 0 : i64, tpu.core_type = #tpu.core_type<tc>, window_params = [{transform_indices = @transform_0, window_bounds = array<i64: 8, 512>}, {pipeline_mode = #tpu.pipeline_mode<synchronous>, transform_indices = @transform_1, window_bounds = array<i64: 512, 512>}, {pipeline_mode = #tpu.pipeline_mode<synchronous>, transform_indices = @transform_2, window_bounds = array<i64: 1, 512>}, {pipeline_mode = #tpu.pipeline_mode<synchronous>, transform_indices = @transform_3, window_bounds = array<i64: 512, 512>}, {pipeline_mode = #tpu.pipeline_mode<synchronous>, transform_indices = @transform_4, window_bounds = array<i64: 1, 512>}, {pipeline_mode = #tpu.pipeline_mode<synchronous>, transform_indices = @transform_5, window_bounds = array<i64: 512, 128>}, {pipeline_mode = #tpu.pipeline_mode<synchronous>, transform_indices = @transform_6, window_bounds = array<i64: 1, 128>}, {transform_indices = @transform_7, window_bounds = array<i64: 8, 128>}]} {
    %c0 = arith.constant 0 : index
    %c0_0 = arith.constant 0 : index
    %0 = vector.load %arg1[%c0, %c0_0] : memref<8x512xf32, #tpu.memory_space<vmem>>, vector<8x512xf32>
    %c0_1 = arith.constant 0 : index
    %c0_2 = arith.constant 0 : index
    %1 = vector.load %arg2[%c0_1, %c0_2] : memref<512x512xf32, #tpu.memory_space<vmem>>, vector<512x512xf32>
    %c0_3 = arith.constant 0 : index
    %c0_4 = arith.constant 0 : index
    %2 = vector.load %arg3[%c0_3, %c0_4] : memref<1x512xf32, #tpu.memory_space<vmem>>, vector<1x512xf32>
    %cst = arith.constant dense<0.000000e+00> : vector<8x512xf32>
    %3 = tpu.matmul %0, %1, %cst {dimension_numbers = #tpu.dot_dimension_numbers<[1], [0], [0], [1], [0, 0, 1, 1], [], []>} : vector<8x512xf32>, vector<512x512xf32>, vector<8x512xf32> -> vector<8x512xf32>
    %4 = vector.broadcast %2 : vector<1x512xf32> to vector<8x512xf32>
    %5 = arith.addf %3, %4 : vector<8x512xf32>
    %6 = math.tanh %5 : vector<8x512xf32>
    %c0_5 = arith.constant 0 : index
    %c0_6 = arith.constant 0 : index
    %7 = vector.load %arg4[%c0_5, %c0_6] : memref<512x512xf32, #tpu.memory_space<vmem>>, vector<512x512xf32>
    %c0_7 = arith.constant 0 : index
    %c0_8 = arith.constant 0 : index
    %8 = vector.load %arg5[%c0_7, %c0_8] : memref<1x512xf32, #tpu.memory_space<vmem>>, vector<1x512xf32>
    %cst_9 = arith.constant dense<0.000000e+00> : vector<8x512xf32>
    %9 = tpu.matmul %6, %7, %cst_9 {dimension_numbers = #tpu.dot_dimension_numbers<[1], [0], [0], [1], [0, 0, 1, 1], [], []>} : vector<8x512xf32>, vector<512x512xf32>, vector<8x512xf32> -> vector<8x512xf32>
    %10 = vector.broadcast %8 : vector<1x512xf32> to vector<8x512xf32>
    %11 = arith.addf %9, %10 : vector<8x512xf32>
    %12 = math.tanh %11 : vector<8x512xf32>
    %c0_10 = arith.constant 0 : index
    %c0_11 = arith.constant 0 : index
    %13 = vector.load %arg6[%c0_10, %c0_11] : memref<512x128xf32, #tpu.memory_space<vmem>>, vector<512x128xf32>
    %c0_12 = arith.constant 0 : index
    %c0_13 = arith.constant 0 : index
    %14 = vector.load %arg7[%c0_12, %c0_13] : memref<1x128xf32, #tpu.memory_space<vmem>>, vector<1x128xf32>
    %cst_14 = arith.constant dense<0.000000e+00> : vector<8x128xf32>
    %15 = tpu.matmul %12, %13, %cst_14 {dimension_numbers = #tpu.dot_dimension_numbers<[1], [0], [0], [1], [0, 0, 1, 1], [], []>} : vector<8x512xf32>, vector<512x128xf32>, vector<8x128xf32> -> vector<8x128xf32>
    %16 = vector.broadcast %14 : vector<1x128xf32> to vector<8x128xf32>
    %17 = arith.addf %15, %16 : vector<8x128xf32>
    %18 = math.tanh %17 : vector<8x128xf32>
    %c0_15 = arith.constant 0 : index
    %c0_16 = arith.constant 0 : index
    %19 = vector.load %arg8[%c0_15, %c0_16] : memref<8x128xf32, #tpu.memory_space<vmem>>, vector<8x128xf32>
    tpu.vector_store %arg8[%c0_15, %c0_16], %18 {strides = array<i32>} : memref<8x128xf32, #tpu.memory_space<vmem>>, vector<8x128xf32>,
    return
  }
  func.func @transform_0(%arg0: i32) -> (i32, i32) {
    %c0_i32 = arith.constant 0 : i32
    %c0_i32_0 = arith.constant 0 : i32
    return %arg0, %c0_i32 : i32, i32
  }
  func.func @transform_1(%arg0: i32) -> (i32, i32) {
    %c0_i32 = arith.constant 0 : i32
    %c0_i32_0 = arith.constant 0 : i32
    %c0_i32_1 = arith.constant 0 : i32
    return %c0_i32, %c0_i32_0 : i32, i32
  }
  func.func @transform_2(%arg0: i32) -> (i32, i32) {
    %c0_i32 = arith.constant 0 : i32
    %c0_i32_0 = arith.constant 0 : i32
    %c0_i32_1 = arith.constant 0 : i32
    return %c0_i32, %c0_i32_0 : i32, i32
  }
  func.func @transform_3(%arg0: i32) -> (i32, i32) {
    %c0_i32 = arith.constant 0 : i32
    %c0_i32_0 = arith.constant 0 : i32
    %c0_i32_1 = arith.constant 0 : i32
    return %c0_i32, %c0_i32_0 : i32, i32
  }
  func.func @transform_4(%arg0: i32) -> (i32, i32) {
    %c0_i32 = arith.constant 0 : i32
    %c0_i32_0 = arith.constant 0 : i32
    %c0_i32_1 = arith.constant 0 : i32
    return %c0_i32, %c0_i32_0 : i32, i32
  }
  func.func @transform_5(%arg0: i32) -> (i32, i32) {
    %c0_i32 = arith.constant 0 : i32
    %c0_i32_0 = arith.constant 0 : i32
    %c0_i32_1 = arith.constant 0 : i32
    return %c0_i32, %c0_i32_0 : i32, i32
  }
  func.func @transform_6(%arg0: i32) -> (i32, i32) {
    %c0_i32 = arith.constant 0 : i32
    %c0_i32_0 = arith.constant 0 : i32
    %c0_i32_1 = arith.constant 0 : i32
    return %c0_i32, %c0_i32_0 : i32, i32
  }
  func.func @transform_7(%arg0: i32) -> (i32, i32) {
    %c0_i32 = arith.constant 0 : i32
    %c0_i32_0 = arith.constant 0 : i32
    return %arg0, %c0_i32 : i32, i32
  }
}

module attributes {stable_mosaic.version = 11 : i64} {
  func.func @_policy_kernel(%arg0: i32, %arg1: memref<8x512xf32, #tpu.memory_space<vmem>>, %arg2: memref<512x512xf32, #tpu.memory_space<vmem>>, %arg3: memref<1x512xf32, #tpu.memory_space<vmem>>, %arg4: memref<512x512xf32, #tpu.memory_space<vmem>>, %arg5: memref<1x512xf32, #tpu.memory_space<vmem>>, %arg6: memref<512x128xf32, #tpu.memory_space<vmem>>, %arg7: memref<1x128xf32, #tpu.memory_space<vmem>>, %arg8: memref<8x128xf32, #tpu.memory_space<vmem>>) attributes {dimension_semantics = [#tpu.dimension_semantics<parallel>], iteration_bounds = array<i64: 1>, scalar_prefetch = 0 : i64, scratch_operands = 0 : i64, tpu.core_type = #tpu.core_type<tc>, window_params = [{transform_indices = @transform_0, window_bounds = array<i64: 8, 512>}, {pipeline_mode = #tpu.pipeline_mode<synchronous>, transform_indices = @transform_1, window_bounds = array<i64: 512, 512>}, {pipeline_mode = #tpu.pipeline_mode<synchronous>, transform_indices = @transform_2, window_bounds = array<i64: 1, 512>}, {pipeline_mode = #tpu.pipeline_mode<synchronous>, transform_indices = @transform_3, window_bounds = array<i64: 512, 512>}, {pipeline_mode = #tpu.pipeline_mode<synchronous>, transform_indices = @transform_4, window_bounds = array<i64: 1, 512>}, {pipeline_mode = #tpu.pipeline_mode<synchronous>, transform_indices = @transform_5, window_bounds = array<i64: 512, 128>}, {pipeline_mode = #tpu.pipeline_mode<synchronous>, transform_indices = @transform_6, window_bounds = array<i64: 1, 128>}, {transform_indices = @transform_7, window_bounds = array<i64: 8, 128>}]} {
    %c0 = arith.constant 0 : index
    %c0_0 = arith.constant 0 : index
    %0 = vector.load %arg1[%c0, %c0_0] : memref<8x512xf32, #tpu.memory_space<vmem>>, vector<8x512xf32>
    %c0_1 = arith.constant 0 : index
    %c0_2 = arith.constant 0 : index
    %1 = vector.load %arg2[%c0_1, %c0_2] : memref<512x512xf32, #tpu.memory_space<vmem>>, vector<512x512xf32>
    %c0_3 = arith.constant 0 : index
    %c0_4 = arith.constant 0 : index
    %2 = vector.load %arg3[%c0_3, %c0_4] : memref<1x512xf32, #tpu.memory_space<vmem>>, vector<1x512xf32>
    %cst = arith.constant dense<0.000000e+00> : vector<8x512xf32>
    %3 = tpu.matmul %0, %1, %cst {dimension_numbers = #tpu.dot_dimension_numbers<[1], [0], [0], [1], [0, 0, 1, 1], [], []>} : vector<8x512xf32>, vector<512x512xf32>, vector<8x512xf32> -> vector<8x512xf32>
    %4 = vector.broadcast %2 : vector<1x512xf32> to vector<8x512xf32>
    %5 = arith.addf %3, %4 : vector<8x512xf32>
    %6 = math.tanh %5 : vector<8x512xf32>
    %c0_5 = arith.constant 0 : index
    %c0_6 = arith.constant 0 : index
    %7 = vector.load %arg4[%c0_5, %c0_6] : memref<512x512xf32, #tpu.memory_space<vmem>>, vector<512x512xf32>
    %c0_7 = arith.constant 0 : index
    %c0_8 = arith.constant 0 : index
    %8 = vector.load %arg5[%c0_7, %c0_8] : memref<1x512xf32, #tpu.memory_space<vmem>>, vector<1x512xf32>
    %cst_9 = arith.constant dense<0.000000e+00> : vector<8x512xf32>
    %9 = tpu.matmul %6, %7, %cst_9 {dimension_numbers = #tpu.dot_dimension_numbers<[1], [0], [0], [1], [0, 0, 1, 1], [], []>} : vector<8x512xf32>, vector<512x512xf32>, vector<8x512xf32> -> vector<8x512xf32>
    %10 = vector.broadcast %8 : vector<1x512xf32> to vector<8x512xf32>
    %11 = arith.addf %9, %10 : vector<8x512xf32>
    %12 = math.tanh %11 : vector<8x512xf32>
    %c0_10 = arith.constant 0 : index
    %c0_11 = arith.constant 0 : index
    %13 = vector.load %arg6[%c0_10, %c0_11] : memref<512x128xf32, #tpu.memory_space<vmem>>, vector<512x128xf32>
    %c0_12 = arith.constant 0 : index
    %c0_13 = arith.constant 0 : index
    %14 = vector.load %arg7[%c0_12, %c0_13] : memref<1x128xf32, #tpu.memory_space<vmem>>, vector<1x128xf32>
    %cst_14 = arith.constant dense<0.000000e+00> : vector<8x128xf32>
    %15 = tpu.matmul %12, %13, %cst_14 {dimension_numbers = #tpu.dot_dimension_numbers<[1], [0], [0], [1], [0, 0, 1, 1], [], []>} : vector<8x512xf32>, vector<512x128xf32>, vector<8x128xf32> -> vector<8x128xf32>
    %16 = vector.broadcast %14 : vector<1x128xf32> to vector<8x128xf32>
    %17 = arith.addf %15, %16 : vector<8x128xf32>
    %18 = math.tanh %17 : vector<8x128xf32>
    %c0_15 = arith.constant 0 : index
    %c0_16 = arith.constant 0 : index
    %19 = vector.load %arg8[%c0_15, %c0_16] : memref<8x128xf32, #tpu.memory_space<vmem>>, vector<8x128xf32>
    tpu.vector_store %arg8[%c0_15, %c0_16], %18 {strides = array<i32>} : memref<8x128xf32, #tpu.memory_space<vmem>>, vector<8x128xf32>,
    return
  }
  func.func @transform_0(%arg0: i32) -> (i32, i32) {
    %c0_i32 = arith.constant 0 : i32
    %c0_i32_0 = arith.constant 0 : i32
    return %arg0, %c0_i32 : i32, i32
  }
  func.func @transform_1(%arg0: i32) -> (i32, i32) {
    %c0_i32 = arith.constant 0 : i32
    %c0_i32_0 = arith.constant 0 : i32
    %c0_i32_1 = arith.constant 0 : i32
    return %c0_i32, %c0_i32_0 : i32, i32
  }
  func.func @transform_2(%arg0: i32) -> (i32, i32) {
    %c0_i32 = arith.constant 0 : i32
    %c0_i32_0 = arith.constant 0 : i32
    %c0_i32_1 = arith.constant 0 : i32
    return %c0_i32, %c0_i32_0 : i32, i32
  }
  func.func @transform_3(%arg0: i32) -> (i32, i32) {
    %c0_i32 = arith.constant 0 : i32
    %c0_i32_0 = arith.constant 0 : i32
    %c0_i32_1 = arith.constant 0 : i32
    return %c0_i32, %c0_i32_0 : i32, i32
  }
  func.func @transform_4(%arg0: i32) -> (i32, i32) {
    %c0_i32 = arith.constant 0 : i32
    %c0_i32_0 = arith.constant 0 : i32
    %c0_i32_1 = arith.constant 0 : i32
    return %c0_i32, %c0_i32_0 : i32, i32
  }
  func.func @transform_5(%arg0: i32) -> (i32, i32) {
    %c0_i32 = arith.constant 0 : i32
    %c0_i32_0 = arith.constant 0 : i32
    %c0_i32_1 = arith.constant 0 : i32
    return %c0_i32, %c0_i32_0 : i32, i32
  }
  func.func @transform_6(%arg0: i32) -> (i32, i32) {
    %c0_i32 = arith.constant 0 : i32
    %c0_i32_0 = arith.constant 0 : i32
    %c0_i32_1 = arith.constant 0 : i32
    return %c0_i32, %c0_i32_0 : i32, i32
  }
  func.func @transform_7(%arg0: i32) -> (i32, i32) {
    %c0_i32 = arith.constant 0 : i32
    %c0_i32_0 = arith.constant 0 : i32
    return %arg0, %c0_i32 : i32, i32
  }
}

</mosaic_0001>

<bundles_post_ra>
// kernel: tpu_custom_call.1
= control target key start
LH: loop header
LB: loop body
LE: loop exit
PB: predicated region body
PF: predicated region fallthrough
CT: control target
= control target key end

     0   :  { %12 = vsyncpa [#allocation3], 0  ;;  %s1810_s0 = inlined_call_operand.hbm [shape: f32[8,512], index: 0, kind: input, shape index: {}]   ;;  %s1811_s1 = inlined_call_operand.hbm [shape: f32[512,512], index: 1, kind: input, shape index: {}]   ;;  %s1812_s2 = inlined_call_operand.hbm [shape: f32[1,512], index: 2, kind: input, shape index: {}]   ;;  %s1813_s3 = inlined_call_operand.hbm [shape: f32[512,512], index: 3, kind: input, shape index: {}]   ;;  %s1814_s4 = inlined_call_operand.vmem [shape: f32[1,512], index: 4, kind: input, shape index: {}]   ;;  %s1815_s5 = inlined_call_operand.hbm [shape: f32[512,128], index: 5, kind: input, shape index: {}]   ;;  %s1816_s6 = inlined_call_operand.vmem [shape: f32[1,128], index: 6, kind: input, shape index: {}]   ;;  %s1817_s7 = inlined_call_operand.hbm [shape: f32[8,128], index: 7, kind: output, shape index: {}]  }
   0x1   :  { %13 = vsyncpa [#allocation6], 0 }
   0x2   :  { %14 = vsyncpa [#allocation9], 0 }
   0x3   :  { %15 = vsyncpa [#allocation4], 0  ;;  %s1684_s24 = smov [#allocation5]  }
   0x4   :  { %s31_s25 = sshll.u32 %s1684_s24, 4  ;;  %s32_s25 = int_to_ptr.vmem [resolvable:$true] %s31_s25 }
   0x5   :  { %s1564_s26 = scalar_lea.vmem %s32_s25, 32768  ;;  %p1569_p1 = scmp.lt.s32.totalorder %s32_s25, %s32_s25 }
   0x6   :  { %p1565_p0 = scmp.ne.s32.totalorder %s32_s25, %s1564_s26  ;;  %p1570_p2 = scmp.lt.s32.totalorder %s1564_s26, %s1564_s26 }
   0x8   :  { %p1571_p3 = por %p1570_p2, %p1569_p1 }
   0xa   :  { %p1572_p4 = pnand %p1571_p3, %p1565_p0 }
   0xc   :  { %1575 = shalt.err (!%p1572_p4)
}
   0xd   :  { %s1685_s27 = smov 512   ;;  %s1686_s28 = smov 32  }
   0xe   :  { %37 = dma.hbm_to_vmem [thread:$0]  %s1811_s1, 32768, %s32_s25, [#allocation6], %s1685_s27, %s1685_s27, %s1686_s28  }
   0xf   :  { %s1687_s8 = smov [#allocation8]   ;;  %s1688_s10 = smov [#allocation2]  }
  0x10   :  { %s53_s9 = sshll.u32 %s1687_s8, 4  ;;  %s22_s11 = sshll.u32 %s1688_s10, 4  ;;  %s54_s9 = int_to_ptr.vmem [resolvable:$true] %s53_s9  ;;  %s23_s11 = int_to_ptr.vmem [resolvable:$true] %s22_s11 }
  0x11   :  { %s1584_s12 = scalar_lea.vmem %s54_s9, 32768  ;;  %p1589_p6 = scmp.lt.s32.totalorder %s54_s9, %s54_s9 }
  0x12   :  { %p1585_p5 = scmp.ne.s32.totalorder %s54_s9, %s1584_s12  ;;  %p1590_p7 = scmp.lt.s32.totalorder %s1584_s12, %s1584_s12 }
  0x14   :  { %p1591_p8 = por %p1590_p7, %p1589_p6 }
  0x16   :  { %p1592_p9 = pnand %p1591_p8, %p1585_p5 }
  0x18   :  { %1595 = shalt.err (!%p1592_p9)
}
  0x19   :  { %59 = dma.hbm_to_vmem [thread:$0]  %s1813_s3, 32768, %s54_s9, [#allocation9], %s1685_s27, %s1685_s27, %s1686_s28  }
  0x1a   :  { %s1604_s15 = scalar_lea.vmem %s23_s11, 512  ;;  %p1609_p11 = scmp.lt.s32.totalorder %s23_s11, %s23_s11 }
  0x1b   :  { %p1605_p10 = scmp.ne.s32.totalorder %s23_s11, %s1604_s15  ;;  %p1610_p12 = scmp.lt.s32.totalorder %s1604_s15, %s1604_s15 }
  0x1d   :  { %p1611_p13 = por %p1610_p12, %p1609_p11 }
  0x1f   :  { %p1612_p0 = pnand %p1611_p13, %p1605_p10 }
  0x21   :  { %1615 = shalt.err (!%p1612_p0)
}
  0x22   :  { %25 = dma.hbm_to_vmem [thread:$0]  %s1810_s0, 512, %s23_s11, [#allocation3]  }
  0x23   :  { %s1689_s17 = smov [#allocation7]   ;;  %s1690_s19 = smov [#allocation10]  }
  0x24   :  { %s44_s18 = sshll.u32 %s1689_s17, 4  ;;  %s67_s20 = sshll.u32 %s1690_s19, 4  ;;  %s45_s18 = int_to_ptr.vmem [resolvable:$true] %s44_s18  ;;  %s68_s20 = int_to_ptr.vmem [resolvable:$true] %s67_s20 }
  0x25   :  { %s1624_s21 = scalar_lea.vmem %s45_s18, 64  ;;  %p1629_p2 = scmp.lt.s32.totalorder %s45_s18, %s45_s18 }
  0x26   :  { %p1625_p1 = scmp.ne.s32.totalorder %s45_s18, %s1624_s21  ;;  %p1630_p3 = scmp.lt.s32.totalorder %s1624_s21, %s1624_s21 }
  0x28   :  { %p1631_p4 = por %p1630_p3, %p1629_p2 }
  0x2a   :  { %p1632_p5 = pnand %p1631_p4, %p1625_p1 }
  0x2c   :  { %1635 = shalt.err (!%p1632_p5)
}
  0x2d   :  { %47 = dma.hbm_to_vmem [thread:$0]  %s1812_s2, 64, %s45_s18, [#allocation6]  }
  0x2e   :  { %s1644_s23 = scalar_lea.vmem %s68_s20, 8192  ;;  %p1649_p7 = scmp.lt.s32.totalorder %s68_s20, %s68_s20 }
  0x2f   :  { %p1645_p6 = scmp.ne.s32.totalorder %s68_s20, %s1644_s23  ;;  %p1650_p8 = scmp.lt.s32.totalorder %s1644_s23, %s1644_s23 }
  0x31   :  { %p1651_p9 = por %p1650_p8, %p1649_p7 }
  0x33   :  { %p1652_p10 = pnand %p1651_p9, %p1645_p6 }
  0x35   :  { %1655 = shalt.err (!%p1652_p10)
}
  0x36   :  { %s1691_s0 = smov 128   ;;  %s1692_s24 = smov 8  }
  0x37   :  { %73 = dma.hbm_to_vmem [thread:$0]  %s1815_s5, 8192, %s68_s20, [#allocation9], %s1691_s0, %s1691_s0, %s1692_s24  }
  0x38   :  { %1676 = dma.done.wait [#allocation3], 512  }
  0x39   :  { %1677 = vsyncadd [#allocation3], 4294966784 }
  0x3a   :  { %1678 = dma.done.wait [#allocation6], 32832  }
  0x3b   :  { %1679 = vsyncadd [#allocation6], 4294934464 }
  0x3c   :  { %1680 = dma.done.wait [#allocation9], 40960  }
  0x3d   :  { %1681 = vsyncadd [#allocation9], 4294926336  ;;  %v156_v0 = vld [vmem:[#allocation5 + $0x1e8] sm:$0xff]  ;;  %v155_v2 = vld [vmem:[#allocation5 + $0x1e0] sm:$0xff]  ;;  %s1693_s28 = smov [#allocation11]  }
  0x3e   :  { %v284_v1 = vld [vmem:[#allocation5 + $0x5e8] sm:$0xff]  ;;  %373 = vmatprep.subr.mxu0 %v156_v0  ;;  %v283_v3 = vld [vmem:[#allocation5 + $0x5e0] sm:$0xff]  ;;  %s1446_s29 = sshll.u32 %s1693_s28, 4  ;;  %s1447_s29 = int_to_ptr.vmem [resolvable:$true] %s1446_s29 }
  0x3f   :  { %444 = vmatprep.subr.mxu1 %v284_v1  ;;  %v152_v4 = vld [vmem:[#allocation5 + $0x1c8] sm:$0xff]  ;;  %374 = vmatpush1.msra.mxu0 %v155_v2  ;;  %v151_v6 = vld [vmem:[#allocation5 + $0x1c0] sm:$0xff]  ;;  %s1656_s30 = scalar_lea.vmem %s1447_s29, 128  ;;  %p1661_p12 = scmp.lt.s32.totalorder %s1447_s29, %s1447_s29 }
  0x40   :  { %v280_v5 = vld [vmem:[#allocation5 + $0x5c8] sm:$0xff]  ;;  %445 = vmatpush1.msra.mxu1 %v283_v3  ;;  %v279_v7 = vld [vmem:[#allocation5 + $0x5c0] sm:$0xff]  ;;  %375 = vmatprep.subr.mxu0 %v152_v4  ;;  %p1657_p11 = scmp.ne.s32.totalorder %s1447_s29, %s1656_s30  ;;  %p1662_p13 = scmp.lt.s32.totalorder %s1656_s30, %s1656_s30 }
  0x41   :  { %v148_v8 = vld [vmem:[#allocation5 + $0x1a8] sm:$0xff]  ;;  %446 = vmatprep.subr.mxu1 %v280_v5  ;;  %v147_v10 = vld [vmem:[#allocation5 + $0x1a0] sm:$0xff]  ;;  %376 = vmatpush1.msra.mxu0 %v151_v6 }
  0x42   :  { %v276_v9 = vld [vmem:[#allocation5 + $0x5a8] sm:$0xff]  ;;  %v275_v11 = vld [vmem:[#allocation5 + $0x5a0] sm:$0xff]  ;;  %447 = vmatpush1.msra.mxu1 %v279_v7  ;;  %377 = vmatprep.subr.mxu0 %v148_v8  ;;  %p1663_p0 = por %p1662_p13, %p1661_p12 }
  0x43   :  { %v144_v12 = vld [vmem:[#allocation5 + $0x188] sm:$0xff]  ;;  %448 = vmatprep.subr.mxu1 %v276_v9  ;;  %v143_v14 = vld [vmem:[#allocation5 + $0x180] sm:$0xff]  ;;  %378 = vmatpush1.msra.mxu0 %v147_v10 }
  0x44   :  { %v272_v13 = vld [vmem:[#allocation5 + $0x588] sm:$0xff]  ;;  %v271_v15 = vld [vmem:[#allocation5 + $0x580] sm:$0xff]  ;;  %449 = vmatpush1.msra.mxu1 %v275_v11  ;;  %379 = vmatprep.subr.mxu0 %v144_v12  ;;  %p1664_p1 = pnand %p1663_p0, %p1657_p11 }
  0x45   :  { %v140_v16 = vld [vmem:[#allocation5 + $0x168] sm:$0xff]  ;;  %450 = vmatprep.subr.mxu1 %v272_v13  ;;  %v139_v18 = vld [vmem:[#allocation5 + $0x160] sm:$0xff]  ;;  %380 = vmatpush1.msra.mxu0 %v143_v14 }
  0x46   :  { %v268_v17 = vld [vmem:[#allocation5 + $0x568] sm:$0xff]  ;;  %v267_v19 = vld [vmem:[#allocation5 + $0x560] sm:$0xff]  ;;  %451 = vmatpush1.msra.mxu1 %v271_v15  ;;  %381 = vmatprep.subr.mxu0 %v140_v16 }
  0x47   :  { %v136_v20 = vld [vmem:[#allocation5 + $0x148] sm:$0xff]  ;;  %452 = vmatprep.subr.mxu1 %v268_v17  ;;  %v135_v22 = vld [vmem:[#allocation5 + $0x140] sm:$0xff]  ;;  %382 = vmatpush1.msra.mxu0 %v139_v18 }
  0x48   :  { %v264_v21 = vld [vmem:[#allocation5 + $0x548] sm:$0xff]  ;;  %v263_v23 = vld [vmem:[#allocation5 + $0x540] sm:$0xff]  ;;  %453 = vmatpush1.msra.mxu1 %v267_v19  ;;  %383 = vmatprep.subr.mxu0 %v136_v20 }
  0x49   :  { %v132_v24 = vld [vmem:[#allocation5 + $0x128] sm:$0xff]  ;;  %454 = vmatprep.subr.mxu1 %v264_v21  ;;  %v131_v26 = vld [vmem:[#allocation5 + $0x120] sm:$0xff]  ;;  %384 = vmatpush1.msra.mxu0 %v135_v22 }
  0x4a   :  { %v260_v25 = vld [vmem:[#allocation5 + $0x528] sm:$0xff]  ;;  %v259_v27 = vld [vmem:[#allocation5 + $0x520] sm:$0xff]  ;;  %455 = vmatpush1.msra.mxu1 %v263_v23  ;;  %385 = vmatprep.subr.mxu0 %v132_v24 }
  0x4b   :  { %v128_v28 = vld [vmem:[#allocation5 + $0x108] sm:$0xff]  ;;  %456 = vmatprep.subr.mxu1 %v260_v25  ;;  %v127_v30 = vld [vmem:[#allocation5 + $0x100] sm:$0xff]  ;;  %386 = vmatpush1.msra.mxu0 %v131_v26 }
  0x4c   :  { %v256_v29 = vld [vmem:[#allocation5 + $0x508] sm:$0xff]  ;;  %v255_v31 = vld [vmem:[#allocation5 + $0x500] sm:$0xff]  ;;  %457 = vmatpush1.msra.mxu1 %v259_v27  ;;  %387 = vmatprep.subr.mxu0 %v128_v28 }
  0x4d   :  { %v124_v32 = vld [vmem:[#allocation5 + $0xe8] sm:$0xff]  ;;  %458 = vmatprep.subr.mxu1 %v256_v29  ;;  %v123_v34 = vld [vmem:[#allocation5 + $0xe0] sm:$0xff]  ;;  %388 = vmatpush1.msra.mxu0 %v127_v30 }
  0x4e   :  { %v252_v33 = vld [vmem:[#allocation5 + $0x4e8] sm:$0xff]  ;;  %v251_v35 = vld [vmem:[#allocation5 + $0x4e0] sm:$0xff]  ;;  %459 = vmatpush1.msra.mxu1 %v255_v31  ;;  %389 = vmatprep.subr.mxu0 %v124_v32 }
  0x4f   :  { %v120_v36 = vld [vmem:[#allocation5 + $0xc8] sm:$0xff]  ;;  %460 = vmatprep.subr.mxu1 %v252_v33  ;;  %v119_v38 = vld [vmem:[#allocation5 + $0xc0] sm:$0xff]  ;;  %390 = vmatpush1.msra.mxu0 %v123_v34 }
  0x50   :  { %v248_v37 = vld [vmem:[#allocation5 + $0x4c8] sm:$0xff]  ;;  %v247_v39 = vld [vmem:[#allocation5 + $0x4c0] sm:$0xff]  ;;  %461 = vmatpush1.msra.mxu1 %v251_v35  ;;  %391 = vmatprep.subr.mxu0 %v120_v36 }
  0x51   :  { %v116_v40 = vld [vmem:[#allocation5 + $0xa8] sm:$0xff]  ;;  %462 = vmatprep.subr.mxu1 %v248_v37  ;;  %v115_v42 = vld [vmem:[#allocation5 + $0xa0] sm:$0xff]  ;;  %392 = vmatpush1.msra.mxu0 %v119_v38 }
  0x52   :  { %v244_v41 = vld [vmem:[#allocation5 + $0x4a8] sm:$0xff]  ;;  %v243_v43 = vld [vmem:[#allocation5 + $0x4a0] sm:$0xff]  ;;  %463 = vmatpush1.msra.mxu1 %v247_v39  ;;  %393 = vmatprep.subr.mxu0 %v116_v40 }
  0x53   :  { %v112_v44 = vld [vmem:[#allocation5 + $0x88] sm:$0xff]  ;;  %464 = vmatprep.subr.mxu1 %v244_v41  ;;  %v111_v46 = vld [vmem:[#allocation5 + $0x80] sm:$0xff]  ;;  %394 = vmatpush1.msra.mxu0 %v115_v42 }
  0x54   :  { %v240_v45 = vld [vmem:[#allocation5 + $0x488] sm:$0xff]  ;;  %v239_v47 = vld [vmem:[#allocation5 + $0x480] sm:$0xff]  ;;  %465 = vmatpush1.msra.mxu1 %v243_v43  ;;  %395 = vmatprep.subr.mxu0 %v112_v44 }
  0x55   :  { %v108_v48 = vld [vmem:[#allocation5 + $0x68] sm:$0xff]  ;;  %466 = vmatprep.subr.mxu1 %v240_v45  ;;  %v107_v50 = vld [vmem:[#allocation5 + $0x60] sm:$0xff]  ;;  %396 = vmatpush1.msra.mxu0 %v111_v46 }
  0x56   :  { %v236_v49 = vld [vmem:[#allocation5 + $0x468] sm:$0xff]  ;;  %v235_v51 = vld [vmem:[#allocation5 + $0x460] sm:$0xff]  ;;  %467 = vmatpush1.msra.mxu1 %v239_v47  ;;  %397 = vmatprep.subr.mxu0 %v108_v48 }
  0x57   :  { %v104_v52 = vld [vmem:[#allocation5 + $0x48] sm:$0xff]  ;;  %468 = vmatprep.subr.mxu1 %v236_v49  ;;  %v103_v54 = vld [vmem:[#allocation5 + $0x40] sm:$0xff]  ;;  %398 = vmatpush1.msra.mxu0 %v107_v50 }
  0x58   :  { %v232_v53 = vld [vmem:[#allocation5 + $0x448] sm:$0xff]  ;;  %v231_v55 = vld [vmem:[#allocation5 + $0x440] sm:$0xff]  ;;  %469 = vmatpush1.msra.mxu1 %v235_v51  ;;  %399 = vmatprep.subr.mxu0 %v104_v52 }
  0x59   :  { %v100_v56 = vld [vmem:[#allocation5 + $0x28] sm:$0xff]  ;;  %470 = vmatprep.subr.mxu1 %v232_v53  ;;  %v99_v58 = vld [vmem:[#allocation5 + $0x20] sm:$0xff]  ;;  %400 = vmatpush1.msra.mxu0 %v103_v54 }
  0x5a   :  { %v228_v57 = vld [vmem:[#allocation5 + $0x428] sm:$0xff]  ;;  %v227_v59 = vld [vmem:[#allocation5 + $0x420] sm:$0xff]  ;;  %471 = vmatpush1.msra.mxu1 %v231_v55  ;;  %401 = vmatprep.subr.mxu0 %v100_v56 }
  0x5b   :  { %v96_v60 = vld [vmem:[#allocation5 + $0x8] sm:$0xff]  ;;  %472 = vmatprep.subr.mxu1 %v228_v57  ;;  %v95_v62 = vld [vmem:[#allocation5] sm:$0xff]  ;;  %402 = vmatpush1.msra.mxu0 %v99_v58 }
  0x5c   :  { %v224_v61 = vld [vmem:[#allocation5 + $0x408] sm:$0xff]  ;;  %v223_v63 = vld [vmem:[#allocation5 + $0x400] sm:$0xff]  ;;  %473 = vmatpush1.msra.mxu1 %v227_v59  ;;  %403 = vmatprep.subr.mxu0 %v96_v60 }
  0x5d   :  { %v220_v0 = vld [vmem:[#allocation5 + $0x3e8] sm:$0xff]  ;;  %474 = vmatprep.subr.mxu1 %v224_v61  ;;  %v219_v2 = vld [vmem:[#allocation5 + $0x3e0] sm:$0xff]  ;;  %404 = vmatpush1.msra.mxu0 %v95_v62 }
  0x5e   :  { %v348_v1 = vld [vmem:[#allocation5 + $0x7e8] sm:$0xff]  ;;  %v347_v3 = vld [vmem:[#allocation5 + $0x7e0] sm:$0xff]  ;;  %475 = vmatpush1.msra.mxu1 %v223_v63  ;;  %405 = vmatprep.subr.mxu0 %v220_v0 }
  0x5f   :  { %v216_v4 = vld [vmem:[#allocation5 + $0x3c8] sm:$0xff]  ;;  %476 = vmatprep.subr.mxu1 %v348_v1  ;;  %v215_v6 = vld [vmem:[#allocation5 + $0x3c0] sm:$0xff]  ;;  %406 = vmatpush2.msra.mxu0 %v219_v2  ;;  %v1753_v2 = vld [vmem:[#allocation2 + $0x18] sm:$0xff] }
  0x60   :  { %v344_v5 = vld [vmem:[#allocation5 + $0x7c8] sm:$0xff]  ;;  %v343_v7 = vld [vmem:[#allocation5 + $0x7c0] sm:$0xff]  ;;  %477 = vmatpush2.msra.mxu1 %v347_v3  ;;  %407 = vmatprep.subr.mxu0 %v216_v4  ;;  %v158_v3 = vld [vmem:[#allocation5 + $0x1f8] sm:$0xff] }
  0x61   :  { %v212_v8 = vld [vmem:[#allocation5 + $0x3a8] sm:$0xff]  ;;  %478 = vmatprep.subr.mxu1 %v344_v5  ;;  %v211_v10 = vld [vmem:[#allocation5 + $0x3a0] sm:$0xff]  ;;  %408 = vmatpush2.msra.mxu0 %v215_v6  ;;  %v286_v4 = vld [vmem:[#allocation5 + $0x5f8] sm:$0xff] }
  0x62   :  { %v340_v9 = vld [vmem:[#allocation5 + $0x7a8] sm:$0xff]  ;;  %v339_v11 = vld [vmem:[#allocation5 + $0x7a0] sm:$0xff]  ;;  %479 = vmatpush2.msra.mxu1 %v343_v7  ;;  %409 = vmatprep.subr.mxu0 %v212_v8  ;;  %v1756_v5 = vld [vmem:[#allocation2 + $0x10] sm:$0xff] }
  0x63   :  { %v208_v12 = vld [vmem:[#allocation5 + $0x388] sm:$0xff]  ;;  %480 = vmatprep.subr.mxu1 %v340_v9  ;;  %v207_v14 = vld [vmem:[#allocation5 + $0x380] sm:$0xff]  ;;  %410 = vmatpush2.msra.mxu0 %v211_v10  ;;  %v157_v6 = vld [vmem:[#allocation5 + $0x1f0] sm:$0xff] }
  0x64   :  { %v336_v13 = vld [vmem:[#allocation5 + $0x788] sm:$0xff]  ;;  %v335_v15 = vld [vmem:[#allocation5 + $0x780] sm:$0xff]  ;;  %481 = vmatpush2.msra.mxu1 %v339_v11  ;;  %411 = vmatprep.subr.mxu0 %v208_v12  ;;  %v285_v7 = vld [vmem:[#allocation5 + $0x5f0] sm:$0xff] }
  0x65   :  { %v204_v16 = vld [vmem:[#allocation5 + $0x368] sm:$0xff]  ;;  %482 = vmatprep.subr.mxu1 %v336_v13  ;;  %v203_v18 = vld [vmem:[#allocation5 + $0x360] sm:$0xff]  ;;  %412 = vmatpush2.msra.mxu0 %v207_v14  ;;  %v154_v8 = vld [vmem:[#allocation5 + $0x1d8] sm:$0xff] }
  0x66   :  { %v332_v17 = vld [vmem:[#allocation5 + $0x768] sm:$0xff]  ;;  %v331_v19 = vld [vmem:[#allocation5 + $0x760] sm:$0xff]  ;;  %483 = vmatpush2.msra.mxu1 %v335_v15  ;;  %413 = vmatprep.subr.mxu0 %v204_v16  ;;  %v282_v9 = vld [vmem:[#allocation5 + $0x5d8] sm:$0xff] }
  0x67   :  { %v200_v20 = vld [vmem:[#allocation5 + $0x348] sm:$0xff]  ;;  %484 = vmatprep.subr.mxu1 %v332_v17  ;;  %v199_v22 = vld [vmem:[#allocation5 + $0x340] sm:$0xff]  ;;  %414 = vmatpush2.msra.mxu0 %v203_v18  ;;  %v153_v10 = vld [vmem:[#allocation5 + $0x1d0] sm:$0xff] }
  0x68   :  { %v328_v21 = vld [vmem:[#allocation5 + $0x748] sm:$0xff]  ;;  %v327_v23 = vld [vmem:[#allocation5 + $0x740] sm:$0xff]  ;;  %485 = vmatpush2.msra.mxu1 %v331_v19  ;;  %415 = vmatprep.subr.mxu0 %v200_v20  ;;  %v281_v11 = vld [vmem:[#allocation5 + $0x5d0] sm:$0xff] }
  0x69   :  { %v196_v24 = vld [vmem:[#allocation5 + $0x328] sm:$0xff]  ;;  %486 = vmatprep.subr.mxu1 %v328_v21  ;;  %v195_v26 = vld [vmem:[#allocation5 + $0x320] sm:$0xff]  ;;  %416 = vmatpush2.msra.mxu0 %v199_v22  ;;  %v150_v12 = vld [vmem:[#allocation5 + $0x1b8] sm:$0xff] }
  0x6a   :  { %v324_v25 = vld [vmem:[#allocation5 + $0x728] sm:$0xff]  ;;  %v323_v27 = vld [vmem:[#allocation5 + $0x720] sm:$0xff]  ;;  %487 = vmatpush2.msra.mxu1 %v327_v23  ;;  %417 = vmatprep.subr.mxu0 %v196_v24  ;;  %v278_v13 = vld [vmem:[#allocation5 + $0x5b8] sm:$0xff] }
  0x6b   :  { %v192_v28 = vld [vmem:[#allocation5 + $0x308] sm:$0xff]  ;;  %488 = vmatprep.subr.mxu1 %v324_v25  ;;  %v191_v30 = vld [vmem:[#allocation5 + $0x300] sm:$0xff]  ;;  %418 = vmatpush2.msra.mxu0 %v195_v26  ;;  %v149_v14 = vld [vmem:[#allocation5 + $0x1b0] sm:$0xff] }
  0x6c   :  { %v320_v29 = vld [vmem:[#allocation5 + $0x708] sm:$0xff]  ;;  %v319_v31 = vld [vmem:[#allocation5 + $0x700] sm:$0xff]  ;;  %489 = vmatpush2.msra.mxu1 %v323_v27  ;;  %419 = vmatprep.subr.mxu0 %v192_v28  ;;  %v277_v15 = vld [vmem:[#allocation5 + $0x5b0] sm:$0xff] }
  0x6d   :  { %v188_v32 = vld [vmem:[#allocation5 + $0x2e8] sm:$0xff]  ;;  %490 = vmatprep.subr.mxu1 %v320_v29  ;;  %v187_v34 = vld [vmem:[#allocation5 + $0x2e0] sm:$0xff]  ;;  %420 = vmatpush2.msra.mxu0 %v191_v30  ;;  %v146_v16 = vld [vmem:[#allocation5 + $0x198] sm:$0xff] }
  0x6e   :  { %v316_v33 = vld [vmem:[#allocation5 + $0x6e8] sm:$0xff]  ;;  %v315_v35 = vld [vmem:[#allocation5 + $0x6e0] sm:$0xff]  ;;  %491 = vmatpush2.msra.mxu1 %v319_v31  ;;  %421 = vmatprep.subr.mxu0 %v188_v32  ;;  %v274_v17 = vld [vmem:[#allocation5 + $0x598] sm:$0xff] }
  0x6f   :  { %v184_v36 = vld [vmem:[#allocation5 + $0x2c8] sm:$0xff]  ;;  %492 = vmatprep.subr.mxu1 %v316_v33  ;;  %v183_v38 = vld [vmem:[#allocation5 + $0x2c0] sm:$0xff]  ;;  %422 = vmatpush2.msra.mxu0 %v187_v34  ;;  %v145_v18 = vld [vmem:[#allocation5 + $0x190] sm:$0xff] }
  0x70   :  { %v312_v37 = vld [vmem:[#allocation5 + $0x6c8] sm:$0xff]  ;;  %v311_v39 = vld [vmem:[#allocation5 + $0x6c0] sm:$0xff]  ;;  %493 = vmatpush2.msra.mxu1 %v315_v35  ;;  %423 = vmatprep.subr.mxu0 %v184_v36  ;;  %v273_v19 = vld [vmem:[#allocation5 + $0x590] sm:$0xff] }
  0x71   :  { %v180_v40 = vld [vmem:[#allocation5 + $0x2a8] sm:$0xff]  ;;  %494 = vmatprep.subr.mxu1 %v312_v37  ;;  %v179_v42 = vld [vmem:[#allocation5 + $0x2a0] sm:$0xff]  ;;  %424 = vmatpush2.msra.mxu0 %v183_v38  ;;  %v142_v20 = vld [vmem:[#allocation5 + $0x178] sm:$0xff] }
  0x72   :  { %v308_v41 = vld [vmem:[#allocation5 + $0x6a8] sm:$0xff]  ;;  %v307_v43 = vld [vmem:[#allocation5 + $0x6a0] sm:$0xff]  ;;  %495 = vmatpush2.msra.mxu1 %v311_v39  ;;  %425 = vmatprep.subr.mxu0 %v180_v40  ;;  %v270_v21 = vld [vmem:[#allocation5 + $0x578] sm:$0xff] }
  0x73   :  { %v176_v44 = vld [vmem:[#allocation5 + $0x288] sm:$0xff]  ;;  %496 = vmatprep.subr.mxu1 %v308_v41  ;;  %v175_v46 = vld [vmem:[#allocation5 + $0x280] sm:$0xff]  ;;  %426 = vmatpush2.msra.mxu0 %v179_v42  ;;  %v141_v22 = vld [vmem:[#allocation5 + $0x170] sm:$0xff] }
  0x74   :  { %v304_v45 = vld [vmem:[#allocation5 + $0x688] sm:$0xff]  ;;  %v303_v47 = vld [vmem:[#allocation5 + $0x680] sm:$0xff]  ;;  %497 = vmatpush2.msra.mxu1 %v307_v43  ;;  %427 = vmatprep.subr.mxu0 %v176_v44  ;;  %v269_v23 = vld [vmem:[#allocation5 + $0x570] sm:$0xff] }
  0x75   :  { %v172_v48 = vld [vmem:[#allocation5 + $0x268] sm:$0xff]  ;;  %498 = vmatprep.subr.mxu1 %v304_v45  ;;  %v171_v50 = vld [vmem:[#allocation5 + $0x260] sm:$0xff]  ;;  %428 = vmatpush2.msra.mxu0 %v175_v46  ;;  %v138_v24 = vld [vmem:[#allocation5 + $0x158] sm:$0xff] }
  0x76   :  { %v300_v49 = vld [vmem:[#allocation5 + $0x668] sm:$0xff]  ;;  %v299_v51 = vld [vmem:[#allocation5 + $0x660] sm:$0xff]  ;;  %499 = vmatpush2.msra.mxu1 %v303_v47  ;;  %429 = vmatprep.subr.mxu0 %v172_v48  ;;  %v266_v25 = vld [vmem:[#allocation5 + $0x558] sm:$0xff] }
  0x77   :  { %v168_v52 = vld [vmem:[#allocation5 + $0x248] sm:$0xff]  ;;  %500 = vmatprep.subr.mxu1 %v300_v49  ;;  %v167_v54 = vld [vmem:[#allocation5 + $0x240] sm:$0xff]  ;;  %430 = vmatpush2.msra.mxu0 %v171_v50  ;;  %v137_v26 = vld [vmem:[#allocation5 + $0x150] sm:$0xff] }
  0x78   :  { %v296_v53 = vld [vmem:[#allocation5 + $0x648] sm:$0xff]  ;;  %v295_v55 = vld [vmem:[#allocation5 + $0x640] sm:$0xff]  ;;  %501 = vmatpush2.msra.mxu1 %v299_v51  ;;  %431 = vmatprep.subr.mxu0 %v168_v52  ;;  %v265_v27 = vld [vmem:[#allocation5 + $0x550] sm:$0xff] }
  0x79   :  { %v164_v56 = vld [vmem:[#allocation5 + $0x228] sm:$0xff]  ;;  %502 = vmatprep.subr.mxu1 %v296_v53  ;;  %v163_v58 = vld [vmem:[#allocation5 + $0x220] sm:$0xff]  ;;  %432 = vmatpush2.msra.mxu0 %v167_v54  ;;  %v134_v28 = vld [vmem:[#allocation5 + $0x138] sm:$0xff] }
  0x7a   :  { %v292_v57 = vld [vmem:[#allocation5 + $0x628] sm:$0xff]  ;;  %v291_v59 = vld [vmem:[#allocation5 + $0x620] sm:$0xff]  ;;  %503 = vmatpush2.msra.mxu1 %v295_v55  ;;  %433 = vmatprep.subr.mxu0 %v164_v56  ;;  %v262_v29 = vld [vmem:[#allocation5 + $0x538] sm:$0xff] }
  0x7b   :  { %v160_v60 = vld [vmem:[#allocation5 + $0x208] sm:$0xff]  ;;  %504 = vmatprep.subr.mxu1 %v292_v57  ;;  %v159_v62 = vld [vmem:[#allocation5 + $0x200] sm:$0xff]  ;;  %434 = vmatpush2.msra.mxu0 %v163_v58  ;;  %v133_v30 = vld [vmem:[#allocation5 + $0x130] sm:$0xff] }
  0x7c   :  { %v288_v61 = vld [vmem:[#allocation5 + $0x608] sm:$0xff]  ;;  %505 = vmatpush2.msra.mxu1 %v291_v59  ;;  %v287_v0 = vld [vmem:[#allocation5 + $0x600] sm:$0xff]  ;;  %435 = vmatprep.subr.mxu0 %v160_v60  ;;  %v261_v31 = vld [vmem:[#allocation5 + $0x530] sm:$0xff] }
  0x7d   :  { %v1749_v63 = vld [vmem:[#allocation2 + $0x8] sm:$0xff]  ;;  %v1751_v1 = vld [vmem:[#allocation2] sm:$0xff]  ;;  %506 = vmatprep.subr.mxu1 %v288_v61  ;;  %436 = vmatpush2.msra.mxu0 %v159_v62  ;;  %v130_v32 = vld [vmem:[#allocation5 + $0x118] sm:$0xff] }
  0x7e   :  { %437 = vmatprep.mubr.f32.mxu0 %v1749_v63  ;;  %507 = vmatpush2.msra.mxu1 %v287_v0  ;;  %v258_v33 = vld [vmem:[#allocation5 + $0x518] sm:$0xff]  ;;  %v129_v34 = vld [vmem:[#allocation5 + $0x110] sm:$0xff] }
  0x7f   :  { %438 = vmatmul.mubr.f32.vlgmr.msra.gmra.mxu0 %v1751_v1  ;;  %508 = vmatprep.mubr.f32.mxu1 %v1753_v2  ;;  %v257_v35 = vld [vmem:[#allocation5 + $0x510] sm:$0xff]  ;;  %v126_v36 = vld [vmem:[#allocation5 + $0xf8] sm:$0xff] }
  0x80   :  { %515 = vmatprep.subr.mxu0 %v158_v3  ;;  %586 = vmatprep.subr.mxu1 %v286_v4  ;;  %v254_v37 = vld [vmem:[#allocation5 + $0x4f8] sm:$0xff]  ;;  %v125_v38 = vld [vmem:[#allocation5 + $0xf0] sm:$0xff] }
  0x81   :  { %509 = vmatmul.mubr.f32.vlgmr.msra.gmra.mxu1 %v1756_v5  ;;  %516 = vmatpush1.msra.mxu0 %v157_v6  ;;  %v253_v39 = vld [vmem:[#allocation5 + $0x4f0] sm:$0xff]  ;;  %v122_v40 = vld [vmem:[#allocation5 + $0xd8] sm:$0xff] }
  0x82   :  { %587 = vmatpush1.msra.mxu1 %v285_v7  ;;  %517 = vmatprep.subr.mxu0 %v154_v8  ;;  %v250_v41 = vld [vmem:[#allocation5 + $0x4d8] sm:$0xff]  ;;  %v121_v42 = vld [vmem:[#allocation5 + $0xd0] sm:$0xff] }
  0x83   :  { %588 = vmatprep.subr.mxu1 %v282_v9  ;;  %518 = vmatpush1.msra.mxu0 %v153_v10  ;;  %v249_v43 = vld [vmem:[#allocation5 + $0x4d0] sm:$0xff]  ;;  %v118_v44 = vld [vmem:[#allocation5 + $0xb8] sm:$0xff] }
  0x84   :  { %589 = vmatpush1.msra.mxu1 %v281_v11  ;;  %519 = vmatprep.subr.mxu0 %v150_v12  ;;  %v246_v45 = vld [vmem:[#allocation5 + $0x4b8] sm:$0xff]  ;;  %v117_v46 = vld [vmem:[#allocation5 + $0xb0] sm:$0xff] }
  0x85   :  { %590 = vmatprep.subr.mxu1 %v278_v13  ;;  %520 = vmatpush1.msra.mxu0 %v149_v14  ;;  %v245_v47 = vld [vmem:[#allocation5 + $0x4b0] sm:$0xff]  ;;  %v114_v48 = vld [vmem:[#allocation5 + $0x98] sm:$0xff] }
  0x86   :  { %591 = vmatpush1.msra.mxu1 %v277_v15  ;;  %521 = vmatprep.subr.mxu0 %v146_v16  ;;  %v242_v49 = vld [vmem:[#allocation5 + $0x498] sm:$0xff]  ;;  %v113_v50 = vld [vmem:[#allocation5 + $0x90] sm:$0xff] }
  0x87   :  { %592 = vmatprep.subr.mxu1 %v274_v17  ;;  %522 = vmatpush1.msra.mxu0 %v145_v18  ;;  %v241_v51 = vld [vmem:[#allocation5 + $0x490] sm:$0xff]  ;;  %v110_v52 = vld [vmem:[#allocation5 + $0x78] sm:$0xff] }
  0x88   :  { %593 = vmatpush1.msra.mxu1 %v273_v19  ;;  %523 = vmatprep.subr.mxu0 %v142_v20  ;;  %v238_v53 = vld [vmem:[#allocation5 + $0x478] sm:$0xff]  ;;  %v109_v54 = vld [vmem:[#allocation5 + $0x70] sm:$0xff] }
  0x89   :  { %594 = vmatprep.subr.mxu1 %v270_v21  ;;  %524 = vmatpush1.msra.mxu0 %v141_v22  ;;  %v237_v55 = vld [vmem:[#allocation5 + $0x470] sm:$0xff]  ;;  %v106_v56 = vld [vmem:[#allocation5 + $0x58] sm:$0xff] }
  0x8a   :  { %595 = vmatpush1.msra.mxu1 %v269_v23  ;;  %525 = vmatprep.subr.mxu0 %v138_v24  ;;  %v234_v57 = vld [vmem:[#allocation5 + $0x458] sm:$0xff]  ;;  %v105_v58 = vld [vmem:[#allocation5 + $0x50] sm:$0xff] }
  0x8b   :  { %596 = vmatprep.subr.mxu1 %v266_v25  ;;  %526 = vmatpush1.msra.mxu0 %v137_v26  ;;  %v233_v59 = vld [vmem:[#allocation5 + $0x450] sm:$0xff]  ;;  %v102_v60 = vld [vmem:[#allocation5 + $0x38] sm:$0xff] }
  0x8c   :  { %597 = vmatpush1.msra.mxu1 %v265_v27  ;;  %527 = vmatprep.subr.mxu0 %v134_v28  ;;  %v230_v61 = vld [vmem:[#allocation5 + $0x438] sm:$0xff]  ;;  %v101_v62 = vld [vmem:[#allocation5 + $0x30] sm:$0xff] }
  0x8d   :  { %598 = vmatprep.subr.mxu1 %v262_v29  ;;  %528 = vmatpush1.msra.mxu0 %v133_v30  ;;  %v229_v0 = vld [vmem:[#allocation5 + $0x430] sm:$0xff]  ;;  %v98_v3 = vld [vmem:[#allocation5 + $0x18] sm:$0xff] }
  0x8e   :  { %599 = vmatpush1.msra.mxu1 %v261_v31  ;;  %529 = vmatprep.subr.mxu0 %v130_v32  ;;  %v226_v4 = vld [vmem:[#allocation5 + $0x418] sm:$0xff]  ;;  %v97_v6 = vld [vmem:[#allocation5 + $0x10] sm:$0xff] }
  0x8f   :  { %600 = vmatprep.subr.mxu1 %v258_v33  ;;  %530 = vmatpush1.msra.mxu0 %v129_v34  ;;  %v225_v7 = vld [vmem:[#allocation5 + $0x410] sm:$0xff]  ;;  %v222_v8 = vld [vmem:[#allocation5 + $0x3f8] sm:$0xff] }
  0x90   :  { %601 = vmatpush1.msra.mxu1 %v257_v35  ;;  %531 = vmatprep.subr.mxu0 %v126_v36  ;;  %v350_v9 = vld [vmem:[#allocation5 + $0x7f8] sm:$0xff]  ;;  %v221_v10 = vld [vmem:[#allocation5 + $0x3f0] sm:$0xff] }
  0x91   :  { %602 = vmatprep.subr.mxu1 %v254_v37  ;;  %532 = vmatpush1.msra.mxu0 %v125_v38  ;;  %v349_v11 = vld [vmem:[#allocation5 + $0x7f0] sm:$0xff]  ;;  %v218_v12 = vld [vmem:[#allocation5 + $0x3d8] sm:$0xff] }
  0x92   :  { %603 = vmatpush1.msra.mxu1 %v253_v39  ;;  %533 = vmatprep.subr.mxu0 %v122_v40  ;;  %v346_v13 = vld [vmem:[#allocation5 + $0x7d8] sm:$0xff]  ;;  %v217_v14 = vld [vmem:[#allocation5 + $0x3d0] sm:$0xff] }
  0x93   :  { %604 = vmatprep.subr.mxu1 %v250_v41  ;;  %534 = vmatpush1.msra.mxu0 %v121_v42  ;;  %v345_v15 = vld [vmem:[#allocation5 + $0x7d0] sm:$0xff]  ;;  %v214_v16 = vld [vmem:[#allocation5 + $0x3b8] sm:$0xff] }
  0x94   :  { %605 = vmatpush1.msra.mxu1 %v249_v43  ;;  %535 = vmatprep.subr.mxu0 %v118_v44  ;;  %v342_v17 = vld [vmem:[#allocation5 + $0x7b8] sm:$0xff]  ;;  %v213_v18 = vld [vmem:[#allocation5 + $0x3b0] sm:$0xff] }
  0x95   :  { %606 = vmatprep.subr.mxu1 %v246_v45  ;;  %536 = vmatpush1.msra.mxu0 %v117_v46  ;;  %v341_v19 = vld [vmem:[#allocation5 + $0x7b0] sm:$0xff]  ;;  %v210_v20 = vld [vmem:[#allocation5 + $0x398] sm:$0xff] }
  0x96   :  { %607 = vmatpush1.msra.mxu1 %v245_v47  ;;  %537 = vmatprep.subr.mxu0 %v114_v48  ;;  %v338_v21 = vld [vmem:[#allocation5 + $0x798] sm:$0xff]  ;;  %v209_v22 = vld [vmem:[#allocation5 + $0x390] sm:$0xff] }
  0x97   :  { %608 = vmatprep.subr.mxu1 %v242_v49  ;;  %538 = vmatpush1.msra.mxu0 %v113_v50  ;;  %v337_v23 = vld [vmem:[#allocation5 + $0x790] sm:$0xff]  ;;  %v206_v24 = vld [vmem:[#allocation5 + $0x378] sm:$0xff] }
  0x98   :  { %609 = vmatpush1.msra.mxu1 %v241_v51  ;;  %539 = vmatprep.subr.mxu0 %v110_v52  ;;  %v334_v25 = vld [vmem:[#allocation5 + $0x778] sm:$0xff]  ;;  %v205_v26 = vld [vmem:[#allocation5 + $0x370] sm:$0xff] }
  0x99   :  { %610 = vmatprep.subr.mxu1 %v238_v53  ;;  %540 = vmatpush1.msra.mxu0 %v109_v54  ;;  %v333_v27 = vld [vmem:[#allocation5 + $0x770] sm:$0xff]  ;;  %v202_v28 = vld [vmem:[#allocation5 + $0x358] sm:$0xff] }
  0x9a   :  { %611 = vmatpush1.msra.mxu1 %v237_v55  ;;  %541 = vmatprep.subr.mxu0 %v106_v56  ;;  %v330_v29 = vld [vmem:[#allocation5 + $0x758] sm:$0xff]  ;;  %v201_v30 = vld [vmem:[#allocation5 + $0x350] sm:$0xff] }
  0x9b   :  { %612 = vmatprep.subr.mxu1 %v234_v57  ;;  %542 = vmatpush1.msra.mxu0 %v105_v58  ;;  %v329_v31 = vld [vmem:[#allocation5 + $0x750] sm:$0xff]  ;;  %v198_v32 = vld [vmem:[#allocation5 + $0x338] sm:$0xff] }
  0x9c   :  { %613 = vmatpush1.msra.mxu1 %v233_v59  ;;  %543 = vmatprep.subr.mxu0 %v102_v60  ;;  %v326_v33 = vld [vmem:[#allocation5 + $0x738] sm:$0xff]  ;;  %v197_v34 = vld [vmem:[#allocation5 + $0x330] sm:$0xff] }
  0x9d   :  { %614 = vmatprep.subr.mxu1 %v230_v61  ;;  %544 = vmatpush1.msra.mxu0 %v101_v62  ;;  %v325_v35 = vld [vmem:[#allocation5 + $0x730] sm:$0xff]  ;;  %v194_v36 = vld [vmem:[#allocation5 + $0x318] sm:$0xff] }
  0x9e   :  { %615 = vmatpush1.msra.mxu1 %v229_v0  ;;  %545 = vmatprep.subr.mxu0 %v98_v3  ;;  %v322_v37 = vld [vmem:[#allocation5 + $0x718] sm:$0xff]  ;;  %v193_v38 = vld [vmem:[#allocation5 + $0x310] sm:$0xff] }
  0x9f   :  { %616 = vmatprep.subr.mxu1 %v226_v4  ;;  %546 = vmatpush1.msra.mxu0 %v97_v6  ;;  %v321_v39 = vld [vmem:[#allocation5 + $0x710] sm:$0xff]  ;;  %v190_v40 = vld [vmem:[#allocation5 + $0x2f8] sm:$0xff] }
  0xa0   :  { %617 = vmatpush1.msra.mxu1 %v225_v7  ;;  %547 = vmatprep.subr.mxu0 %v222_v8  ;;  %v318_v41 = vld [vmem:[#allocation5 + $0x6f8] sm:$0xff]  ;;  %v189_v42 = vld [vmem:[#allocation5 + $0x2f0] sm:$0xff] }
  0xa1   :  { %618 = vmatprep.subr.mxu1 %v350_v9  ;;  %548 = vmatpush2.msra.mxu0 %v221_v10  ;;  %v317_v43 = vld [vmem:[#allocation5 + $0x6f0] sm:$0xff]  ;;  %v186_v44 = vld [vmem:[#allocation5 + $0x2d8] sm:$0xff] }
  0xa2   :  { %619 = vmatpush2.msra.mxu1 %v349_v11  ;;  %549 = vmatprep.subr.mxu0 %v218_v12  ;;  %v314_v45 = vld [vmem:[#allocation5 + $0x6d8] sm:$0xff]  ;;  %v185_v46 = vld [vmem:[#allocation5 + $0x2d0] sm:$0xff] }
  0xa3   :  { %620 = vmatprep.subr.mxu1 %v346_v13  ;;  %550 = vmatpush2.msra.mxu0 %v217_v14  ;;  %v313_v47 = vld [vmem:[#allocation5 + $0x6d0] sm:$0xff]  ;;  %v182_v48 = vld [vmem:[#allocation5 + $0x2b8] sm:$0xff]  ;;  %v721_v13 = vld [vmem:[#allocation8 + $0x1e0] sm:$0xff] }
  0xa4   :  { %621 = vmatpush2.msra.mxu1 %v345_v15  ;;  %551 = vmatprep.subr.mxu0 %v214_v16  ;;  %v310_v49 = vld [vmem:[#allocation5 + $0x6b8] sm:$0xff]  ;;  %v181_v50 = vld [vmem:[#allocation5 + $0x2b0] sm:$0xff]  ;;  %v717_v15 = vld [vmem:[#allocation8 + $0x1c0] sm:$0xff] }
  0xa5   :  { %622 = vmatprep.subr.mxu1 %v342_v17  ;;  %552 = vmatpush2.msra.mxu0 %v213_v18  ;;  %v309_v51 = vld [vmem:[#allocation5 + $0x6b0] sm:$0xff]  ;;  %v178_v52 = vld [vmem:[#allocation5 + $0x298] sm:$0xff]  ;;  %v713_v17 = vld [vmem:[#allocation8 + $0x1a0] sm:$0xff] }
  0xa6   :  { %623 = vmatpush2.msra.mxu1 %v341_v19  ;;  %553 = vmatprep.subr.mxu0 %v210_v20  ;;  %v306_v53 = vld [vmem:[#allocation5 + $0x698] sm:$0xff]  ;;  %v177_v54 = vld [vmem:[#allocation5 + $0x290] sm:$0xff] }
  0xa7   :  { %624 = vmatprep.subr.mxu1 %v338_v21  ;;  %554 = vmatpush2.msra.mxu0 %v209_v22  ;;  %v305_v55 = vld [vmem:[#allocation5 + $0x690] sm:$0xff]  ;;  %v174_v56 = vld [vmem:[#allocation5 + $0x278] sm:$0xff]  ;;  %v697_v21 = vld [vmem:[#allocation8 + $0x120] sm:$0xff] }
  0xa8   :  { %625 = vmatpush2.msra.mxu1 %v337_v23  ;;  %555 = vmatprep.subr.mxu0 %v206_v24  ;;  %v302_v57 = vld [vmem:[#allocation5 + $0x678] sm:$0xff]  ;;  %v173_v58 = vld [vmem:[#allocation5 + $0x270] sm:$0xff]  ;;  %v693_v23 = vld [vmem:[#allocation8 + $0x100] sm:$0xff] }
  0xa9   :  { %626 = vmatprep.subr.mxu1 %v334_v25  ;;  %556 = vmatpush2.msra.mxu0 %v205_v26  ;;  %v301_v59 = vld [vmem:[#allocation5 + $0x670] sm:$0xff]  ;;  %v170_v60 = vld [vmem:[#allocation5 + $0x258] sm:$0xff]  ;;  %v689_v25 = vld [vmem:[#allocation8 + $0xe0] sm:$0xff] }
  0xaa   :  { %627 = vmatpush2.msra.mxu1 %v333_v27  ;;  %557 = vmatprep.subr.mxu0 %v202_v28  ;;  %v298_v61 = vld [vmem:[#allocation5 + $0x658] sm:$0xff]  ;;  %v169_v62 = vld [vmem:[#allocation5 + $0x250] sm:$0xff]  ;;  %v685_v27 = vld [vmem:[#allocation8 + $0xc0] sm:$0xff] }
  0xab   :  { %628 = vmatprep.subr.mxu1 %v330_v29  ;;  %558 = vmatpush2.msra.mxu0 %v201_v30  ;;  %v297_v0 = vld [vmem:[#allocation5 + $0x650] sm:$0xff]  ;;  %v166_v3 = vld [vmem:[#allocation5 + $0x238] sm:$0xff]  ;;  %v681_v30 = vld [vmem:[#allocation8 + $0xa0] sm:$0xff] }
  0xac   :  { %629 = vmatpush2.msra.mxu1 %v329_v31  ;;  %559 = vmatprep.subr.mxu0 %v198_v32  ;;  %v294_v4 = vld [vmem:[#allocation5 + $0x638] sm:$0xff]  ;;  %v165_v6 = vld [vmem:[#allocation5 + $0x230] sm:$0xff]  ;;  %v849_v31 = vld [vmem:[#allocation8 + $0x5e0] sm:$0xff] }
  0xad   :  { %630 = vmatprep.subr.mxu1 %v326_v33  ;;  %560 = vmatpush2.msra.mxu0 %v197_v34  ;;  %v293_v7 = vld [vmem:[#allocation5 + $0x630] sm:$0xff]  ;;  %v162_v8 = vld [vmem:[#allocation5 + $0x218] sm:$0xff]  ;;  %v677_v34 = vld [vmem:[#allocation8 + $0x80] sm:$0xff] }
  0xae   :  { %631 = vmatpush2.msra.mxu1 %v325_v35  ;;  %561 = vmatprep.subr.mxu0 %v194_v36  ;;  %v290_v9 = vld [vmem:[#allocation5 + $0x618] sm:$0xff]  ;;  %v161_v10 = vld [vmem:[#allocation5 + $0x210] sm:$0xff]  ;;  %v845_v35 = vld [vmem:[#allocation8 + $0x5c0] sm:$0xff] }
  0xaf   :  { %632 = vmatprep.subr.mxu1 %v322_v37  ;;  %562 = vmatpush2.msra.mxu0 %v193_v38  ;;  %v289_v11 = vld [vmem:[#allocation5 + $0x610] sm:$0xff]  ;;  %v673_v38 = vld [vmem:[#allocation8 + $0x60] sm:$0xff] }
  0xb0   :  { %633 = vmatpush2.msra.mxu1 %v321_v39  ;;  %563 = vmatprep.subr.mxu0 %v190_v40  ;;  %v722_v12 = vld [vmem:[#allocation8 + $0x1e8] sm:$0xff]  ;;  %v841_v39 = vld [vmem:[#allocation8 + $0x5a0] sm:$0xff] }
  0xb1   :  { %634 = vmatprep.subr.mxu1 %v318_v41  ;;  %564 = vmatpush2.msra.mxu0 %v189_v42  ;;  %v718_v14 = vld [vmem:[#allocation8 + $0x1c8] sm:$0xff]  ;;  %v669_v42 = vld [vmem:[#allocation8 + $0x40] sm:$0xff] }
  0xb2   :  { %635 = vmatpush2.msra.mxu1 %v317_v43  ;;  %565 = vmatprep.subr.mxu0 %v186_v44  ;;  %v714_v16 = vld [vmem:[#allocation8 + $0x1a8] sm:$0xff]  ;;  %v837_v43 = vld [vmem:[#allocation8 + $0x580] sm:$0xff] }
  0xb3   :  { %636 = vmatprep.subr.mxu1 %v314_v45  ;;  %566 = vmatpush2.msra.mxu0 %v185_v46  ;;  %v710_v18 = vld [vmem:[#allocation8 + $0x188] sm:$0xff]  ;;  %v665_v46 = vld [vmem:[#allocation8 + $0x20] sm:$0xff] }
  0xb4   :  { %637 = vmatpush2.msra.mxu1 %v313_v47  ;;  %567 = vmatprep.subr.mxu0 %v182_v48  ;;  %v706_v19 = vld [vmem:[#allocation8 + $0x168] sm:$0xff]  ;;  %v833_v47 = vld [vmem:[#allocation8 + $0x560] sm:$0xff] }
  0xb5   :  { %638 = vmatprep.subr.mxu1 %v310_v49  ;;  %568 = vmatpush2.msra.mxu0 %v181_v50  ;;  %v702_v20 = vld [vmem:[#allocation8 + $0x148] sm:$0xff]  ;;  %v661_v50 = vld [vmem:[#allocation8] sm:$0xff] }
  0xb6   :  { %639 = vmatpush2.msra.mxu1 %v309_v51  ;;  %569 = vmatprep.subr.mxu0 %v178_v52  ;;  %v694_v22 = vld [vmem:[#allocation8 + $0x108] sm:$0xff]  ;;  %v829_v51 = vld [vmem:[#allocation8 + $0x540] sm:$0xff] }
  0xb7   :  { %640 = vmatprep.subr.mxu1 %v306_v53  ;;  %570 = vmatpush2.msra.mxu0 %v177_v54  ;;  %v690_v24 = vld [vmem:[#allocation8 + $0xe8] sm:$0xff]  ;;  %v785_v54 = vld [vmem:[#allocation8 + $0x3e0] sm:$0xff] }
  0xb8   :  { %641 = vmatpush2.msra.mxu1 %v305_v55  ;;  %571 = vmatprep.subr.mxu0 %v174_v56  ;;  %v686_v26 = vld [vmem:[#allocation8 + $0xc8] sm:$0xff]  ;;  %v825_v55 = vld [vmem:[#allocation8 + $0x520] sm:$0xff] }
  0xb9   :  { %642 = vmatprep.subr.mxu1 %v302_v57  ;;  %572 = vmatpush2.msra.mxu0 %v173_v58  ;;  %v682_v28 = vld [vmem:[#allocation8 + $0xa8] sm:$0xff]  ;;  %v781_v58 = vld [vmem:[#allocation8 + $0x3c0] sm:$0xff] }
  0xba   :  { %643 = vmatpush2.msra.mxu1 %v301_v59  ;;  %573 = vmatprep.subr.mxu0 %v170_v60  ;;  %v850_v29 = vld [vmem:[#allocation8 + $0x5e8] sm:$0xff]  ;;  %v821_v59 = vld [vmem:[#allocation8 + $0x500] sm:$0xff] }
  0xbb   :  { %644 = vmatprep.subr.mxu1 %v298_v61  ;;  %574 = vmatpush2.msra.mxu0 %v169_v62  ;;  %v678_v32 = vld [vmem:[#allocation8 + $0x88] sm:$0xff]  ;;  %v777_v62 = vld [vmem:[#allocation8 + $0x3a0] sm:$0xff] }
  0xbc   :  { %645 = vmatpush2.msra.mxu1 %v297_v0  ;;  %575 = vmatprep.subr.mxu0 %v166_v3  ;;  %v846_v33 = vld [vmem:[#allocation8 + $0x5c8] sm:$0xff]  ;;  %v817_v0 = vld [vmem:[#allocation8 + $0x4e0] sm:$0xff] }
  0xbd   :  { %646 = vmatprep.subr.mxu1 %v294_v4  ;;  %576 = vmatpush2.msra.mxu0 %v165_v6  ;;  %v674_v36 = vld [vmem:[#allocation8 + $0x68] sm:$0xff]  ;;  %v773_v6 = vld [vmem:[#allocation8 + $0x380] sm:$0xff] }
  0xbe   :  { %647 = vmatpush2.msra.mxu1 %v293_v7  ;;  %577 = vmatprep.subr.mxu0 %v162_v8  ;;  %v842_v37 = vld [vmem:[#allocation8 + $0x5a8] sm:$0xff]  ;;  %v813_v7 = vld [vmem:[#allocation8 + $0x4c0] sm:$0xff] }
  0xbf   :  { %648 = vmatprep.subr.mxu1 %v290_v9  ;;  %578 = vmatpush2.msra.mxu0 %v161_v10  ;;  %v670_v40 = vld [vmem:[#allocation8 + $0x48] sm:$0xff]  ;;  %v769_v10 = vld [vmem:[#allocation8 + $0x360] sm:$0xff] }
  0xc0   :  { %579 = vmatprep.mubr.f32.mxu0 %v1749_v63  ;;  %649 = vmatpush2.msra.mxu1 %v289_v11  ;;  %v709_v63 = vld [vmem:[#allocation8 + $0x180] sm:$0xff]  ;;  %v838_v41 = vld [vmem:[#allocation8 + $0x588] sm:$0xff] }
  0xc1   :  { %650 = vmatprep.mubr.f32.mxu1 %v1753_v2  ;;  %580 = vmatmul.mubr.f32.vlgmr.msra.gmra.mxu0 %v1751_v1  ;;  %v705_v2 = vld [vmem:[#allocation8 + $0x160] sm:$0xff]  ;;  %v666_v44 = vld [vmem:[#allocation8 + $0x28] sm:$0xff] }
  0xc2   :  { %651 = vmatmul.mubr.f32.vlgmr.msra.gmra.mxu1 %v1756_v5  ;;  %939 = vmatprep.subr.mxu0 %v722_v12  ;;  %v701_v1 = vld [vmem:[#allocation8 + $0x140] sm:$0xff]  ;;  %v698_v5 = vld [vmem:[#allocation8 + $0x128] sm:$0xff] }
  0xc3   :  { %940 = vmatpush1.msra.mxu0 %v721_v13  ;;  %1010 = vmatprep.subr.mxu1 %v850_v29  ;;  %v834_v45 = vld [vmem:[#allocation8 + $0x568] sm:$0xff]  ;;  %v809_v11 = vld [vmem:[#allocation8 + $0x4a0] sm:$0xff] }
  0xc4   :  { %941 = vmatprep.subr.mxu0 %v718_v14  ;;  %1011 = vmatpush1.msra.mxu1 %v849_v31  ;;  %v662_v48 = vld [vmem:[#allocation8 + $0x8] sm:$0xff]  ;;  %v765_v14 = vld [vmem:[#allocation8 + $0x340] sm:$0xff] }
  0xc5   :  { %942 = vmatpush1.msra.mxu0 %v717_v15  ;;  %1012 = vmatprep.subr.mxu1 %v846_v33  ;;  %v830_v49 = vld [vmem:[#allocation8 + $0x548] sm:$0xff]  ;;  %v805_v15 = vld [vmem:[#allocation8 + $0x480] sm:$0xff] }
  0xc6   :  { %943 = vmatprep.subr.mxu0 %v714_v16  ;;  %1013 = vmatpush1.msra.mxu1 %v845_v35  ;;  %v786_v52 = vld [vmem:[#allocation8 + $0x3e8] sm:$0xff]  ;;  %v913_v31 = vld [vmem:[#allocation8 + $0x7e0] sm:$0xff] }
  0xc7   :  { %944 = vmatpush1.msra.mxu0 %v713_v17  ;;  %1014 = vmatprep.subr.mxu1 %v842_v37  ;;  %v826_v53 = vld [vmem:[#allocation8 + $0x528] sm:$0xff]  ;;  %v909_v35 = vld [vmem:[#allocation8 + $0x7c0] sm:$0xff] }
  0xc8   :  { %945 = vmatprep.subr.mxu0 %v710_v18  ;;  %1015 = vmatpush1.msra.mxu1 %v841_v39  ;;  %v782_v56 = vld [vmem:[#allocation8 + $0x3c8] sm:$0xff]  ;;  %v761_v18 = vld [vmem:[#allocation8 + $0x320] sm:$0xff] }
  0xc9   :  { %946 = vmatpush1.msra.mxu0 %v709_v63  ;;  %1016 = vmatprep.subr.mxu1 %v838_v41  ;;  %v822_v57 = vld [vmem:[#allocation8 + $0x508] sm:$0xff]  ;;  %v801_v63 = vld [vmem:[#allocation8 + $0x460] sm:$0xff] }
  0xca   :  { %947 = vmatprep.subr.mxu0 %v706_v19  ;;  %1017 = vmatpush1.msra.mxu1 %v837_v43  ;;  %v778_v60 = vld [vmem:[#allocation8 + $0x3a8] sm:$0xff]  ;;  %v905_v39 = vld [vmem:[#allocation8 + $0x7a0] sm:$0xff] }
  0xcb   :  { %948 = vmatpush1.msra.mxu0 %v705_v2  ;;  %1018 = vmatprep.subr.mxu1 %v834_v45  ;;  %v818_v61 = vld [vmem:[#allocation8 + $0x4e8] sm:$0xff]  ;;  %v901_v43 = vld [vmem:[#allocation8 + $0x780] sm:$0xff] }
  0xcc   :  { %949 = vmatprep.subr.mxu0 %v702_v20  ;;  %1019 = vmatpush1.msra.mxu1 %v833_v47  ;;  %v774_v3 = vld [vmem:[#allocation8 + $0x388] sm:$0xff]  ;;  %v757_v20 = vld [vmem:[#allocation8 + $0x300] sm:$0xff] }
  0xcd   :  { %950 = vmatpush1.msra.mxu0 %v701_v1  ;;  %1020 = vmatprep.subr.mxu1 %v830_v49  ;;  %v814_v4 = vld [vmem:[#allocation8 + $0x4c8] sm:$0xff]  ;;  %v797_v1 = vld [vmem:[#allocation8 + $0x440] sm:$0xff] }
  0xce   :  { %951 = vmatprep.subr.mxu0 %v698_v5  ;;  %1021 = vmatpush1.msra.mxu1 %v829_v51  ;;  %v770_v8 = vld [vmem:[#allocation8 + $0x368] sm:$0xff]  ;;  %v897_v47 = vld [vmem:[#allocation8 + $0x760] sm:$0xff]  ;;  %v724_v51 = vld [vmem:[#allocation8 + $0x1f8] sm:$0xff] }
  0xcf   :  { %952 = vmatpush1.msra.mxu0 %v697_v21  ;;  %1022 = vmatprep.subr.mxu1 %v826_v53  ;;  %v810_v9 = vld [vmem:[#allocation8 + $0x4a8] sm:$0xff] }
  0xd0   :  { %953 = vmatprep.subr.mxu0 %v694_v22  ;;  %1023 = vmatpush1.msra.mxu1 %v825_v55  ;;  %v766_v12 = vld [vmem:[#allocation8 + $0x348] sm:$0xff]  ;;  %v753_v22 = vld [vmem:[#allocation8 + $0x2e0] sm:$0xff] }
  0xd1   :  { %954 = vmatpush1.msra.mxu0 %v693_v23  ;;  %1024 = vmatprep.subr.mxu1 %v822_v57  ;;  %v806_v13 = vld [vmem:[#allocation8 + $0x488] sm:$0xff]  ;;  %v793_v23 = vld [vmem:[#allocation8 + $0x420] sm:$0xff] }
  0xd2   :  { %955 = vmatprep.subr.mxu0 %v690_v24  ;;  %1025 = vmatpush1.msra.mxu1 %v821_v59  ;;  %v762_v16 = vld [vmem:[#allocation8 + $0x328] sm:$0xff] }
  0xd3   :  { %956 = vmatpush1.msra.mxu0 %v689_v25  ;;  %1026 = vmatprep.subr.mxu1 %v818_v61  ;;  %v802_v17 = vld [vmem:[#allocation8 + $0x468] sm:$0xff] }
  0xd4   :  { %957 = vmatprep.subr.mxu0 %v686_v26  ;;  %1027 = vmatpush1.msra.mxu1 %v817_v0  ;;  %v758_v19 = vld [vmem:[#allocation8 + $0x308] sm:$0xff]  ;;  %v749_v26 = vld [vmem:[#allocation8 + $0x2c0] sm:$0xff] }
  0xd5   :  { %958 = vmatpush1.msra.mxu0 %v685_v27  ;;  %1028 = vmatprep.subr.mxu1 %v814_v4  ;;  %v798_v2 = vld [vmem:[#allocation8 + $0x448] sm:$0xff]  ;;  %v789_v27 = vld [vmem:[#allocation8 + $0x400] sm:$0xff] }
  0xd6   :  { %959 = vmatprep.subr.mxu0 %v682_v28  ;;  %1029 = vmatpush1.msra.mxu1 %v813_v7  ;;  %v754_v5 = vld [vmem:[#allocation8 + $0x2e8] sm:$0xff] }
  0xd7   :  { %960 = vmatpush1.msra.mxu0 %v681_v30  ;;  %1030 = vmatprep.subr.mxu1 %v810_v9  ;;  %v794_v21 = vld [vmem:[#allocation8 + $0x428] sm:$0xff]  ;;  %v745_v30 = vld [vmem:[#allocation8 + $0x2a0] sm:$0xff] }
  0xd8   :  { %961 = vmatprep.subr.mxu0 %v678_v32  ;;  %1031 = vmatpush1.msra.mxu1 %v809_v11  ;;  %v750_v24 = vld [vmem:[#allocation8 + $0x2c8] sm:$0xff] }
  0xd9   :  { %962 = vmatpush1.msra.mxu0 %v677_v34  ;;  %1032 = vmatprep.subr.mxu1 %v806_v13  ;;  %v790_v25 = vld [vmem:[#allocation8 + $0x408] sm:$0xff]  ;;  %v741_v34 = vld [vmem:[#allocation8 + $0x280] sm:$0xff]  ;;  %v852_v13 = vld [vmem:[#allocation8 + $0x5f8] sm:$0xff] }
  0xda   :  { %963 = vmatprep.subr.mxu0 %v674_v36  ;;  %1033 = vmatpush1.msra.mxu1 %v805_v15  ;;  %v746_v28 = vld [vmem:[#allocation8 + $0x2a8] sm:$0xff] }
  0xdb   :  { %964 = vmatpush1.msra.mxu0 %v673_v38  ;;  %1034 = vmatprep.subr.mxu1 %v802_v17  ;;  %v914_v29 = vld [vmem:[#allocation8 + $0x7e8] sm:$0xff]  ;;  %v737_v38 = vld [vmem:[#allocation8 + $0x260] sm:$0xff]  ;;  %v1768_v17 = vld [vmem:[#allocation7] sm:$0xf] }
  0xdc   :  { %965 = vmatprep.subr.mxu0 %v670_v40  ;;  %1035 = vmatpush1.msra.mxu1 %v801_v63  ;;  %v742_v32 = vld [vmem:[#allocation8 + $0x288] sm:$0xff] }
  0xdd   :  { %966 = vmatpush1.msra.mxu0 %v669_v42  ;;  %1036 = vmatprep.subr.mxu1 %v798_v2  ;;  %v910_v33 = vld [vmem:[#allocation8 + $0x7c8] sm:$0xff]  ;;  %v733_v42 = vld [vmem:[#allocation8 + $0x240] sm:$0xff] }
  0xde   :  { %967 = vmatprep.subr.mxu0 %v666_v44  ;;  %1037 = vmatpush1.msra.mxu1 %v797_v1  ;;  %v738_v36 = vld [vmem:[#allocation8 + $0x268] sm:$0xff] }
  0xdf   :  { %968 = vmatpush1.msra.mxu0 %v665_v46  ;;  %1038 = vmatprep.subr.mxu1 %v794_v21  ;;  %v906_v37 = vld [vmem:[#allocation8 + $0x7a8] sm:$0xff]  ;;  %v729_v46 = vld [vmem:[#allocation8 + $0x220] sm:$0xff] }
  0xe0   :  { %969 = vmatprep.subr.mxu0 %v662_v48  ;;  %1039 = vmatpush1.msra.mxu1 %v793_v23  ;;  %v734_v40 = vld [vmem:[#allocation8 + $0x248] sm:$0xff] }
  0xe1   :  { %970 = vmatpush1.msra.mxu0 %v661_v50  ;;  %1040 = vmatprep.subr.mxu1 %v790_v25  ;;  %v902_v41 = vld [vmem:[#allocation8 + $0x788] sm:$0xff]  ;;  %v725_v50 = vld [vmem:[#allocation8 + $0x200] sm:$0xff] }
  0xe2   :  { %971 = vmatprep.subr.mxu0 %v786_v52  ;;  %1041 = vmatpush1.msra.mxu1 %v789_v27  ;;  %v730_v44 = vld [vmem:[#allocation8 + $0x228] sm:$0xff]  ;;  %v893_v52 = vld [vmem:[#allocation8 + $0x740] sm:$0xff] }
  0xe3   :  { %972 = vmatpush2.msra.mxu0 %v785_v54  ;;  %1042 = vmatprep.subr.mxu1 %v914_v29  ;;  %v898_v45 = vld [vmem:[#allocation8 + $0x768] sm:$0xff]  ;;  %v889_v54 = vld [vmem:[#allocation8 + $0x720] sm:$0xff]  ;;  %v719_v29 = vld [vmem:[#allocation8 + $0x1d0] sm:$0xff] }
  0xe4   :  { %973 = vmatprep.subr.mxu0 %v782_v56  ;;  %1043 = vmatpush2.msra.mxu1 %v913_v31  ;;  %v726_v48 = vld [vmem:[#allocation8 + $0x208] sm:$0xff]  ;;  %v885_v56 = vld [vmem:[#allocation8 + $0x700] sm:$0xff]  ;;  %v715_v31 = vld [vmem:[#allocation8 + $0x1b0] sm:$0xff] }
  0xe5   :  { %974 = vmatpush2.msra.mxu0 %v781_v58  ;;  %1044 = vmatprep.subr.mxu1 %v910_v33  ;;  %v894_v49 = vld [vmem:[#allocation8 + $0x748] sm:$0xff]  ;;  %v881_v58 = vld [vmem:[#allocation8 + $0x6e0] sm:$0xff]  ;;  %v711_v33 = vld [vmem:[#allocation8 + $0x190] sm:$0xff] }
  0xe6   :  { %975 = vmatprep.subr.mxu0 %v778_v60  ;;  %1045 = vmatpush2.msra.mxu1 %v909_v35  ;;  %v890_v53 = vld [vmem:[#allocation8 + $0x728] sm:$0xff]  ;;  %v877_v60 = vld [vmem:[#allocation8 + $0x6c0] sm:$0xff]  ;;  %v707_v35 = vld [vmem:[#allocation8 + $0x170] sm:$0xff] }
  0xe7   :  { %976 = vmatpush2.msra.mxu0 %v777_v62  ;;  %1046 = vmatprep.subr.mxu1 %v906_v37  ;;  %v886_v55 = vld [vmem:[#allocation8 + $0x708] sm:$0xff]  ;;  %v873_v62 = vld [vmem:[#allocation8 + $0x6a0] sm:$0xff]  ;;  %v703_v37 = vld [vmem:[#allocation8 + $0x150] sm:$0xff] }
  0xe8   :  { %977 = vmatprep.subr.mxu0 %v774_v3  ;;  %1047 = vmatpush2.msra.mxu1 %v905_v39  ;;  %v882_v57 = vld [vmem:[#allocation8 + $0x6e8] sm:$0xff]  ;;  %v869_v3 = vld [vmem:[#allocation8 + $0x680] sm:$0xff]  ;;  %v699_v39 = vld [vmem:[#allocation8 + $0x130] sm:$0xff] }
  0xe9   :  { %978 = vmatpush2.msra.mxu0 %v773_v6  ;;  %1048 = vmatprep.subr.mxu1 %v902_v41  ;;  %v878_v59 = vld [vmem:[#allocation8 + $0x6c8] sm:$0xff]  ;;  %v865_v6 = vld [vmem:[#allocation8 + $0x660] sm:$0xff]  ;;  %v695_v41 = vld [vmem:[#allocation8 + $0x110] sm:$0xff] }
  0xea   :  { %979 = vmatprep.subr.mxu0 %v770_v8  ;;  %1049 = vmatpush2.msra.mxu1 %v901_v43  ;;  %v874_v61 = vld [vmem:[#allocation8 + $0x6a8] sm:$0xff]  ;;  %v861_v8 = vld [vmem:[#allocation8 + $0x640] sm:$0xff]  ;;  %v691_v43 = vld [vmem:[#allocation8 + $0xf0] sm:$0xff] }
  0xeb   :  { %980 = vmatpush2.msra.mxu0 %v769_v10  ;;  %1050 = vmatprep.subr.mxu1 %v898_v45  ;;  %v870_v0 = vld [vmem:[#allocation8 + $0x688] sm:$0xff]  ;;  %v857_v10 = vld [vmem:[#allocation8 + $0x620] sm:$0xff]  ;;  %v687_v45 = vld [vmem:[#allocation8 + $0xd0] sm:$0xff] }
  0xec   :  { %981 = vmatprep.subr.mxu0 %v766_v12  ;;  %1051 = vmatpush2.msra.mxu1 %v897_v47  ;;  %v866_v4 = vld [vmem:[#allocation8 + $0x668] sm:$0xff]  ;;  %v853_v12 = vld [vmem:[#allocation8 + $0x600] sm:$0xff]  ;;  %v683_v47 = vld [vmem:[#allocation8 + $0xb0] sm:$0xff] }
  0xed   :  { %982 = vmatpush2.msra.mxu0 %v765_v14  ;;  %1052 = vmatprep.subr.mxu1 %v894_v49  ;;  %v862_v7 = vld [vmem:[#allocation8 + $0x648] sm:$0xff]  ;;  %v353_v14 = vlaneseq  ;;  %v679_v49 = vld [vmem:[#allocation8 + $0x90] sm:$0xff] }
  0xee   :  { %983 = vmatprep.subr.mxu0 %v762_v16  ;;  %1053 = vmatpush2.msra.mxu1 %v893_v52  ;;  %v858_v9 = vld [vmem:[#allocation8 + $0x628] sm:$0xff]  ;;  %v672_v52 = vld [vmem:[#allocation8 + $0x58] sm:$0xff] }
  0xef   :  { %984 = vmatpush2.msra.mxu0 %v761_v18  ;;  %1054 = vmatprep.subr.mxu1 %v890_v53  ;;  %v854_v11 = vld [vmem:[#allocation8 + $0x608] sm:$0xff]  ;;  %v1765_v15 = vshrl.u32 %v353_v14, 7  ;;  %v671_v53 = vld [vmem:[#allocation8 + $0x50] sm:$0xff] }
  0xf0   :  { %985 = vmatprep.subr.mxu0 %v758_v19  ;;  %1055 = vmatpush2.msra.mxu1 %v889_v54  ;;  %v668_v54 = vld [vmem:[#allocation8 + $0x38] sm:$0xff]  ;;  %v763_v14 = vld [vmem:[#allocation8 + $0x330] sm:$0xff] }
  0xf1   :  { %986 = vmatpush2.msra.mxu0 %v757_v20  ;;  %1056 = vmatprep.subr.mxu1 %v886_v55  ;;  %v355_v16 = vsub.s32 0, %v1765_v15  ;;  %v359_v18 = vsub.s32 1, %v1765_v15  ;;  %v667_v55 = vld [vmem:[#allocation8 + $0x30] sm:$0xff] }
  0xf2   :  { %987 = vmatprep.subr.mxu0 %v754_v5  ;;  %1057 = vmatpush2.msra.mxu1 %v885_v56  ;;  %v664_v56 = vld [vmem:[#allocation8 + $0x18] sm:$0xff] }
  0xf3   :  { %988 = vmatpush2.msra.mxu0 %v753_v22  ;;  %1058 = vmatprep.subr.mxu1 %v882_v57  ;;  %v356_v63 = vrot.slane %v1768_v17, %v355_v16  ;;  %v360_v19 = vrot.slane %v1768_v17, %v359_v18  ;;  %v663_v57 = vld [vmem:[#allocation8 + $0x10] sm:$0xff] }
  0xf4   :  { %989 = vmatprep.subr.mxu0 %v750_v24  ;;  %1059 = vmatpush2.msra.mxu1 %v881_v58  ;;  %v788_v58 = vld [vmem:[#allocation8 + $0x3f8] sm:$0xff] }
  0xf5   :  { %990 = vmatpush2.msra.mxu0 %v749_v26  ;;  %1060 = vmatprep.subr.mxu1 %v878_v59  ;;  %v723_v26 = vld [vmem:[#allocation8 + $0x1f0] sm:$0xff] }
  0xf6   :  { %991 = vmatprep.subr.mxu0 %v746_v28  ;;  %1061 = vmatpush2.msra.mxu1 %v877_v60  ;;  %v720_v28 = vld [vmem:[#allocation8 + $0x1d8] sm:$0xff]  ;;  %v787_v59 = vld [vmem:[#allocation8 + $0x3f0] sm:$0xff] }
  0xf7   :  { %992 = vmatpush2.msra.mxu0 %v745_v30  ;;  %1062 = vmatprep.subr.mxu1 %v874_v61  ;;  %v716_v30 = vld [vmem:[#allocation8 + $0x1b8] sm:$0xff]  ;;  %v783_v61 = vld [vmem:[#allocation8 + $0x3d0] sm:$0xff] }
  0xf8   :  { %993 = vmatprep.subr.mxu0 %v742_v32  ;;  %1063 = vmatpush2.msra.mxu1 %v873_v62  ;;  %v712_v32 = vld [vmem:[#allocation8 + $0x198] sm:$0xff] }
  0xf9   :  { %994 = vmatpush2.msra.mxu0 %v741_v34  ;;  %1064 = vmatprep.subr.mxu1 %v870_v0  ;;  %v708_v34 = vld [vmem:[#allocation8 + $0x178] sm:$0xff]  ;;  %v779_v0 = vld [vmem:[#allocation8 + $0x3b0] sm:$0xff] }
  0xfa   :  { %995 = vmatprep.subr.mxu0 %v738_v36  ;;  %1065 = vmatpush2.msra.mxu1 %v869_v3  ;;  %v704_v36 = vld [vmem:[#allocation8 + $0x158] sm:$0xff] }
  0xfb   :  { %996 = vmatpush2.msra.mxu0 %v737_v38  ;;  %1066 = vmatprep.subr.mxu1 %v866_v4  ;;  %v700_v38 = vld [vmem:[#allocation8 + $0x138] sm:$0xff]  ;;  %v775_v4 = vld [vmem:[#allocation8 + $0x390] sm:$0xff] }
  0xfc   :  { %997 = vmatprep.subr.mxu0 %v734_v40  ;;  %1067 = vmatpush2.msra.mxu1 %v865_v6  ;;  %v696_v40 = vld [vmem:[#allocation8 + $0x118] sm:$0xff] }
  0xfd   :  { %998 = vmatpush2.msra.mxu0 %v733_v42  ;;  %1068 = vmatprep.subr.mxu1 %v862_v7  ;;  %v692_v42 = vld [vmem:[#allocation8 + $0xf8] sm:$0xff]  ;;  %v771_v7 = vld [vmem:[#allocation8 + $0x370] sm:$0xff] }
  0xfe   :  { %999 = vmatprep.subr.mxu0 %v730_v44  ;;  %1069 = vmatpush2.msra.mxu1 %v861_v8  ;;  %v688_v44 = vld [vmem:[#allocation8 + $0xd8] sm:$0xff]  ;;  %v363_v8 = vsub.s32 2, %v1765_v15 }
  0xff   :  { %1000 = vmatpush2.msra.mxu0 %v729_v46  ;;  %1070 = vmatprep.subr.mxu1 %v858_v9  ;;  %v684_v46 = vld [vmem:[#allocation8 + $0xb8] sm:$0xff] }
 0x100   :  { %1001 = vmatprep.subr.mxu0 %v726_v48  ;;  %1071 = vmatpush2.msra.mxu1 %v857_v10  ;;  %v680_v48 = vld [vmem:[#allocation8 + $0x98] sm:$0xff]  ;;  %v767_v10 = vld [vmem:[#allocation8 + $0x350] sm:$0xff] }
 0x101   :  { %1002 = vmatpush2.msra.mxu0 %v725_v50  ;;  %1072 = vmatprep.subr.mxu1 %v854_v11  ;;  %v676_v50 = vld [vmem:[#allocation8 + $0x78] sm:$0xff]  ;;  %v367_v11 = vsub.s32 3, %v1765_v15 }
 0x102   :  { %1081 = vmatprep.subr.mxu0 %v724_v51  ;;  %1073 = vmatpush2.msra.mxu1 %v853_v12  ;;  %v675_v51 = vld [vmem:[#allocation8 + $0x70] sm:$0xff]  ;;  %v784_v60 = vld [vmem:[#allocation8 + $0x3d8] sm:$0xff] }
 0x103   :  { %1152 = vmatprep.subr.mxu1 %v852_v13  ;;  %v780_v62 = vld [vmem:[#allocation8 + $0x3b8] sm:$0xff]  ;;  %v364_v13 = vrot.slane %v1768_v17, %v363_v8 }
 0x104   :  { %v776_v3 = vld [vmem:[#allocation8 + $0x398] sm:$0xff] }
 0x105   :  { %v772_v6 = vld [vmem:[#allocation8 + $0x378] sm:$0xff] }
 0x106   :  { %v768_v9 = vld [vmem:[#allocation8 + $0x358] sm:$0xff] }
 0x107   :  { %v764_v12 = vld [vmem:[#allocation8 + $0x338] sm:$0xff] }
 0x108   :  { %v1457_v15 = vld [vmem:[%s1816_s6] ss:$0 sm:$0xff] }
 0x13f   :  { %v439_v2 = vpop.f32.mrf.mxu0 }
 0x140   :  { %v440_v20 = vadd.f32 %v439_v2, %v356_v63  ;;  %v760_v63 = vld [vmem:[#allocation8 + $0x318] sm:$0xff]  ;;  %v759_v2 = vld [vmem:[#allocation8 + $0x310] sm:$0xff] }
 0x141   :  { %v510_v1 = vpop.f32.mrf.mxu1  ;;  %v441_v5 = vpop.f32.mrf.mxu0 }
 0x142   :  { %v442_v21 = vadd.f32 %v441_v5, %v360_v19  ;;  %v511_v22 = vadd.f32 %v510_v1, %v440_v20  ;;  %v368_v19 = vrot.slane %v1768_v17, %v367_v11  ;;  %v756_v5 = vld [vmem:[#allocation8 + $0x2f8] sm:$0xff]  ;;  %v747_v17 = vld [vmem:[#allocation8 + $0x2b0] sm:$0xff] }
 0x143   :  { %v512_v23 = vpop.f32.mrf.mxu1 }
 0x144   :  { %v513_v24 = vadd.f32 %v512_v23, %v442_v21 }
 0x146   :  { %1538 = vtanh.f32 %v513_v24  ;;  %v752_v24 = vld [vmem:[#allocation8 + $0x2d8] sm:$0xff] }
 0x147   :  { %1540 = vtanh.f32 %v511_v22  ;;  %v755_v22 = vld [vmem:[#allocation8 + $0x2f0] sm:$0xff] }
 0x153   :  { %v1539_v25 = vpop.eup %1538 }
 0x154   :  { %v1777_v27 = vpop.eup %1540  ;;  %1003 = vmatprep.mubr.f32.mxu0 %v1539_v25 }
 0x155   :  { %1004 = vmatmul.mubr.f32.vlgmr.msra.gmra.mxu0 %v1777_v27 }
 0x156   :  { %1082 = vmatpush1.msra.mxu0 %v723_v26  ;;  %1145 = vmatprep.mubr.f32.mxu0 %v1539_v25  ;;  %v751_v26 = vld [vmem:[#allocation8 + $0x2d0] sm:$0xff] }
 0x157   :  { %1083 = vmatprep.subr.mxu0 %v720_v28 }
 0x158   :  { %1084 = vmatpush1.msra.mxu0 %v719_v29 }
 0x159   :  { %1085 = vmatprep.subr.mxu0 %v716_v30  ;;  %v748_v30 = vld [vmem:[#allocation8 + $0x2b8] sm:$0xff] }
 0x15a   :  { %1086 = vmatpush1.msra.mxu0 %v715_v31 }
 0x15b   :  { %1087 = vmatprep.subr.mxu0 %v712_v32  ;;  %v744_v32 = vld [vmem:[#allocation8 + $0x298] sm:$0xff] }
 0x15c   :  { %1088 = vmatpush1.msra.mxu0 %v711_v33  ;;  %v743_v33 = vld [vmem:[#allocation8 + $0x290] sm:$0xff] }
 0x15d   :  { %1089 = vmatprep.subr.mxu0 %v708_v34  ;;  %v740_v34 = vld [vmem:[#allocation8 + $0x278] sm:$0xff] }
 0x15e   :  { %1090 = vmatpush1.msra.mxu0 %v707_v35  ;;  %v739_v35 = vld [vmem:[#allocation8 + $0x270] sm:$0xff] }
 0x15f   :  { %1091 = vmatprep.subr.mxu0 %v704_v36  ;;  %v736_v36 = vld [vmem:[#allocation8 + $0x258] sm:$0xff] }
 0x160   :  { %1092 = vmatpush1.msra.mxu0 %v703_v37  ;;  %v735_v37 = vld [vmem:[#allocation8 + $0x250] sm:$0xff] }
 0x161   :  { %1093 = vmatprep.subr.mxu0 %v700_v38  ;;  %v732_v38 = vld [vmem:[#allocation8 + $0x238] sm:$0xff] }
 0x162   :  { %1094 = vmatpush1.msra.mxu0 %v699_v39  ;;  %v731_v39 = vld [vmem:[#allocation8 + $0x230] sm:$0xff] }
 0x163   :  { %1095 = vmatprep.subr.mxu0 %v696_v40  ;;  %v728_v40 = vld [vmem:[#allocation8 + $0x218] sm:$0xff] }
 0x164   :  { %1096 = vmatpush1.msra.mxu0 %v695_v41  ;;  %v727_v41 = vld [vmem:[#allocation8 + $0x210] sm:$0xff] }
 0x165   :  { %1097 = vmatprep.subr.mxu0 %v692_v42 }
 0x166   :  { %1098 = vmatpush1.msra.mxu0 %v691_v43  ;;  %v851_v43 = vld [vmem:[#allocation8 + $0x5f0] sm:$0xff] }
 0x167   :  { %1099 = vmatprep.subr.mxu0 %v688_v44 }
 0x168   :  { %1100 = vmatpush1.msra.mxu0 %v687_v45  ;;  %v848_v45 = vld [vmem:[#allocation8 + $0x5d8] sm:$0xff] }
 0x169   :  { %1101 = vmatprep.subr.mxu0 %v684_v46  ;;  %v847_v46 = vld [vmem:[#allocation8 + $0x5d0] sm:$0xff] }
 0x16a   :  { %1102 = vmatpush1.msra.mxu0 %v683_v47  ;;  %v1258_v47 = vld [vmem:[#allocation10 + $0xf8] sm:$0xff] }
 0x16b   :  { %1103 = vmatprep.subr.mxu0 %v680_v48  ;;  %v1242_v48 = vld [vmem:[#allocation10 + $0x78] sm:$0xff] }
 0x16c   :  { %1104 = vmatpush1.msra.mxu0 %v679_v49  ;;  %v844_v49 = vld [vmem:[#allocation8 + $0x5b8] sm:$0xff] }
 0x16d   :  { %1105 = vmatprep.subr.mxu0 %v676_v50  ;;  %v1257_v50 = vld [vmem:[#allocation10 + $0xf0] sm:$0xff] }
 0x16e   :  { %1106 = vmatpush1.msra.mxu0 %v675_v51  ;;  %v843_v51 = vld [vmem:[#allocation8 + $0x5b0] sm:$0xff] }
 0x16f   :  { %1107 = vmatprep.subr.mxu0 %v672_v52  ;;  %v1241_v52 = vld [vmem:[#allocation10 + $0x70] sm:$0xff] }
 0x170   :  { %1108 = vmatpush1.msra.mxu0 %v671_v53  ;;  %v1256_v53 = vld [vmem:[#allocation10 + $0xe8] sm:$0xff] }
 0x171   :  { %1109 = vmatprep.subr.mxu0 %v668_v54  ;;  %v839_v54 = vld [vmem:[#allocation8 + $0x590] sm:$0xff] }
 0x172   :  { %1110 = vmatpush1.msra.mxu0 %v667_v55  ;;  %v1240_v55 = vld [vmem:[#allocation10 + $0x68] sm:$0xff] }
 0x173   :  { %1111 = vmatprep.subr.mxu0 %v664_v56  ;;  %v836_v56 = vld [vmem:[#allocation8 + $0x578] sm:$0xff] }
 0x174   :  { %1112 = vmatpush1.msra.mxu0 %v663_v57  ;;  %v1255_v57 = vld [vmem:[#allocation10 + $0xe0] sm:$0xff] }
 0x175   :  { %1113 = vmatprep.subr.mxu0 %v788_v58  ;;  %v835_v58 = vld [vmem:[#allocation8 + $0x570] sm:$0xff] }
 0x176   :  { %1114 = vmatpush2.msra.mxu0 %v787_v59  ;;  %v1239_v59 = vld [vmem:[#allocation10 + $0x60] sm:$0xff] }
 0x177   :  { %1115 = vmatprep.subr.mxu0 %v784_v60  ;;  %v832_v60 = vld [vmem:[#allocation8 + $0x558] sm:$0xff] }
 0x178   :  { %1116 = vmatpush2.msra.mxu0 %v783_v61  ;;  %v1254_v61 = vld [vmem:[#allocation10 + $0xd8] sm:$0xff] }
 0x179   :  { %1117 = vmatprep.subr.mxu0 %v780_v62  ;;  %v831_v62 = vld [vmem:[#allocation8 + $0x550] sm:$0xff] }
 0x17a   :  { %1118 = vmatpush2.msra.mxu0 %v779_v0  ;;  %v1238_v0 = vld [vmem:[#allocation10 + $0x58] sm:$0xff] }
 0x17b   :  { %1119 = vmatprep.subr.mxu0 %v776_v3  ;;  %v828_v3 = vld [vmem:[#allocation8 + $0x538] sm:$0xff] }
 0x17c   :  { %1120 = vmatpush2.msra.mxu0 %v775_v4  ;;  %v1253_v4 = vld [vmem:[#allocation10 + $0xd0] sm:$0xff] }
 0x17d   :  { %1121 = vmatprep.subr.mxu0 %v772_v6  ;;  %v827_v6 = vld [vmem:[#allocation8 + $0x530] sm:$0xff] }
 0x17e   :  { %1122 = vmatpush2.msra.mxu0 %v771_v7  ;;  %v824_v7 = vld [vmem:[#allocation8 + $0x518] sm:$0xff] }
 0x17f   :  { %1123 = vmatprep.subr.mxu0 %v768_v9  ;;  %v823_v9 = vld [vmem:[#allocation8 + $0x510] sm:$0xff] }
 0x180   :  { %1124 = vmatpush2.msra.mxu0 %v767_v10  ;;  %v820_v10 = vld [vmem:[#allocation8 + $0x4f8] sm:$0xff] }
 0x181   :  { %1125 = vmatprep.subr.mxu0 %v764_v12  ;;  %v581_v20 = vpop.f32.mrf.mxu0  ;;  %v819_v12 = vld [vmem:[#allocation8 + $0x4f0] sm:$0xff] }
 0x182   :  { %v652_v1 = vpop.f32.mrf.mxu1  ;;  %1126 = vmatpush2.msra.mxu0 %v763_v14  ;;  %v582_v21 = vadd.f32 %v581_v20, %v364_v13  ;;  %v816_v13 = vld [vmem:[#allocation8 + $0x4d8] sm:$0xff]  ;;  %v815_v14 = vld [vmem:[#allocation8 + $0x4d0] sm:$0xff] }
 0x183   :  { %1127 = vmatprep.subr.mxu0 %v760_v63  ;;  %v583_v23 = vpop.f32.mrf.mxu0  ;;  %v812_v63 = vld [vmem:[#allocation8 + $0x4b8] sm:$0xff]  ;;  %v807_v20 = vld [vmem:[#allocation8 + $0x490] sm:$0xff] }
 0x184   :  { %1128 = vmatpush2.msra.mxu0 %v759_v2  ;;  %v584_v25 = vadd.f32 %v583_v23, %v368_v19  ;;  %v653_v28 = vadd.f32 %v652_v1, %v582_v21  ;;  %v654_v29 = vpop.f32.mrf.mxu1  ;;  %v811_v19 = vld [vmem:[#allocation8 + $0x4b0] sm:$0xff]  ;;  %v808_v2 = vld [vmem:[#allocation8 + $0x498] sm:$0xff] }
 0x185   :  { %1129 = vmatprep.subr.mxu0 %v756_v5  ;;  %v804_v1 = vld [vmem:[#allocation8 + $0x478] sm:$0xff]  ;;  %v803_v5 = vld [vmem:[#allocation8 + $0x470] sm:$0xff] }
 0x186   :  { %1130 = vmatpush2.msra.mxu0 %v755_v22  ;;  %v655_v31 = vadd.f32 %v654_v29, %v584_v25  ;;  %v800_v21 = vld [vmem:[#allocation8 + $0x458] sm:$0xff]  ;;  %v799_v22 = vld [vmem:[#allocation8 + $0x450] sm:$0xff] }
 0x187   :  { %1131 = vmatprep.subr.mxu0 %v752_v24  ;;  %v796_v23 = vld [vmem:[#allocation8 + $0x438] sm:$0xff]  ;;  %v795_v24 = vld [vmem:[#allocation8 + $0x430] sm:$0xff] }
 0x188   :  { %1132 = vmatpush2.msra.mxu0 %v751_v26  ;;  %1542 = vtanh.f32 %v655_v31  ;;  %v792_v25 = vld [vmem:[#allocation8 + $0x418] sm:$0xff]  ;;  %v791_v26 = vld [vmem:[#allocation8 + $0x410] sm:$0xff] }
 0x189   :  { %1133 = vmatprep.subr.mxu0 %v748_v30  ;;  %1544 = vtanh.f32 %v653_v28  ;;  %v916_v28 = vld [vmem:[#allocation8 + $0x7f8] sm:$0xff]  ;;  %v915_v29 = vld [vmem:[#allocation8 + $0x7f0] sm:$0xff] }
 0x18a   :  { %1134 = vmatpush2.msra.mxu0 %v747_v17  ;;  %v912_v30 = vld [vmem:[#allocation8 + $0x7d8] sm:$0xff]  ;;  %v911_v31 = vld [vmem:[#allocation8 + $0x7d0] sm:$0xff] }
 0x18b   :  { %1135 = vmatprep.subr.mxu0 %v744_v32  ;;  %v908_v17 = vld [vmem:[#allocation8 + $0x7b8] sm:$0xff]  ;;  %v907_v32 = vld [vmem:[#allocation8 + $0x7b0] sm:$0xff] }
 0x18c   :  { %1136 = vmatpush2.msra.mxu0 %v743_v33  ;;  %v904_v33 = vld [vmem:[#allocation8 + $0x798] sm:$0xff] }
 0x18d   :  { %1137 = vmatprep.subr.mxu0 %v740_v34  ;;  %v903_v34 = vld [vmem:[#allocation8 + $0x790] sm:$0xff] }
 0x18e   :  { %1138 = vmatpush2.msra.mxu0 %v739_v35  ;;  %v900_v35 = vld [vmem:[#allocation8 + $0x778] sm:$0xff] }
 0x18f   :  { %1139 = vmatprep.subr.mxu0 %v736_v36  ;;  %v899_v36 = vld [vmem:[#allocation8 + $0x770] sm:$0xff] }
 0x190   :  { %1140 = vmatpush2.msra.mxu0 %v735_v37  ;;  %v896_v37 = vld [vmem:[#allocation8 + $0x758] sm:$0xff] }
 0x191   :  { %1141 = vmatprep.subr.mxu0 %v732_v38  ;;  %v895_v38 = vld [vmem:[#allocation8 + $0x750] sm:$0xff] }
 0x192   :  { %1142 = vmatpush2.msra.mxu0 %v731_v39  ;;  %v892_v39 = vld [vmem:[#allocation8 + $0x738] sm:$0xff] }
 0x193   :  { %1143 = vmatprep.subr.mxu0 %v728_v40  ;;  %v891_v40 = vld [vmem:[#allocation8 + $0x730] sm:$0xff] }
 0x194   :  { %1144 = vmatpush2.msra.mxu0 %v727_v41  ;;  %v888_v41 = vld [vmem:[#allocation8 + $0x718] sm:$0xff] }
 0x195   :  { %1146 = vmatmul.mubr.f32.vlgmr.msra.gmra.mxu0 %v1777_v27  ;;  %v1543_v42 = vpop.eup %1542  ;;  %1458 = vmatprep.subr.mxu0 %v1258_v47  ;;  %v840_v27 = vld [vmem:[#allocation8 + $0x598] sm:$0xff]  ;;  %v879_v47 = vld [vmem:[#allocation8 + $0x6d0] sm:$0xff] }
 0x196   :  { %v1789_v44 = vpop.eup %1544  ;;  %1074 = vmatprep.mubr.f32.mxu1 %v1543_v42  ;;  %1459 = vmatpush3.msra.mxu0 %v1242_v48  ;;  %v876_v48 = vld [vmem:[#allocation8 + $0x6b8] sm:$0xff] }
 0x197   :  { %1075 = vmatmul.mubr.f32.vlgmr.msra.gmra.mxu1 %v1789_v44  ;;  %1460 = vmatprep.subr.mxu0 %v1257_v50  ;;  %v872_v50 = vld [vmem:[#allocation8 + $0x698] sm:$0xff] }
 0x198   :  { %1153 = vmatpush1.msra.mxu1 %v851_v43  ;;  %1216 = vmatprep.mubr.f32.mxu1 %v1543_v42  ;;  %v887_v42 = vld [vmem:[#allocation8 + $0x710] sm:$0xff]  ;;  %v884_v43 = vld [vmem:[#allocation8 + $0x6f8] sm:$0xff] }
 0x199   :  { %1154 = vmatprep.subr.mxu1 %v848_v45  ;;  %1461 = vmatpush3.msra.mxu0 %v1241_v52  ;;  %v883_v45 = vld [vmem:[#allocation8 + $0x6f0] sm:$0xff]  ;;  %v868_v52 = vld [vmem:[#allocation8 + $0x678] sm:$0xff] }
 0x19a   :  { %1155 = vmatpush1.msra.mxu1 %v847_v46  ;;  %1462 = vmatprep.subr.mxu0 %v1256_v53  ;;  %v880_v46 = vld [vmem:[#allocation8 + $0x6d8] sm:$0xff] }
 0x19b   :  { %1156 = vmatprep.subr.mxu1 %v844_v49  ;;  %1463 = vmatpush3.msra.mxu0 %v1240_v55  ;;  %v875_v49 = vld [vmem:[#allocation8 + $0x6b0] sm:$0xff]  ;;  %v864_v53 = vld [vmem:[#allocation8 + $0x658] sm:$0xff] }
 0x19c   :  { %1157 = vmatpush1.msra.mxu1 %v843_v51  ;;  %1464 = vmatprep.subr.mxu0 %v1255_v57  ;;  %v871_v51 = vld [vmem:[#allocation8 + $0x690] sm:$0xff]  ;;  %v860_v55 = vld [vmem:[#allocation8 + $0x638] sm:$0xff] }
 0x19d   :  { %1158 = vmatprep.subr.mxu1 %v840_v27  ;;  %1465 = vmatpush3.msra.mxu0 %v1239_v59  ;;  %v867_v27 = vld [vmem:[#allocation8 + $0x670] sm:$0xff]  ;;  %v856_v57 = vld [vmem:[#allocation8 + $0x618] sm:$0xff] }
 0x19e   :  { %1159 = vmatpush1.msra.mxu1 %v839_v54  ;;  %1466 = vmatprep.subr.mxu0 %v1254_v61  ;;  %v863_v54 = vld [vmem:[#allocation8 + $0x650] sm:$0xff]  ;;  %v1236_v61 = vld [vmem:[#allocation10 + $0x48] sm:$0xff] }
 0x19f   :  { %1160 = vmatprep.subr.mxu1 %v836_v56  ;;  %1467 = vmatpush3.msra.mxu0 %v1238_v0  ;;  %v859_v56 = vld [vmem:[#allocation8 + $0x630] sm:$0xff]  ;;  %v1235_v0 = vld [vmem:[#allocation10 + $0x40] sm:$0xff] }
 0x1a0   :  { %1161 = vmatpush1.msra.mxu1 %v835_v58  ;;  %1468 = vmatprep.subr.mxu0 %v1253_v4  ;;  %v855_v58 = vld [vmem:[#allocation8 + $0x610] sm:$0xff]  ;;  %v1234_v4 = vld [vmem:[#allocation10 + $0x38] sm:$0xff] }
 0x1a1   :  { %1162 = vmatprep.subr.mxu1 %v832_v60  ;;  %v1237_v59 = vld [vmem:[#allocation10 + $0x50] sm:$0xff]  ;;  %v1252_v60 = vld [vmem:[#allocation10 + $0xc8] sm:$0xff] }
 0x1a2   :  { %1163 = vmatpush1.msra.mxu1 %v831_v62  ;;  %1469 = vmatpush3.msra.mxu0 %v1237_v59  ;;  %v1251_v62 = vld [vmem:[#allocation10 + $0xc0] sm:$0xff] }
 0x1a3   :  { %1164 = vmatprep.subr.mxu1 %v828_v3  ;;  %1470 = vmatprep.subr.mxu0 %v1252_v60  ;;  %v1250_v3 = vld [vmem:[#allocation10 + $0xb8] sm:$0xff] }
 0x1a4   :  { %1165 = vmatpush1.msra.mxu1 %v827_v6  ;;  %1471 = vmatpush3.msra.mxu0 %v1236_v61  ;;  %v1249_v6 = vld [vmem:[#allocation10 + $0xb0] sm:$0xff] }
 0x1a5   :  { %1166 = vmatprep.subr.mxu1 %v824_v7  ;;  %1472 = vmatprep.subr.mxu0 %v1251_v62  ;;  %v1233_v7 = vld [vmem:[#allocation10 + $0x30] sm:$0xff] }
 0x1a6   :  { %1167 = vmatpush1.msra.mxu1 %v823_v9  ;;  %1473 = vmatpush3.msra.mxu0 %v1235_v0  ;;  %v1248_v9 = vld [vmem:[#allocation10 + $0xa8] sm:$0xff] }
 0x1a7   :  { %1168 = vmatprep.subr.mxu1 %v820_v10  ;;  %1474 = vmatprep.subr.mxu0 %v1250_v3  ;;  %v1232_v10 = vld [vmem:[#allocation10 + $0x28] sm:$0xff] }
 0x1a8   :  { %1169 = vmatpush1.msra.mxu1 %v819_v12  ;;  %1475 = vmatpush3.msra.mxu0 %v1234_v4  ;;  %v1247_v12 = vld [vmem:[#allocation10 + $0xa0] sm:$0xff] }
 0x1a9   :  { %1170 = vmatprep.subr.mxu1 %v816_v13  ;;  %1476 = vmatprep.subr.mxu0 %v1249_v6  ;;  %v1246_v13 = vld [vmem:[#allocation10 + $0x98] sm:$0xff] }
 0x1aa   :  { %1171 = vmatpush1.msra.mxu1 %v815_v14  ;;  %1477 = vmatpush3.msra.mxu0 %v1233_v7  ;;  %v1230_v14 = vld [vmem:[#allocation10 + $0x18] sm:$0xff] }
 0x1ab   :  { %1172 = vmatprep.subr.mxu1 %v812_v63  ;;  %1478 = vmatprep.subr.mxu0 %v1248_v9  ;;  %v1245_v63 = vld [vmem:[#allocation10 + $0x90] sm:$0xff] }
 0x1ac   :  { %1173 = vmatpush1.msra.mxu1 %v811_v19  ;;  %1479 = vmatpush3.msra.mxu0 %v1232_v10  ;;  %v1229_v19 = vld [vmem:[#allocation10 + $0x10] sm:$0xff] }
 0x1ad   :  { %1174 = vmatprep.subr.mxu1 %v808_v2  ;;  %1480 = vmatprep.subr.mxu0 %v1247_v12  ;;  %v1244_v2 = vld [vmem:[#allocation10 + $0x88] sm:$0xff] }
 0x1ae   :  { %1175 = vmatpush1.msra.mxu1 %v807_v20  ;;  %v1228_v20 = vld [vmem:[#allocation10 + $0x8] sm:$0xff] }
 0x1af   :  { %1176 = vmatprep.subr.mxu1 %v804_v1  ;;  %v1243_v1 = vld [vmem:[#allocation10 + $0x80] sm:$0xff] }
 0x1b0   :  { %1177 = vmatpush1.msra.mxu1 %v803_v5  ;;  %v1227_v5 = vld [vmem:[#allocation10] sm:$0xff] }
 0x1b1   :  { %1178 = vmatprep.subr.mxu1 %v800_v21  ;;  %v1290_v21 = vld [vmem:[#allocation10 + $0x1f8] sm:$0xff] }
 0x1b2   :  { %1179 = vmatpush1.msra.mxu1 %v799_v22  ;;  %v1274_v22 = vld [vmem:[#allocation10 + $0x178] sm:$0xff] }
 0x1b3   :  { %1180 = vmatprep.subr.mxu1 %v796_v23  ;;  %v1289_v23 = vld [vmem:[#allocation10 + $0x1f0] sm:$0xff] }
 0x1b4   :  { %1181 = vmatpush1.msra.mxu1 %v795_v24  ;;  %v1273_v24 = vld [vmem:[#allocation10 + $0x170] sm:$0xff] }
 0x1b5   :  { %1182 = vmatprep.subr.mxu1 %v792_v25  ;;  %v1288_v25 = vld [vmem:[#allocation10 + $0x1e8] sm:$0xff] }
 0x1b6   :  { %1183 = vmatpush1.msra.mxu1 %v791_v26  ;;  %v1272_v26 = vld [vmem:[#allocation10 + $0x168] sm:$0xff] }
 0x1b7   :  { %1184 = vmatprep.subr.mxu1 %v916_v28  ;;  %v1287_v28 = vld [vmem:[#allocation10 + $0x1e0] sm:$0xff] }
 0x1b8   :  { %1185 = vmatpush2.msra.mxu1 %v915_v29  ;;  %v1271_v29 = vld [vmem:[#allocation10 + $0x160] sm:$0xff] }
 0x1b9   :  { %1186 = vmatprep.subr.mxu1 %v912_v30  ;;  %v1286_v30 = vld [vmem:[#allocation10 + $0x1d8] sm:$0xff] }
 0x1ba   :  { %1187 = vmatpush2.msra.mxu1 %v911_v31  ;;  %v1270_v31 = vld [vmem:[#allocation10 + $0x158] sm:$0xff] }
 0x1bb   :  { %1188 = vmatprep.subr.mxu1 %v908_v17  ;;  %v1285_v17 = vld [vmem:[#allocation10 + $0x1d0] sm:$0xff] }
 0x1bc   :  { %1189 = vmatpush2.msra.mxu1 %v907_v32  ;;  %v1269_v32 = vld [vmem:[#allocation10 + $0x150] sm:$0xff] }
 0x1bd   :  { %1190 = vmatprep.subr.mxu1 %v904_v33  ;;  %v1284_v33 = vld [vmem:[#allocation10 + $0x1c8] sm:$0xff] }
 0x1be   :  { %1191 = vmatpush2.msra.mxu1 %v903_v34  ;;  %v1268_v34 = vld [vmem:[#allocation10 + $0x148] sm:$0xff] }
 0x1bf   :  { %1192 = vmatprep.subr.mxu1 %v900_v35  ;;  %v1283_v35 = vld [vmem:[#allocation10 + $0x1c0] sm:$0xff] }
 0x1c0   :  { %1193 = vmatpush2.msra.mxu1 %v899_v36  ;;  %v1267_v36 = vld [vmem:[#allocation10 + $0x140] sm:$0xff] }
 0x1c1   :  { %1194 = vmatprep.subr.mxu1 %v896_v37  ;;  %v1282_v37 = vld [vmem:[#allocation10 + $0x1b8] sm:$0xff] }
 0x1c2   :  { %1195 = vmatpush2.msra.mxu1 %v895_v38  ;;  %v1266_v38 = vld [vmem:[#allocation10 + $0x138] sm:$0xff] }
 0x1c3   :  { %1196 = vmatprep.subr.mxu1 %v892_v39  ;;  %v1281_v39 = vld [vmem:[#allocation10 + $0x1b0] sm:$0xff] }
 0x1c4   :  { %1197 = vmatpush2.msra.mxu1 %v891_v40  ;;  %v1265_v40 = vld [vmem:[#allocation10 + $0x130] sm:$0xff] }
 0x1c5   :  { %1198 = vmatprep.subr.mxu1 %v888_v41  ;;  %v1280_v41 = vld [vmem:[#allocation10 + $0x1a8] sm:$0xff] }
 0x1c6   :  { %1199 = vmatpush2.msra.mxu1 %v887_v42  ;;  %v1264_v42 = vld [vmem:[#allocation10 + $0x128] sm:$0xff] }
 0x1c7   :  { %1200 = vmatprep.subr.mxu1 %v884_v43  ;;  %v1279_v43 = vld [vmem:[#allocation10 + $0x1a0] sm:$0xff] }
 0x1c8   :  { %1201 = vmatpush2.msra.mxu1 %v883_v45  ;;  %v1263_v45 = vld [vmem:[#allocation10 + $0x120] sm:$0xff] }
 0x1c9   :  { %1202 = vmatprep.subr.mxu1 %v880_v46  ;;  %v1278_v46 = vld [vmem:[#allocation10 + $0x198] sm:$0xff] }
 0x1ca   :  { %1203 = vmatpush2.msra.mxu1 %v879_v47  ;;  %v1262_v47 = vld [vmem:[#allocation10 + $0x118] sm:$0xff] }
 0x1cb   :  { %1204 = vmatprep.subr.mxu1 %v876_v48  ;;  %v1277_v48 = vld [vmem:[#allocation10 + $0x190] sm:$0xff] }
 0x1cc   :  { %1205 = vmatpush2.msra.mxu1 %v875_v49  ;;  %v1261_v49 = vld [vmem:[#allocation10 + $0x110] sm:$0xff] }
 0x1cd   :  { %1206 = vmatprep.subr.mxu1 %v872_v50  ;;  %v1276_v50 = vld [vmem:[#allocation10 + $0x188] sm:$0xff] }
 0x1ce   :  { %1207 = vmatpush2.msra.mxu1 %v871_v51  ;;  %v1260_v51 = vld [vmem:[#allocation10 + $0x108] sm:$0xff] }
 0x1cf   :  { %1208 = vmatprep.subr.mxu1 %v868_v52  ;;  %v1275_v52 = vld [vmem:[#allocation10 + $0x180] sm:$0xff] }
 0x1d0   :  { %1209 = vmatpush2.msra.mxu1 %v867_v27  ;;  %v1259_v27 = vld [vmem:[#allocation10 + $0x100] sm:$0xff] }
 0x1d1   :  { %1210 = vmatprep.subr.mxu1 %v864_v53  ;;  %v917_v53 = vld [vmem:[%s1814_s4] sm:$0xf] }
 0x1d2   :  { %1211 = vmatpush2.msra.mxu1 %v863_v54 }
 0x1d3   :  { %1212 = vmatprep.subr.mxu1 %v860_v55  ;;  %v922_v55 = vrot.slane %v917_v53, %v355_v16  ;;  %v930_v16 = vrot.slane %v917_v53, %v363_v8 }
 0x1d4   :  { %1213 = vmatpush2.msra.mxu1 %v859_v56  ;;  %v926_v56 = vrot.slane %v917_v53, %v359_v18  ;;  %v934_v18 = vrot.slane %v917_v53, %v367_v11 }
 0x1d5   :  { %1214 = vmatprep.subr.mxu1 %v856_v57 }
 0x1d6   :  { %1215 = vmatpush2.msra.mxu1 %v855_v58 }
 0x1d7   :  { %1217 = vmatmul.mubr.f32.vlgmr.msra.gmra.mxu1 %v1789_v44  ;;  %v1231_v44 = vld [vmem:[#allocation10 + $0x20] sm:$0xff]  ;;  %1493 = vmatprep.subr.mxu1 %v1290_v21 }
 0x1d8   :  { %1481 = vmatpush3.msra.mxu0 %v1231_v44  ;;  %1494 = vmatpush3.msra.mxu1 %v1274_v22 }
 0x1d9   :  { %1482 = vmatprep.subr.mxu0 %v1246_v13  ;;  %1495 = vmatprep.subr.mxu1 %v1289_v23 }
 0x1da   :  { %1483 = vmatpush3.msra.mxu0 %v1230_v14  ;;  %1496 = vmatpush3.msra.mxu1 %v1273_v24 }
 0x1db   :  { %1484 = vmatprep.subr.mxu0 %v1245_v63  ;;  %1497 = vmatprep.subr.mxu1 %v1288_v25 }
 0x1dc   :  { %1485 = vmatpush3.msra.mxu0 %v1229_v19  ;;  %1498 = vmatpush3.msra.mxu1 %v1272_v26 }
 0x1dd   :  { %1486 = vmatprep.subr.mxu0 %v1244_v2  ;;  %1499 = vmatprep.subr.mxu1 %v1287_v28 }
 0x1de   :  { %1487 = vmatpush3.msra.mxu0 %v1228_v20  ;;  %1500 = vmatpush3.msra.mxu1 %v1271_v29 }
 0x1df   :  { %1488 = vmatprep.subr.mxu0 %v1243_v1  ;;  %1501 = vmatprep.subr.mxu1 %v1286_v30 }
 0x1e0   :  { %1489 = vmatpush3.msra.mxu0 %v1227_v5  ;;  %1502 = vmatpush3.msra.mxu1 %v1270_v31 }
 0x1e1   :  { %1503 = vmatprep.subr.mxu1 %v1285_v17 }
 0x1e2   :  { %1504 = vmatpush3.msra.mxu1 %v1269_v32 }
 0x1e3   :  { %1505 = vmatprep.subr.mxu1 %v1284_v33 }
 0x1e4   :  { %1506 = vmatpush3.msra.mxu1 %v1268_v34 }
 0x1e5   :  { %1507 = vmatprep.subr.mxu1 %v1283_v35 }
 0x1e6   :  { %1508 = vmatpush3.msra.mxu1 %v1267_v36 }
 0x1e7   :  { %1509 = vmatprep.subr.mxu1 %v1282_v37 }
 0x1e8   :  { %1510 = vmatpush3.msra.mxu1 %v1266_v38 }
 0x1e9   :  { %1511 = vmatprep.subr.mxu1 %v1281_v39 }
 0x1ea   :  { %1512 = vmatpush3.msra.mxu1 %v1265_v40 }
 0x1eb   :  { %1513 = vmatprep.subr.mxu1 %v1280_v41 }
 0x1ec   :  { %1514 = vmatpush3.msra.mxu1 %v1264_v42 }
 0x1ed   :  { %1515 = vmatprep.subr.mxu1 %v1279_v43 }
 0x1ee   :  { %1516 = vmatpush3.msra.mxu1 %v1263_v45 }
 0x1ef   :  { %1517 = vmatprep.subr.mxu1 %v1278_v46 }
 0x1f0   :  { %1518 = vmatpush3.msra.mxu1 %v1262_v47 }
 0x1f1   :  { %1519 = vmatprep.subr.mxu1 %v1277_v48 }
 0x1f2   :  { %1520 = vmatpush3.msra.mxu1 %v1261_v49 }
 0x1f3   :  { %1521 = vmatprep.subr.mxu1 %v1276_v50 }
 0x1f4   :  { %1522 = vmatpush3.msra.mxu1 %v1260_v51 }
 0x1f5   :  { %1523 = vmatprep.subr.mxu1 %v1275_v52 }
 0x1f6   :  { %1524 = vmatpush3.msra.mxu1 %v1259_v27 }
 0x215   :  { %v1005_v54 = vpop.f32.mrf.mxu0 }
 0x216   :  { %v1006_v58 = vadd.f32 %v1005_v54, %v922_v55 }
 0x217   :  { %v1007_v57 = vpop.f32.mrf.mxu0 }
 0x218   :  { %v1008_v60 = vadd.f32 %v1007_v57, %v926_v56 }
 0x255   :  { %v1147_v6 = vpop.f32.mrf.mxu0 }
 0x256   :  { %v1148_v9 = vadd.f32 %v1147_v6, %v930_v16 }
 0x257   :  { %v1076_v59 = vpop.f32.mrf.mxu1  ;;  %v1149_v7 = vpop.f32.mrf.mxu0 }
 0x258   :  { %v1077_v61 = vadd.f32 %v1076_v59, %v1006_v58  ;;  %v1150_v12 = vadd.f32 %v1149_v7, %v934_v18 }
 0x259   :  { %v1078_v62 = vpop.f32.mrf.mxu1 }
 0x25a   :  { %v1079_v0 = vadd.f32 %v1078_v62, %v1008_v60 }
 0x25c   :  { %1546 = vtanh.f32 %v1079_v0 }
 0x25d   :  { %1548 = vtanh.f32 %v1077_v61 }
 0x269   :  { %v1547_v3 = vpop.eup %1546 }
 0x26a   :  { %v1549_v4 = vpop.eup %1548  ;;  %1362 = vmatprep.mubr.f32.mxu0 %v1547_v3 }
 0x26b   :  { %1363 = vmatmul.mubr.f32.vlgmr.msra.gmra.mxu0 %v1549_v4 }
 0x297   :  { %v1218_v10 = vpop.f32.mrf.mxu1 }
 0x298   :  { %v1219_v44 = vadd.f32 %v1218_v10, %v1148_v9 }
 0x299   :  { %v1220_v13 = vpop.f32.mrf.mxu1 }
 0x29a   :  { %v1221_v14 = vadd.f32 %v1220_v13, %v1150_v12 }
 0x29c   :  { %1550 = vtanh.f32 %v1221_v14 }
 0x29d   :  { %1552 = vtanh.f32 %v1219_v44 }
 0x2a9   :  { %v1551_v63 = vpop.eup %1550 }
 0x2aa   :  { %v1553_v19 = vpop.eup %1552  ;;  %1432 = vmatprep.mubr.f32.mxu1 %v1551_v63 }
 0x2ab   :  { %1433 = vmatmul.mubr.f32.vlgmr.msra.gmra.mxu1 %v1553_v19 }
 0x32b   :  { %v1490_v2 = vpop.f32.mrf.mxu0 }
 0x32d   :  { %v1491_v20 = vpop.f32.mrf.mxu0 }
 0x32e   :  { %v1492_v1 = vadd.f32 %v1491_v20, %v1490_v2 }
 0x330   :  { %v1365_v5 = vadd.f32 %v1492_v1, %v1457_v15 }
 0x36b   :  { %v1525_v8 = vpop.f32.mrf.mxu1 }
 0x36d   :  { %v1526_v11 = vpop.f32.mrf.mxu1 }
 0x36e   :  { %v1527_v21 = vadd.f32 %v1526_v11, %v1525_v8 }
 0x370   :  { %v1435_v22 = vadd.f32 %v1527_v21, %v1365_v5 }
 0x372   :  { %1554 = vtanh.f32 %v1435_v22 }
 0x37f   :  { %v1555_v23 = vpop.eup %1554 }
 0x380   :  { %1439 = vst [vmem:[#allocation11] sm:$0xff] %v1555_v23 }
 0x381   :  { %1667 = shalt.err (!%p1664_p1)
}
 0x382   :  { %1449 = dma.vmem_to_hbm [thread:$0]  %s1447_s29, 128, %s1817_s7, [#allocation4]  }
 0x383   :  { %1682 = dma.done.wait [#allocation4], 128  }
 0x384   :  { %1683 = vsyncadd [#allocation4], 4294967168 }
 0x385   :  { %1453 = vsyncpa [#allocation3], 1 }
 0x386   :  { %1454 = vsyncpa [#allocation6], 1 }
 0x387   :  { %1455 = vsyncpa [#allocation9], 1 }
 0x388   :  { %1456 = vsyncpa [#allocation4], 1 }

// kernel: tpu_custom_call.1
= control target key start
LH: loop header
LB: loop body
LE: loop exit
PB: predicated region body
PF: predicated region fallthrough
CT: control target
= control target key end

     0   :  { %12 = vsyncpa [#allocation3], 0  ;;  %s1810_s0 = inlined_call_operand.hbm [shape: f32[8,512], index: 0, kind: input, shape index: {}]   ;;  %s1811_s1 = inlined_call_operand.hbm [shape: f32[512,512], index: 1, kind: input, shape index: {}]   ;;  %s1812_s2 = inlined_call_operand.hbm [shape: f32[1,512], index: 2, kind: input, shape index: {}]   ;;  %s1813_s3 = inlined_call_operand.hbm [shape: f32[512,512], index: 3, kind: input, shape index: {}]   ;;  %s1814_s4 = inlined_call_operand.vmem [shape: f32[1,512], index: 4, kind: input, shape index: {}]   ;;  %s1815_s5 = inlined_call_operand.hbm [shape: f32[512,128], index: 5, kind: input, shape index: {}]   ;;  %s1816_s6 = inlined_call_operand.vmem [shape: f32[1,128], index: 6, kind: input, shape index: {}]   ;;  %s1817_s7 = inlined_call_operand.hbm [shape: f32[8,128], index: 7, kind: output, shape index: {}]  }
   0x1   :  { %13 = vsyncpa [#allocation6], 0 }
   0x2   :  { %14 = vsyncpa [#allocation9], 0 }
   0x3   :  { %15 = vsyncpa [#allocation4], 0  ;;  %s1684_s24 = smov [#allocation5]  }
   0x4   :  { %s31_s25 = sshll.u32 %s1684_s24, 4  ;;  %s32_s25 = int_to_ptr.vmem [resolvable:$true] %s31_s25 }
   0x5   :  { %s1564_s26 = scalar_lea.vmem %s32_s25, 32768  ;;  %p1569_p1 = scmp.lt.s32.totalorder %s32_s25, %s32_s25 }
   0x6   :  { %p1565_p0 = scmp.ne.s32.totalorder %s32_s25, %s1564_s26  ;;  %p1570_p2 = scmp.lt.s32.totalorder %s1564_s26, %s1564_s26 }
   0x8   :  { %p1571_p3 = por %p1570_p2, %p1569_p1 }
   0xa   :  { %p1572_p4 = pnand %p1571_p3, %p1565_p0 }
   0xc   :  { %1575 = shalt.err (!%p1572_p4)
}
   0xd   :  { %s1685_s27 = smov 512   ;;  %s1686_s28 = smov 32  }
   0xe   :  { %37 = dma.hbm_to_vmem [thread:$0]  %s1811_s1, 32768, %s32_s25, [#allocation6], %s1685_s27, %s1685_s27, %s1686_s28  }
   0xf   :  { %s1687_s8 = smov [#allocation8]   ;;  %s1688_s10 = smov [#allocation2]  }
  0x10   :  { %s53_s9 = sshll.u32 %s1687_s8, 4  ;;  %s22_s11 = sshll.u32 %s1688_s10, 4  ;;  %s54_s9 = int_to_ptr.vmem [resolvable:$true] %s53_s9  ;;  %s23_s11 = int_to_ptr.vmem [resolvable:$true] %s22_s11 }
  0x11   :  { %s1584_s12 = scalar_lea.vmem %s54_s9, 32768  ;;  %p1589_p6 = scmp.lt.s32.totalorder %s54_s9, %s54_s9 }
  0x12   :  { %p1585_p5 = scmp.ne.s32.totalorder %s54_s9, %s1584_s12  ;;  %p1590_p7 = scmp.lt.s32.totalorder %s1584_s12, %s1584_s12 }
  0x14   :  { %p1591_p8 = por %p1590_p7, %p1589_p6 }
  0x16   :  { %p1592_p9 = pnand %p1591_p8, %p1585_p5 }
  0x18   :  { %1595 = shalt.err (!%p1592_p9)
}
  0x19   :  { %59 = dma.hbm_to_vmem [thread:$0]  %s1813_s3, 32768, %s54_s9, [#allocation9], %s1685_s27, %s1685_s27, %s1686_s28  }
  0x1a   :  { %s1604_s15 = scalar_lea.vmem %s23_s11, 512  ;;  %p1609_p11 = scmp.lt.s32.totalorder %s23_s11, %s23_s11 }
  0x1b   :  { %p1605_p10 = scmp.ne.s32.totalorder %s23_s11, %s1604_s15  ;;  %p1610_p12 = scmp.lt.s32.totalorder %s1604_s15, %s1604_s15 }
  0x1d   :  { %p1611_p13 = por %p1610_p12, %p1609_p11 }
  0x1f   :  { %p1612_p0 = pnand %p1611_p13, %p1605_p10 }
  0x21   :  { %1615 = shalt.err (!%p1612_p0)
}
  0x22   :  { %25 = dma.hbm_to_vmem [thread:$0]  %s1810_s0, 512, %s23_s11, [#allocation3]  }
  0x23   :  { %s1689_s17 = smov [#allocation7]   ;;  %s1690_s19 = smov [#allocation10]  }
  0x24   :  { %s44_s18 = sshll.u32 %s1689_s17, 4  ;;  %s67_s20 = sshll.u32 %s1690_s19, 4  ;;  %s45_s18 = int_to_ptr.vmem [resolvable:$true] %s44_s18  ;;  %s68_s20 = int_to_ptr.vmem [resolvable:$true] %s67_s20 }
  0x25   :  { %s1624_s21 = scalar_lea.vmem %s45_s18, 64  ;;  %p1629_p2 = scmp.lt.s32.totalorder %s45_s18, %s45_s18 }
  0x26   :  { %p1625_p1 = scmp.ne.s32.totalorder %s45_s18, %s1624_s21  ;;  %p1630_p3 = scmp.lt.s32.totalorder %s1624_s21, %s1624_s21 }
  0x28   :  { %p1631_p4 = por %p1630_p3, %p1629_p2 }
  0x2a   :  { %p1632_p5 = pnand %p1631_p4, %p1625_p1 }
  0x2c   :  { %1635 = shalt.err (!%p1632_p5)
}
  0x2d   :  { %47 = dma.hbm_to_vmem [thread:$0]  %s1812_s2, 64, %s45_s18, [#allocation6]  }
  0x2e   :  { %s1644_s23 = scalar_lea.vmem %s68_s20, 8192  ;;  %p1649_p7 = scmp.lt.s32.totalorder %s68_s20, %s68_s20 }
  0x2f   :  { %p1645_p6 = scmp.ne.s32.totalorder %s68_s20, %s1644_s23  ;;  %p1650_p8 = scmp.lt.s32.totalorder %s1644_s23, %s1644_s23 }
  0x31   :  { %p1651_p9 = por %p1650_p8, %p1649_p7 }
  0x33   :  { %p1652_p10 = pnand %p1651_p9, %p1645_p6 }
  0x35   :  { %1655 = shalt.err (!%p1652_p10)
}
  0x36   :  { %s1691_s0 = smov 128   ;;  %s1692_s24 = smov 8  }
  0x37   :  { %73 = dma.hbm_to_vmem [thread:$0]  %s1815_s5, 8192, %s68_s20, [#allocation9], %s1691_s0, %s1691_s0, %s1692_s24  }
  0x38   :  { %1676 = dma.done.wait [#allocation3], 512  }
  0x39   :  { %1677 = vsyncadd [#allocation3], 4294966784 }
  0x3a   :  { %1678 = dma.done.wait [#allocation6], 32832  }
  0x3b   :  { %1679 = vsyncadd [#allocation6], 4294934464 }
  0x3c   :  { %1680 = dma.done.wait [#allocation9], 40960  }
  0x3d   :  { %1681 = vsyncadd [#allocation9], 4294926336  ;;  %v156_v0 = vld [vmem:[#allocation5 + $0x1e8] sm:$0xff]  ;;  %v155_v2 = vld [vmem:[#allocation5 + $0x1e0] sm:$0xff]  ;;  %s1693_s28 = smov [#allocation11]  }
  0x3e   :  { %v284_v1 = vld [vmem:[#allocation5 + $0x5e8] sm:$0xff]  ;;  %373 = vmatprep.subr.mxu0 %v156_v0  ;;  %v283_v3 = vld [vmem:[#allocation5 + $0x5e0] sm:$0xff]  ;;  %s1446_s29 = sshll.u32 %s1693_s28, 4  ;;  %s1447_s29 = int_to_ptr.vmem [resolvable:$true] %s1446_s29 }
  0x3f   :  { %444 = vmatprep.subr.mxu1 %v284_v1  ;;  %v152_v4 = vld [vmem:[#allocation5 + $0x1c8] sm:$0xff]  ;;  %374 = vmatpush1.msra.mxu0 %v155_v2  ;;  %v151_v6 = vld [vmem:[#allocation5 + $0x1c0] sm:$0xff]  ;;  %s1656_s30 = scalar_lea.vmem %s1447_s29, 128  ;;  %p1661_p12 = scmp.lt.s32.totalorder %s1447_s29, %s1447_s29 }
  0x40   :  { %v280_v5 = vld [vmem:[#allocation5 + $0x5c8] sm:$0xff]  ;;  %445 = vmatpush1.msra.mxu1 %v283_v3  ;;  %v279_v7 = vld [vmem:[#allocation5 + $0x5c0] sm:$0xff]  ;;  %375 = vmatprep.subr.mxu0 %v152_v4  ;;  %p1657_p11 = scmp.ne.s32.totalorder %s1447_s29, %s1656_s30  ;;  %p1662_p13 = scmp.lt.s32.totalorder %s1656_s30, %s1656_s30 }
  0x41   :  { %v148_v8 = vld [vmem:[#allocation5 + $0x1a8] sm:$0xff]  ;;  %446 = vmatprep.subr.mxu1 %v280_v5  ;;  %v147_v10 = vld [vmem:[#allocation5 + $0x1a0] sm:$0xff]  ;;  %376 = vmatpush1.msra.mxu0 %v151_v6 }
  0x42   :  { %v276_v9 = vld [vmem:[#allocation5 + $0x5a8] sm:$0xff]  ;;  %v275_v11 = vld [vmem:[#allocation5 + $0x5a0] sm:$0xff]  ;;  %447 = vmatpush1.msra.mxu1 %v279_v7  ;;  %377 = vmatprep.subr.mxu0 %v148_v8  ;;  %p1663_p0 = por %p1662_p13, %p1661_p12 }
  0x43   :  { %v144_v12 = vld [vmem:[#allocation5 + $0x188] sm:$0xff]  ;;  %448 = vmatprep.subr.mxu1 %v276_v9  ;;  %v143_v14 = vld [vmem:[#allocation5 + $0x180] sm:$0xff]  ;;  %378 = vmatpush1.msra.mxu0 %v147_v10 }
  0x44   :  { %v272_v13 = vld [vmem:[#allocation5 + $0x588] sm:$0xff]  ;;  %v271_v15 = vld [vmem:[#allocation5 + $0x580] sm:$0xff]  ;;  %449 = vmatpush1.msra.mxu1 %v275_v11  ;;  %379 = vmatprep.subr.mxu0 %v144_v12  ;;  %p1664_p1 = pnand %p1663_p0, %p1657_p11 }
  0x45   :  { %v140_v16 = vld [vmem:[#allocation5 + $0x168] sm:$0xff]  ;;  %450 = vmatprep.subr.mxu1 %v272_v13  ;;  %v139_v18 = vld [vmem:[#allocation5 + $0x160] sm:$0xff]  ;;  %380 = vmatpush1.msra.mxu0 %v143_v14 }
  0x46   :  { %v268_v17 = vld [vmem:[#allocation5 + $0x568] sm:$0xff]  ;;  %v267_v19 = vld [vmem:[#allocation5 + $0x560] sm:$0xff]  ;;  %451 = vmatpush1.msra.mxu1 %v271_v15  ;;  %381 = vmatprep.subr.mxu0 %v140_v16 }
  0x47   :  { %v136_v20 = vld [vmem:[#allocation5 + $0x148] sm:$0xff]  ;;  %452 = vmatprep.subr.mxu1 %v268_v17  ;;  %v135_v22 = vld [vmem:[#allocation5 + $0x140] sm:$0xff]  ;;  %382 = vmatpush1.msra.mxu0 %v139_v18 }
  0x48   :  { %v264_v21 = vld [vmem:[#allocation5 + $0x548] sm:$0xff]  ;;  %v263_v23 = vld [vmem:[#allocation5 + $0x540] sm:$0xff]  ;;  %453 = vmatpush1.msra.mxu1 %v267_v19  ;;  %383 = vmatprep.subr.mxu0 %v136_v20 }
  0x49   :  { %v132_v24 = vld [vmem:[#allocation5 + $0x128] sm:$0xff]  ;;  %454 = vmatprep.subr.mxu1 %v264_v21  ;;  %v131_v26 = vld [vmem:[#allocation5 + $0x120] sm:$0xff]  ;;  %384 = vmatpush1.msra.mxu0 %v135_v22 }
  0x4a   :  { %v260_v25 = vld [vmem:[#allocation5 + $0x528] sm:$0xff]  ;;  %v259_v27 = vld [vmem:[#allocation5 + $0x520] sm:$0xff]  ;;  %455 = vmatpush1.msra.mxu1 %v263_v23  ;;  %385 = vmatprep.subr.mxu0 %v132_v24 }
  0x4b   :  { %v128_v28 = vld [vmem:[#allocation5 + $0x108] sm:$0xff]  ;;  %456 = vmatprep.subr.mxu1 %v260_v25  ;;  %v127_v30 = vld [vmem:[#allocation5 + $0x100] sm:$0xff]  ;;  %386 = vmatpush1.msra.mxu0 %v131_v26 }
  0x4c   :  { %v256_v29 = vld [vmem:[#allocation5 + $0x508] sm:$0xff]  ;;  %v255_v31 = vld [vmem:[#allocation5 + $0x500] sm:$0xff]  ;;  %457 = vmatpush1.msra.mxu1 %v259_v27  ;;  %387 = vmatprep.subr.mxu0 %v128_v28 }
  0x4d   :  { %v124_v32 = vld [vmem:[#allocation5 + $0xe8] sm:$0xff]  ;;  %458 = vmatprep.subr.mxu1 %v256_v29  ;;  %v123_v34 = vld [vmem:[#allocation5 + $0xe0] sm:$0xff]  ;;  %388 = vmatpush1.msra.mxu0 %v127_v30 }
  0x4e   :  { %v252_v33 = vld [vmem:[#allocation5 + $0x4e8] sm:$0xff]  ;;  %v251_v35 = vld [vmem:[#allocation5 + $0x4e0] sm:$0xff]  ;;  %459 = vmatpush1.msra.mxu1 %v255_v31  ;;  %389 = vmatprep.subr.mxu0 %v124_v32 }
  0x4f   :  { %v120_v36 = vld [vmem:[#allocation5 + $0xc8] sm:$0xff]  ;;  %460 = vmatprep.subr.mxu1 %v252_v33  ;;  %v119_v38 = vld [vmem:[#allocation5 + $0xc0] sm:$0xff]  ;;  %390 = vmatpush1.msra.mxu0 %v123_v34 }
  0x50   :  { %v248_v37 = vld [vmem:[#allocation5 + $0x4c8] sm:$0xff]  ;;  %v247_v39 = vld [vmem:[#allocation5 + $0x4c0] sm:$0xff]  ;;  %461 = vmatpush1.msra.mxu1 %v251_v35  ;;  %391 = vmatprep.subr.mxu0 %v120_v36 }
  0x51   :  { %v116_v40 = vld [vmem:[#allocation5 + $0xa8] sm:$0xff]  ;;  %462 = vmatprep.subr.mxu1 %v248_v37  ;;  %v115_v42 = vld [vmem:[#allocation5 + $0xa0] sm:$0xff]  ;;  %392 = vmatpush1.msra.mxu0 %v119_v38 }
  0x52   :  { %v244_v41 = vld [vmem:[#allocation5 + $0x4a8] sm:$0xff]  ;;  %v243_v43 = vld [vmem:[#allocation5 + $0x4a0] sm:$0xff]  ;;  %463 = vmatpush1.msra.mxu1 %v247_v39  ;;  %393 = vmatprep.subr.mxu0 %v116_v40 }
  0x53   :  { %v112_v44 = vld [vmem:[#allocation5 + $0x88] sm:$0xff]  ;;  %464 = vmatprep.subr.mxu1 %v244_v41  ;;  %v111_v46 = vld [vmem:[#allocation5 + $0x80] sm:$0xff]  ;;  %394 = vmatpush1.msra.mxu0 %v115_v42 }
  0x54   :  { %v240_v45 = vld [vmem:[#allocation5 + $0x488] sm:$0xff]  ;;  %v239_v47 = vld [vmem:[#allocation5 + $0x480] sm:$0xff]  ;;  %465 = vmatpush1.msra.mxu1 %v243_v43  ;;  %395 = vmatprep.subr.mxu0 %v112_v44 }
  0x55   :  { %v108_v48 = vld [vmem:[#allocation5 + $0x68] sm:$0xff]  ;;  %466 = vmatprep.subr.mxu1 %v240_v45  ;;  %v107_v50 = vld [vmem:[#allocation5 + $0x60] sm:$0xff]  ;;  %396 = vmatpush1.msra.mxu0 %v111_v46 }
  0x56   :  { %v236_v49 = vld [vmem:[#allocation5 + $0x468] sm:$0xff]  ;;  %v235_v51 = vld [vmem:[#allocation5 + $0x460] sm:$0xff]  ;;  %467 = vmatpush1.msra.mxu1 %v239_v47  ;;  %397 = vmatprep.subr.mxu0 %v108_v48 }
  0x57   :  { %v104_v52 = vld [vmem:[#allocation5 + $0x48] sm:$0xff]  ;;  %468 = vmatprep.subr.mxu1 %v236_v49  ;;  %v103_v54 = vld [vmem:[#allocation5 + $0x40] sm:$0xff]  ;;  %398 = vmatpush1.msra.mxu0 %v107_v50 }
  0x58   :  { %v232_v53 = vld [vmem:[#allocation5 + $0x448] sm:$0xff]  ;;  %v231_v55 = vld [vmem:[#allocation5 + $0x440] sm:$0xff]  ;;  %469 = vmatpush1.msra.mxu1 %v235_v51  ;;  %399 = vmatprep.subr.mxu0 %v104_v52 }
  0x59   :  { %v100_v56 = vld [vmem:[#allocation5 + $0x28] sm:$0xff]  ;;  %470 = vmatprep.subr.mxu1 %v232_v53  ;;  %v99_v58 = vld [vmem:[#allocation5 + $0x20] sm:$0xff]  ;;  %400 = vmatpush1.msra.mxu0 %v103_v54 }
  0x5a   :  { %v228_v57 = vld [vmem:[#allocation5 + $0x428] sm:$0xff]  ;;  %v227_v59 = vld [vmem:[#allocation5 + $0x420] sm:$0xff]  ;;  %471 = vmatpush1.msra.mxu1 %v231_v55  ;;  %401 = vmatprep.subr.mxu0 %v100_v56 }
  0x5b   :  { %v96_v60 = vld [vmem:[#allocation5 + $0x8] sm:$0xff]  ;;  %472 = vmatprep.subr.mxu1 %v228_v57  ;;  %v95_v62 = vld [vmem:[#allocation5] sm:$0xff]  ;;  %402 = vmatpush1.msra.mxu0 %v99_v58 }
  0x5c   :  { %v224_v61 = vld [vmem:[#allocation5 + $0x408] sm:$0xff]  ;;  %v223_v63 = vld [vmem:[#allocation5 + $0x400] sm:$0xff]  ;;  %473 = vmatpush1.msra.mxu1 %v227_v59  ;;  %403 = vmatprep.subr.mxu0 %v96_v60 }
  0x5d   :  { %v220_v0 = vld [vmem:[#allocation5 + $0x3e8] sm:$0xff]  ;;  %474 = vmatprep.subr.mxu1 %v224_v61  ;;  %v219_v2 = vld [vmem:[#allocation5 + $0x3e0] sm:$0xff]  ;;  %404 = vmatpush1.msra.mxu0 %v95_v62 }
  0x5e   :  { %v348_v1 = vld [vmem:[#allocation5 + $0x7e8] sm:$0xff]  ;;  %v347_v3 = vld [vmem:[#allocation5 + $0x7e0] sm:$0xff]  ;;  %475 = vmatpush1.msra.mxu1 %v223_v63  ;;  %405 = vmatprep.subr.mxu0 %v220_v0 }
  0x5f   :  { %v216_v4 = vld [vmem:[#allocation5 + $0x3c8] sm:$0xff]  ;;  %476 = vmatprep.subr.mxu1 %v348_v1  ;;  %v215_v6 = vld [vmem:[#allocation5 + $0x3c0] sm:$0xff]  ;;  %406 = vmatpush2.msra.mxu0 %v219_v2  ;;  %v1753_v2 = vld [vmem:[#allocation2 + $0x18] sm:$0xff] }
  0x60   :  { %v344_v5 = vld [vmem:[#allocation5 + $0x7c8] sm:$0xff]  ;;  %v343_v7 = vld [vmem:[#allocation5 + $0x7c0] sm:$0xff]  ;;  %477 = vmatpush2.msra.mxu1 %v347_v3  ;;  %407 = vmatprep.subr.mxu0 %v216_v4  ;;  %v158_v3 = vld [vmem:[#allocation5 + $0x1f8] sm:$0xff] }
  0x61   :  { %v212_v8 = vld [vmem:[#allocation5 + $0x3a8] sm:$0xff]  ;;  %478 = vmatprep.subr.mxu1 %v344_v5  ;;  %v211_v10 = vld [vmem:[#allocation5 + $0x3a0] sm:$0xff]  ;;  %408 = vmatpush2.msra.mxu0 %v215_v6  ;;  %v286_v4 = vld [vmem:[#allocation5 + $0x5f8] sm:$0xff] }
  0x62   :  { %v340_v9 = vld [vmem:[#allocation5 + $0x7a8] sm:$0xff]  ;;  %v339_v11 = vld [vmem:[#allocation5 + $0x7a0] sm:$0xff]  ;;  %479 = vmatpush2.msra.mxu1 %v343_v7  ;;  %409 = vmatprep.subr.mxu0 %v212_v8  ;;  %v1756_v5 = vld [vmem:[#allocation2 + $0x10] sm:$0xff] }
  0x63   :  { %v208_v12 = vld [vmem:[#allocation5 + $0x388] sm:$0xff]  ;;  %480 = vmatprep.subr.mxu1 %v340_v9  ;;  %v207_v14 = vld [vmem:[#allocation5 + $0x380] sm:$0xff]  ;;  %410 = vmatpush2.msra.mxu0 %v211_v10  ;;  %v157_v6 = vld [vmem:[#allocation5 + $0x1f0] sm:$0xff] }
  0x64   :  { %v336_v13 = vld [vmem:[#allocation5 + $0x788] sm:$0xff]  ;;  %v335_v15 = vld [vmem:[#allocation5 + $0x780] sm:$0xff]  ;;  %481 = vmatpush2.msra.mxu1 %v339_v11  ;;  %411 = vmatprep.subr.mxu0 %v208_v12  ;;  %v285_v7 = vld [vmem:[#allocation5 + $0x5f0] sm:$0xff] }
  0x65   :  { %v204_v16 = vld [vmem:[#allocation5 + $0x368] sm:$0xff]  ;;  %482 = vmatprep.subr.mxu1 %v336_v13  ;;  %v203_v18 = vld [vmem:[#allocation5 + $0x360] sm:$0xff]  ;;  %412 = vmatpush2.msra.mxu0 %v207_v14  ;;  %v154_v8 = vld [vmem:[#allocation5 + $0x1d8] sm:$0xff] }
  0x66   :  { %v332_v17 = vld [vmem:[#allocation5 + $0x768] sm:$0xff]  ;;  %v331_v19 = vld [vmem:[#allocation5 + $0x760] sm:$0xff]  ;;  %483 = vmatpush2.msra.mxu1 %v335_v15  ;;  %413 = vmatprep.subr.mxu0 %v204_v16  ;;  %v282_v9 = vld [vmem:[#allocation5 + $0x5d8] sm:$0xff] }
  0x67   :  { %v200_v20 = vld [vmem:[#allocation5 + $0x348] sm:$0xff]  ;;  %484 = vmatprep.subr.mxu1 %v332_v17  ;;  %v199_v22 = vld [vmem:[#allocation5 + $0x340] sm:$0xff]  ;;  %414 = vmatpush2.msra.mxu0 %v203_v18  ;;  %v153_v10 = vld [vmem:[#allocation5 + $0x1d0] sm:$0xff] }
  0x68   :  { %v328_v21 = vld [vmem:[#allocation5 + $0x748] sm:$0xff]  ;;  %v327_v23 = vld [vmem:[#allocation5 + $0x740] sm:$0xff]  ;;  %485 = vmatpush2.msra.mxu1 %v331_v19  ;;  %415 = vmatprep.subr.mxu0 %v200_v20  ;;  %v281_v11 = vld [vmem:[#allocation5 + $0x5d0] sm:$0xff] }
  0x69   :  { %v196_v24 = vld [vmem:[#allocation5 + $0x328] sm:$0xff]  ;;  %486 = vmatprep.subr.mxu1 %v328_v21  ;;  %v195_v26 = vld [vmem:[#allocation5 + $0x320] sm:$0xff]  ;;  %416 = vmatpush2.msra.mxu0 %v199_v22  ;;  %v150_v12 = vld [vmem:[#allocation5 + $0x1b8] sm:$0xff] }
  0x6a   :  { %v324_v25 = vld [vmem:[#allocation5 + $0x728] sm:$0xff]  ;;  %v323_v27 = vld [vmem:[#allocation5 + $0x720] sm:$0xff]  ;;  %487 = vmatpush2.msra.mxu1 %v327_v23  ;;  %417 = vmatprep.subr.mxu0 %v196_v24  ;;  %v278_v13 = vld [vmem:[#allocation5 + $0x5b8] sm:$0xff] }
  0x6b   :  { %v192_v28 = vld [vmem:[#allocation5 + $0x308] sm:$0xff]  ;;  %488 = vmatprep.subr.mxu1 %v324_v25  ;;  %v191_v30 = vld [vmem:[#allocation5 + $0x300] sm:$0xff]  ;;  %418 = vmatpush2.msra.mxu0 %v195_v26  ;;  %v149_v14 = vld [vmem:[#allocation5 + $0x1b0] sm:$0xff] }
  0x6c   :  { %v320_v29 = vld [vmem:[#allocation5 + $0x708] sm:$0xff]  ;;  %v319_v31 = vld [vmem:[#allocation5 + $0x700] sm:$0xff]  ;;  %489 = vmatpush2.msra.mxu1 %v323_v27  ;;  %419 = vmatprep.subr.mxu0 %v192_v28  ;;  %v277_v15 = vld [vmem:[#allocation5 + $0x5b0] sm:$0xff] }
  0x6d   :  { %v188_v32 = vld [vmem:[#allocation5 + $0x2e8] sm:$0xff]  ;;  %490 = vmatprep.subr.mxu1 %v320_v29  ;;  %v187_v34 = vld [vmem:[#allocation5 + $0x2e0] sm:$0xff]  ;;  %420 = vmatpush2.msra.mxu0 %v191_v30  ;;  %v146_v16 = vld [vmem:[#allocation5 + $0x198] sm:$0xff] }
  0x6e   :  { %v316_v33 = vld [vmem:[#allocation5 + $0x6e8] sm:$0xff]  ;;  %v315_v35 = vld [vmem:[#allocation5 + $0x6e0] sm:$0xff]  ;;  %491 = vmatpush2.msra.mxu1 %v319_v31  ;;  %421 = vmatprep.subr.mxu0 %v188_v32  ;;  %v274_v17 = vld [vmem:[#allocation5 + $0x598] sm:$0xff] }
  0x6f   :  { %v184_v36 = vld [vmem:[#allocation5 + $0x2c8] sm:$0xff]  ;;  %492 = vmatprep.subr.mxu1 %v316_v33  ;;  %v183_v38 = vld [vmem:[#allocation5 + $0x2c0] sm:$0xff]  ;;  %422 = vmatpush2.msra.mxu0 %v187_v34  ;;  %v145_v18 = vld [vmem:[#allocation5 + $0x190] sm:$0xff] }
  0x70   :  { %v312_v37 = vld [vmem:[#allocation5 + $0x6c8] sm:$0xff]  ;;  %v311_v39 = vld [vmem:[#allocation5 + $0x6c0] sm:$0xff]  ;;  %493 = vmatpush2.msra.mxu1 %v315_v35  ;;  %423 = vmatprep.subr.mxu0 %v184_v36  ;;  %v273_v19 = vld [vmem:[#allocation5 + $0x590] sm:$0xff] }
  0x71   :  { %v180_v40 = vld [vmem:[#allocation5 + $0x2a8] sm:$0xff]  ;;  %494 = vmatprep.subr.mxu1 %v312_v37  ;;  %v179_v42 = vld [vmem:[#allocation5 + $0x2a0] sm:$0xff]  ;;  %424 = vmatpush2.msra.mxu0 %v183_v38  ;;  %v142_v20 = vld [vmem:[#allocation5 + $0x178] sm:$0xff] }
  0x72   :  { %v308_v41 = vld [vmem:[#allocation5 + $0x6a8] sm:$0xff]  ;;  %v307_v43 = vld [vmem:[#allocation5 + $0x6a0] sm:$0xff]  ;;  %495 = vmatpush2.msra.mxu1 %v311_v39  ;;  %425 = vmatprep.subr.mxu0 %v180_v40  ;;  %v270_v21 = vld [vmem:[#allocation5 + $0x578] sm:$0xff] }
  0x73   :  { %v176_v44 = vld [vmem:[#allocation5 + $0x288] sm:$0xff]  ;;  %496 = vmatprep.subr.mxu1 %v308_v41  ;;  %v175_v46 = vld [vmem:[#allocation5 + $0x280] sm:$0xff]  ;;  %426 = vmatpush2.msra.mxu0 %v179_v42  ;;  %v141_v22 = vld [vmem:[#allocation5 + $0x170] sm:$0xff] }
  0x74   :  { %v304_v45 = vld [vmem:[#allocation5 + $0x688] sm:$0xff]  ;;  %v303_v47 = vld [vmem:[#allocation5 + $0x680] sm:$0xff]  ;;  %497 = vmatpush2.msra.mxu1 %v307_v43  ;;  %427 = vmatprep.subr.mxu0 %v176_v44  ;;  %v269_v23 = vld [vmem:[#allocation5 + $0x570] sm:$0xff] }
  0x75   :  { %v172_v48 = vld [vmem:[#allocation5 + $0x268] sm:$0xff]  ;;  %498 = vmatprep.subr.mxu1 %v304_v45  ;;  %v171_v50 = vld [vmem:[#allocation5 + $0x260] sm:$0xff]  ;;  %428 = vmatpush2.msra.mxu0 %v175_v46  ;;  %v138_v24 = vld [vmem:[#allocation5 + $0x158] sm:$0xff] }
  0x76   :  { %v300_v49 = vld [vmem:[#allocation5 + $0x668] sm:$0xff]  ;;  %v299_v51 = vld [vmem:[#allocation5 + $0x660] sm:$0xff]  ;;  %499 = vmatpush2.msra.mxu1 %v303_v47  ;;  %429 = vmatprep.subr.mxu0 %v172_v48  ;;  %v266_v25 = vld [vmem:[#allocation5 + $0x558] sm:$0xff] }
  0x77   :  { %v168_v52 = vld [vmem:[#allocation5 + $0x248] sm:$0xff]  ;;  %500 = vmatprep.subr.mxu1 %v300_v49  ;;  %v167_v54 = vld [vmem:[#allocation5 + $0x240] sm:$0xff]  ;;  %430 = vmatpush2.msra.mxu0 %v171_v50  ;;  %v137_v26 = vld [vmem:[#allocation5 + $0x150] sm:$0xff] }
  0x78   :  { %v296_v53 = vld [vmem:[#allocation5 + $0x648] sm:$0xff]  ;;  %v295_v55 = vld [vmem:[#allocation5 + $0x640] sm:$0xff]  ;;  %501 = vmatpush2.msra.mxu1 %v299_v51  ;;  %431 = vmatprep.subr.mxu0 %v168_v52  ;;  %v265_v27 = vld [vmem:[#allocation5 + $0x550] sm:$0xff] }
  0x79   :  { %v164_v56 = vld [vmem:[#allocation5 + $0x228] sm:$0xff]  ;;  %502 = vmatprep.subr.mxu1 %v296_v53  ;;  %v163_v58 = vld [vmem:[#allocation5 + $0x220] sm:$0xff]  ;;  %432 = vmatpush2.msra.mxu0 %v167_v54  ;;  %v134_v28 = vld [vmem:[#allocation5 + $0x138] sm:$0xff] }
  0x7a   :  { %v292_v57 = vld [vmem:[#allocation5 + $0x628] sm:$0xff]  ;;  %v291_v59 = vld [vmem:[#allocation5 + $0x620] sm:$0xff]  ;;  %503 = vmatpush2.msra.mxu1 %v295_v55  ;;  %433 = vmatprep.subr.mxu0 %v164_v56  ;;  %v262_v29 = vld [vmem:[#allocation5 + $0x538] sm:$0xff] }
  0x7b   :  { %v160_v60 = vld [vmem:[#allocation5 + $0x208] sm:$0xff]  ;;  %504 = vmatprep.subr.mxu1 %v292_v57  ;;  %v159_v62 = vld [vmem:[#allocation5 + $0x200] sm:$0xff]  ;;  %434 = vmatpush2.msra.mxu0 %v163_v58  ;;  %v133_v30 = vld [vmem:[#allocation5 + $0x130] sm:$0xff] }
  0x7c   :  { %v288_v61 = vld [vmem:[#allocation5 + $0x608] sm:$0xff]  ;;  %505 = vmatpush2.msra.mxu1 %v291_v59  ;;  %v287_v0 = vld [vmem:[#allocation5 + $0x600] sm:$0xff]  ;;  %435 = vmatprep.subr.mxu0 %v160_v60  ;;  %v261_v31 = vld [vmem:[#allocation5 + $0x530] sm:$0xff] }
  0x7d   :  { %v1749_v63 = vld [vmem:[#allocation2 + $0x8] sm:$0xff]  ;;  %v1751_v1 = vld [vmem:[#allocation2] sm:$0xff]  ;;  %506 = vmatprep.subr.mxu1 %v288_v61  ;;  %436 = vmatpush2.msra.mxu0 %v159_v62  ;;  %v130_v32 = vld [vmem:[#allocation5 + $0x118] sm:$0xff] }
  0x7e   :  { %437 = vmatprep.mubr.f32.mxu0 %v1749_v63  ;;  %507 = vmatpush2.msra.mxu1 %v287_v0  ;;  %v258_v33 = vld [vmem:[#allocation5 + $0x518] sm:$0xff]  ;;  %v129_v34 = vld [vmem:[#allocation5 + $0x110] sm:$0xff] }
  0x7f   :  { %438 = vmatmul.mubr.f32.vlgmr.msra.gmra.mxu0 %v1751_v1  ;;  %508 = vmatprep.mubr.f32.mxu1 %v1753_v2  ;;  %v257_v35 = vld [vmem:[#allocation5 + $0x510] sm:$0xff]  ;;  %v126_v36 = vld [vmem:[#allocation5 + $0xf8] sm:$0xff] }
  0x80   :  { %515 = vmatprep.subr.mxu0 %v158_v3  ;;  %586 = vmatprep.subr.mxu1 %v286_v4  ;;  %v254_v37 = vld [vmem:[#allocation5 + $0x4f8] sm:$0xff]  ;;  %v125_v38 = vld [vmem:[#allocation5 + $0xf0] sm:$0xff] }
  0x81   :  { %509 = vmatmul.mubr.f32.vlgmr.msra.gmra.mxu1 %v1756_v5  ;;  %516 = vmatpush1.msra.mxu0 %v157_v6  ;;  %v253_v39 = vld [vmem:[#allocation5 + $0x4f0] sm:$0xff]  ;;  %v122_v40 = vld [vmem:[#allocation5 + $0xd8] sm:$0xff] }
  0x82   :  { %587 = vmatpush1.msra.mxu1 %v285_v7  ;;  %517 = vmatprep.subr.mxu0 %v154_v8  ;;  %v250_v41 = vld [vmem:[#allocation5 + $0x4d8] sm:$0xff]  ;;  %v121_v42 = vld [vmem:[#allocation5 + $0xd0] sm:$0xff] }
  0x83   :  { %588 = vmatprep.subr.mxu1 %v282_v9  ;;  %518 = vmatpush1.msra.mxu0 %v153_v10  ;;  %v249_v43 = vld [vmem:[#allocation5 + $0x4d0] sm:$0xff]  ;;  %v118_v44 = vld [vmem:[#allocation5 + $0xb8] sm:$0xff] }
  0x84   :  { %589 = vmatpush1.msra.mxu1 %v281_v11  ;;  %519 = vmatprep.subr.mxu0 %v150_v12  ;;  %v246_v45 = vld [vmem:[#allocation5 + $0x4b8] sm:$0xff]  ;;  %v117_v46 = vld [vmem:[#allocation5 + $0xb0] sm:$0xff] }
  0x85   :  { %590 = vmatprep.subr.mxu1 %v278_v13  ;;  %520 = vmatpush1.msra.mxu0 %v149_v14  ;;  %v245_v47 = vld [vmem:[#allocation5 + $0x4b0] sm:$0xff]  ;;  %v114_v48 = vld [vmem:[#allocation5 + $0x98] sm:$0xff] }
  0x86   :  { %591 = vmatpush1.msra.mxu1 %v277_v15  ;;  %521 = vmatprep.subr.mxu0 %v146_v16  ;;  %v242_v49 = vld [vmem:[#allocation5 + $0x498] sm:$0xff]  ;;  %v113_v50 = vld [vmem:[#allocation5 + $0x90] sm:$0xff] }
  0x87   :  { %592 = vmatprep.subr.mxu1 %v274_v17  ;;  %522 = vmatpush1.msra.mxu0 %v145_v18  ;;  %v241_v51 = vld [vmem:[#allocation5 + $0x490] sm:$0xff]  ;;  %v110_v52 = vld [vmem:[#allocation5 + $0x78] sm:$0xff] }
  0x88   :  { %593 = vmatpush1.msra.mxu1 %v273_v19  ;;  %523 = vmatprep.subr.mxu0 %v142_v20  ;;  %v238_v53 = vld [vmem:[#allocation5 + $0x478] sm:$0xff]  ;;  %v109_v54 = vld [vmem:[#allocation5 + $0x70] sm:$0xff] }
  0x89   :  { %594 = vmatprep.subr.mxu1 %v270_v21  ;;  %524 = vmatpush1.msra.mxu0 %v141_v22  ;;  %v237_v55 = vld [vmem:[#allocation5 + $0x470] sm:$0xff]  ;;  %v106_v56 = vld [vmem:[#allocation5 + $0x58] sm:$0xff] }
  0x8a   :  { %595 = vmatpush1.msra.mxu1 %v269_v23  ;;  %525 = vmatprep.subr.mxu0 %v138_v24  ;;  %v234_v57 = vld [vmem:[#allocation5 + $0x458] sm:$0xff]  ;;  %v105_v58 = vld [vmem:[#allocation5 + $0x50] sm:$0xff] }
  0x8b   :  { %596 = vmatprep.subr.mxu1 %v266_v25  ;;  %526 = vmatpush1.msra.mxu0 %v137_v26  ;;  %v233_v59 = vld [vmem:[#allocation5 + $0x450] sm:$0xff]  ;;  %v102_v60 = vld [vmem:[#allocation5 + $0x38] sm:$0xff] }
  0x8c   :  { %597 = vmatpush1.msra.mxu1 %v265_v27  ;;  %527 = vmatprep.subr.mxu0 %v134_v28  ;;  %v230_v61 = vld [vmem:[#allocation5 + $0x438] sm:$0xff]  ;;  %v101_v62 = vld [vmem:[#allocation5 + $0x30] sm:$0xff] }
  0x8d   :  { %598 = vmatprep.subr.mxu1 %v262_v29  ;;  %528 = vmatpush1.msra.mxu0 %v133_v30  ;;  %v229_v0 = vld [vmem:[#allocation5 + $0x430] sm:$0xff]  ;;  %v98_v3 = vld [vmem:[#allocation5 + $0x18] sm:$0xff] }
  0x8e   :  { %599 = vmatpush1.msra.mxu1 %v261_v31  ;;  %529 = vmatprep.subr.mxu0 %v130_v32  ;;  %v226_v4 = vld [vmem:[#allocation5 + $0x418] sm:$0xff]  ;;  %v97_v6 = vld [vmem:[#allocation5 + $0x10] sm:$0xff] }
  0x8f   :  { %600 = vmatprep.subr.mxu1 %v258_v33  ;;  %530 = vmatpush1.msra.mxu0 %v129_v34  ;;  %v225_v7 = vld [vmem:[#allocation5 + $0x410] sm:$0xff]  ;;  %v222_v8 = vld [vmem:[#allocation5 + $0x3f8] sm:$0xff] }
  0x90   :  { %601 = vmatpush1.msra.mxu1 %v257_v35  ;;  %531 = vmatprep.subr.mxu0 %v126_v36  ;;  %v350_v9 = vld [vmem:[#allocation5 + $0x7f8] sm:$0xff]  ;;  %v221_v10 = vld [vmem:[#allocation5 + $0x3f0] sm:$0xff] }
  0x91   :  { %602 = vmatprep.subr.mxu1 %v254_v37  ;;  %532 = vmatpush1.msra.mxu0 %v125_v38  ;;  %v349_v11 = vld [vmem:[#allocation5 + $0x7f0] sm:$0xff]  ;;  %v218_v12 = vld [vmem:[#allocation5 + $0x3d8] sm:$0xff] }
  0x92   :  { %603 = vmatpush1.msra.mxu1 %v253_v39  ;;  %533 = vmatprep.subr.mxu0 %v122_v40  ;;  %v346_v13 = vld [vmem:[#allocation5 + $0x7d8] sm:$0xff]  ;;  %v217_v14 = vld [vmem:[#allocation5 + $0x3d0] sm:$0xff] }
  0x93   :  { %604 = vmatprep.subr.mxu1 %v250_v41  ;;  %534 = vmatpush1.msra.mxu0 %v121_v42  ;;  %v345_v15 = vld [vmem:[#allocation5 + $0x7d0] sm:$0xff]  ;;  %v214_v16 = vld [vmem:[#allocation5 + $0x3b8] sm:$0xff] }
  0x94   :  { %605 = vmatpush1.msra.mxu1 %v249_v43  ;;  %535 = vmatprep.subr.mxu0 %v118_v44  ;;  %v342_v17 = vld [vmem:[#allocation5 + $0x7b8] sm:$0xff]  ;;  %v213_v18 = vld [vmem:[#allocation5 + $0x3b0] sm:$0xff] }
  0x95   :  { %606 = vmatprep.subr.mxu1 %v246_v45  ;;  %536 = vmatpush1.msra.mxu0 %v117_v46  ;;  %v341_v19 = vld [vmem:[#allocation5 + $0x7b0] sm:$0xff]  ;;  %v210_v20 = vld [vmem:[#allocation5 + $0x398] sm:$0xff] }
  0x96   :  { %607 = vmatpush1.msra.mxu1 %v245_v47  ;;  %537 = vmatprep.subr.mxu0 %v114_v48  ;;  %v338_v21 = vld [vmem:[#allocation5 + $0x798] sm:$0xff]  ;;  %v209_v22 = vld [vmem:[#allocation5 + $0x390] sm:$0xff] }
  0x97   :  { %608 = vmatprep.subr.mxu1 %v242_v49  ;;  %538 = vmatpush1.msra.mxu0 %v113_v50  ;;  %v337_v23 = vld [vmem:[#allocation5 + $0x790] sm:$0xff]  ;;  %v206_v24 = vld [vmem:[#allocation5 + $0x378] sm:$0xff] }
  0x98   :  { %609 = vmatpush1.msra.mxu1 %v241_v51  ;;  %539 = vmatprep.subr.mxu0 %v110_v52  ;;  %v334_v25 = vld [vmem:[#allocation5 + $0x778] sm:$0xff]  ;;  %v205_v26 = vld [vmem:[#allocation5 + $0x370] sm:$0xff] }
  0x99   :  { %610 = vmatprep.subr.mxu1 %v238_v53  ;;  %540 = vmatpush1.msra.mxu0 %v109_v54  ;;  %v333_v27 = vld [vmem:[#allocation5 + $0x770] sm:$0xff]  ;;  %v202_v28 = vld [vmem:[#allocation5 + $0x358] sm:$0xff] }
  0x9a   :  { %611 = vmatpush1.msra.mxu1 %v237_v55  ;;  %541 = vmatprep.subr.mxu0 %v106_v56  ;;  %v330_v29 = vld [vmem:[#allocation5 + $0x758] sm:$0xff]  ;;  %v201_v30 = vld [vmem:[#allocation5 + $0x350] sm:$0xff] }
  0x9b   :  { %612 = vmatprep.subr.mxu1 %v234_v57  ;;  %542 = vmatpush1.msra.mxu0 %v105_v58  ;;  %v329_v31 = vld [vmem:[#allocation5 + $0x750] sm:$0xff]  ;;  %v198_v32 = vld [vmem:[#allocation5 + $0x338] sm:$0xff] }
  0x9c   :  { %613 = vmatpush1.msra.mxu1 %v233_v59  ;;  %543 = vmatprep.subr.mxu0 %v102_v60  ;;  %v326_v33 = vld [vmem:[#allocation5 + $0x738] sm:$0xff]  ;;  %v197_v34 = vld [vmem:[#allocation5 + $0x330] sm:$0xff] }
  0x9d   :  { %614 = vmatprep.subr.mxu1 %v230_v61  ;;  %544 = vmatpush1.msra.mxu0 %v101_v62  ;;  %v325_v35 = vld [vmem:[#allocation5 + $0x730] sm:$0xff]  ;;  %v194_v36 = vld [vmem:[#allocation5 + $0x318] sm:$0xff] }
  0x9e   :  { %615 = vmatpush1.msra.mxu1 %v229_v0  ;;  %545 = vmatprep.subr.mxu0 %v98_v3  ;;  %v322_v37 = vld [vmem:[#allocation5 + $0x718] sm:$0xff]  ;;  %v193_v38 = vld [vmem:[#allocation5 + $0x310] sm:$0xff] }
  0x9f   :  { %616 = vmatprep.subr.mxu1 %v226_v4  ;;  %546 = vmatpush1.msra.mxu0 %v97_v6  ;;  %v321_v39 = vld [vmem:[#allocation5 + $0x710] sm:$0xff]  ;;  %v190_v40 = vld [vmem:[#allocation5 + $0x2f8] sm:$0xff] }
  0xa0   :  { %617 = vmatpush1.msra.mxu1 %v225_v7  ;;  %547 = vmatprep.subr.mxu0 %v222_v8  ;;  %v318_v41 = vld [vmem:[#allocation5 + $0x6f8] sm:$0xff]  ;;  %v189_v42 = vld [vmem:[#allocation5 + $0x2f0] sm:$0xff] }
  0xa1   :  { %618 = vmatprep.subr.mxu1 %v350_v9  ;;  %548 = vmatpush2.msra.mxu0 %v221_v10  ;;  %v317_v43 = vld [vmem:[#allocation5 + $0x6f0] sm:$0xff]  ;;  %v186_v44 = vld [vmem:[#allocation5 + $0x2d8] sm:$0xff] }
  0xa2   :  { %619 = vmatpush2.msra.mxu1 %v349_v11  ;;  %549 = vmatprep.subr.mxu0 %v218_v12  ;;  %v314_v45 = vld [vmem:[#allocation5 + $0x6d8] sm:$0xff]  ;;  %v185_v46 = vld [vmem:[#allocation5 + $0x2d0] sm:$0xff] }
  0xa3   :  { %620 = vmatprep.subr.mxu1 %v346_v13  ;;  %550 = vmatpush2.msra.mxu0 %v217_v14  ;;  %v313_v47 = vld [vmem:[#allocation5 + $0x6d0] sm:$0xff]  ;;  %v182_v48 = vld [vmem:[#allocation5 + $0x2b8] sm:$0xff]  ;;  %v721_v13 = vld [vmem:[#allocation8 + $0x1e0] sm:$0xff] }
  0xa4   :  { %621 = vmatpush2.msra.mxu1 %v345_v15  ;;  %551 = vmatprep.subr.mxu0 %v214_v16  ;;  %v310_v49 = vld [vmem:[#allocation5 + $0x6b8] sm:$0xff]  ;;  %v181_v50 = vld [vmem:[#allocation5 + $0x2b0] sm:$0xff]  ;;  %v717_v15 = vld [vmem:[#allocation8 + $0x1c0] sm:$0xff] }
  0xa5   :  { %622 = vmatprep.subr.mxu1 %v342_v17  ;;  %552 = vmatpush2.msra.mxu0 %v213_v18  ;;  %v309_v51 = vld [vmem:[#allocation5 + $0x6b0] sm:$0xff]  ;;  %v178_v52 = vld [vmem:[#allocation5 + $0x298] sm:$0xff]  ;;  %v713_v17 = vld [vmem:[#allocation8 + $0x1a0] sm:$0xff] }
  0xa6   :  { %623 = vmatpush2.msra.mxu1 %v341_v19  ;;  %553 = vmatprep.subr.mxu0 %v210_v20  ;;  %v306_v53 = vld [vmem:[#allocation5 + $0x698] sm:$0xff]  ;;  %v177_v54 = vld [vmem:[#allocation5 + $0x290] sm:$0xff] }
  0xa7   :  { %624 = vmatprep.subr.mxu1 %v338_v21  ;;  %554 = vmatpush2.msra.mxu0 %v209_v22  ;;  %v305_v55 = vld [vmem:[#allocation5 + $0x690] sm:$0xff]  ;;  %v174_v56 = vld [vmem:[#allocation5 + $0x278] sm:$0xff]  ;;  %v697_v21 = vld [vmem:[#allocation8 + $0x120] sm:$0xff] }
  0xa8   :  { %625 = vmatpush2.msra.mxu1 %v337_v23  ;;  %555 = vmatprep.subr.mxu0 %v206_v24  ;;  %v302_v57 = vld [vmem:[#allocation5 + $0x678] sm:$0xff]  ;;  %v173_v58 = vld [vmem:[#allocation5 + $0x270] sm:$0xff]  ;;  %v693_v23 = vld [vmem:[#allocation8 + $0x100] sm:$0xff] }
  0xa9   :  { %626 = vmatprep.subr.mxu1 %v334_v25  ;;  %556 = vmatpush2.msra.mxu0 %v205_v26  ;;  %v301_v59 = vld [vmem:[#allocation5 + $0x670] sm:$0xff]  ;;  %v170_v60 = vld [vmem:[#allocation5 + $0x258] sm:$0xff]  ;;  %v689_v25 = vld [vmem:[#allocation8 + $0xe0] sm:$0xff] }
  0xaa   :  { %627 = vmatpush2.msra.mxu1 %v333_v27  ;;  %557 = vmatprep.subr.mxu0 %v202_v28  ;;  %v298_v61 = vld [vmem:[#allocation5 + $0x658] sm:$0xff]  ;;  %v169_v62 = vld [vmem:[#allocation5 + $0x250] sm:$0xff]  ;;  %v685_v27 = vld [vmem:[#allocation8 + $0xc0] sm:$0xff] }
  0xab   :  { %628 = vmatprep.subr.mxu1 %v330_v29  ;;  %558 = vmatpush2.msra.mxu0 %v201_v30  ;;  %v297_v0 = vld [vmem:[#allocation5 + $0x650] sm:$0xff]  ;;  %v166_v3 = vld [vmem:[#allocation5 + $0x238] sm:$0xff]  ;;  %v681_v30 = vld [vmem:[#allocation8 + $0xa0] sm:$0xff] }
  0xac   :  { %629 = vmatpush2.msra.mxu1 %v329_v31  ;;  %559 = vmatprep.subr.mxu0 %v198_v32  ;;  %v294_v4 = vld [vmem:[#allocation5 + $0x638] sm:$0xff]  ;;  %v165_v6 = vld [vmem:[#allocation5 + $0x230] sm:$0xff]  ;;  %v849_v31 = vld [vmem:[#allocation8 + $0x5e0] sm:$0xff] }
  0xad   :  { %630 = vmatprep.subr.mxu1 %v326_v33  ;;  %560 = vmatpush2.msra.mxu0 %v197_v34  ;;  %v293_v7 = vld [vmem:[#allocation5 + $0x630] sm:$0xff]  ;;  %v162_v8 = vld [vmem:[#allocation5 + $0x218] sm:$0xff]  ;;  %v677_v34 = vld [vmem:[#allocation8 + $0x80] sm:$0xff] }
  0xae   :  { %631 = vmatpush2.msra.mxu1 %v325_v35  ;;  %561 = vmatprep.subr.mxu0 %v194_v36  ;;  %v290_v9 = vld [vmem:[#allocation5 + $0x618] sm:$0xff]  ;;  %v161_v10 = vld [vmem:[#allocation5 + $0x210] sm:$0xff]  ;;  %v845_v35 = vld [vmem:[#allocation8 + $0x5c0] sm:$0xff] }
  0xaf   :  { %632 = vmatprep.subr.mxu1 %v322_v37  ;;  %562 = vmatpush2.msra.mxu0 %v193_v38  ;;  %v289_v11 = vld [vmem:[#allocation5 + $0x610] sm:$0xff]  ;;  %v673_v38 = vld [vmem:[#allocation8 + $0x60] sm:$0xff] }
  0xb0   :  { %633 = vmatpush2.msra.mxu1 %v321_v39  ;;  %563 = vmatprep.subr.mxu0 %v190_v40  ;;  %v722_v12 = vld [vmem:[#allocation8 + $0x1e8] sm:$0xff]  ;;  %v841_v39 = vld [vmem:[#allocation8 + $0x5a0] sm:$0xff] }
  0xb1   :  { %634 = vmatprep.subr.mxu1 %v318_v41  ;;  %564 = vmatpush2.msra.mxu0 %v189_v42  ;;  %v718_v14 = vld [vmem:[#allocation8 + $0x1c8] sm:$0xff]  ;;  %v669_v42 = vld [vmem:[#allocation8 + $0x40] sm:$0xff] }
  0xb2   :  { %635 = vmatpush2.msra.mxu1 %v317_v43  ;;  %565 = vmatprep.subr.mxu0 %v186_v44  ;;  %v714_v16 = vld [vmem:[#allocation8 + $0x1a8] sm:$0xff]  ;;  %v837_v43 = vld [vmem:[#allocation8 + $0x580] sm:$0xff] }
  0xb3   :  { %636 = vmatprep.subr.mxu1 %v314_v45  ;;  %566 = vmatpush2.msra.mxu0 %v185_v46  ;;  %v710_v18 = vld [vmem:[#allocation8 + $0x188] sm:$0xff]  ;;  %v665_v46 = vld [vmem:[#allocation8 + $0x20] sm:$0xff] }
  0xb4   :  { %637 = vmatpush2.msra.mxu1 %v313_v47  ;;  %567 = vmatprep.subr.mxu0 %v182_v48  ;;  %v706_v19 = vld [vmem:[#allocation8 + $0x168] sm:$0xff]  ;;  %v833_v47 = vld [vmem:[#allocation8 + $0x560] sm:$0xff] }
  0xb5   :  { %638 = vmatprep.subr.mxu1 %v310_v49  ;;  %568 = vmatpush2.msra.mxu0 %v181_v50  ;;  %v702_v20 = vld [vmem:[#allocation8 + $0x148] sm:$0xff]  ;;  %v661_v50 = vld [vmem:[#allocation8] sm:$0xff] }
  0xb6   :  { %639 = vmatpush2.msra.mxu1 %v309_v51  ;;  %569 = vmatprep.subr.mxu0 %v178_v52  ;;  %v694_v22 = vld [vmem:[#allocation8 + $0x108] sm:$0xff]  ;;  %v829_v51 = vld [vmem:[#allocation8 + $0x540] sm:$0xff] }
  0xb7   :  { %640 = vmatprep.subr.mxu1 %v306_v53  ;;  %570 = vmatpush2.msra.mxu0 %v177_v54  ;;  %v690_v24 = vld [vmem:[#allocation8 + $0xe8] sm:$0xff]  ;;  %v785_v54 = vld [vmem:[#allocation8 + $0x3e0] sm:$0xff] }
  0xb8   :  { %641 = vmatpush2.msra.mxu1 %v305_v55  ;;  %571 = vmatprep.subr.mxu0 %v174_v56  ;;  %v686_v26 = vld [vmem:[#allocation8 + $0xc8] sm:$0xff]  ;;  %v825_v55 = vld [vmem:[#allocation8 + $0x520] sm:$0xff] }
  0xb9   :  { %642 = vmatprep.subr.mxu1 %v302_v57  ;;  %572 = vmatpush2.msra.mxu0 %v173_v58  ;;  %v682_v28 = vld [vmem:[#allocation8 + $0xa8] sm:$0xff]  ;;  %v781_v58 = vld [vmem:[#allocation8 + $0x3c0] sm:$0xff] }
  0xba   :  { %643 = vmatpush2.msra.mxu1 %v301_v59  ;;  %573 = vmatprep.subr.mxu0 %v170_v60  ;;  %v850_v29 = vld [vmem:[#allocation8 + $0x5e8] sm:$0xff]  ;;  %v821_v59 = vld [vmem:[#allocation8 + $0x500] sm:$0xff] }
  0xbb   :  { %644 = vmatprep.subr.mxu1 %v298_v61  ;;  %574 = vmatpush2.msra.mxu0 %v169_v62  ;;  %v678_v32 = vld [vmem:[#allocation8 + $0x88] sm:$0xff]  ;;  %v777_v62 = vld [vmem:[#allocation8 + $0x3a0] sm:$0xff] }
  0xbc   :  { %645 = vmatpush2.msra.mxu1 %v297_v0  ;;  %575 = vmatprep.subr.mxu0 %v166_v3  ;;  %v846_v33 = vld [vmem:[#allocation8 + $0x5c8] sm:$0xff]  ;;  %v817_v0 = vld [vmem:[#allocation8 + $0x4e0] sm:$0xff] }
  0xbd   :  { %646 = vmatprep.subr.mxu1 %v294_v4  ;;  %576 = vmatpush2.msra.mxu0 %v165_v6  ;;  %v674_v36 = vld [vmem:[#allocation8 + $0x68] sm:$0xff]  ;;  %v773_v6 = vld [vmem:[#allocation8 + $0x380] sm:$0xff] }
  0xbe   :  { %647 = vmatpush2.msra.mxu1 %v293_v7  ;;  %577 = vmatprep.subr.mxu0 %v162_v8  ;;  %v842_v37 = vld [vmem:[#allocation8 + $0x5a8] sm:$0xff]  ;;  %v813_v7 = vld [vmem:[#allocation8 + $0x4c0] sm:$0xff] }
  0xbf   :  { %648 = vmatprep.subr.mxu1 %v290_v9  ;;  %578 = vmatpush2.msra.mxu0 %v161_v10  ;;  %v670_v40 = vld [vmem:[#allocation8 + $0x48] sm:$0xff]  ;;  %v769_v10 = vld [vmem:[#allocation8 + $0x360] sm:$0xff] }
  0xc0   :  { %579 = vmatprep.mubr.f32.mxu0 %v1749_v63  ;;  %649 = vmatpush2.msra.mxu1 %v289_v11  ;;  %v709_v63 = vld [vmem:[#allocation8 + $0x180] sm:$0xff]  ;;  %v838_v41 = vld [vmem:[#allocation8 + $0x588] sm:$0xff] }
  0xc1   :  { %650 = vmatprep.mubr.f32.mxu1 %v1753_v2  ;;  %580 = vmatmul.mubr.f32.vlgmr.msra.gmra.mxu0 %v1751_v1  ;;  %v705_v2 = vld [vmem:[#allocation8 + $0x160] sm:$0xff]  ;;  %v666_v44 = vld [vmem:[#allocation8 + $0x28] sm:$0xff] }
  0xc2   :  { %651 = vmatmul.mubr.f32.vlgmr.msra.gmra.mxu1 %v1756_v5  ;;  %939 = vmatprep.subr.mxu0 %v722_v12  ;;  %v701_v1 = vld [vmem:[#allocation8 + $0x140] sm:$0xff]  ;;  %v698_v5 = vld [vmem:[#allocation8 + $0x128] sm:$0xff] }
  0xc3   :  { %940 = vmatpush1.msra.mxu0 %v721_v13  ;;  %1010 = vmatprep.subr.mxu1 %v850_v29  ;;  %v834_v45 = vld [vmem:[#allocation8 + $0x568] sm:$0xff]  ;;  %v809_v11 = vld [vmem:[#allocation8 + $0x4a0] sm:$0xff] }
  0xc4   :  { %941 = vmatprep.subr.mxu0 %v718_v14  ;;  %1011 = vmatpush1.msra.mxu1 %v849_v31  ;;  %v662_v48 = vld [vmem:[#allocation8 + $0x8] sm:$0xff]  ;;  %v765_v14 = vld [vmem:[#allocation8 + $0x340] sm:$0xff] }
  0xc5   :  { %942 = vmatpush1.msra.mxu0 %v717_v15  ;;  %1012 = vmatprep.subr.mxu1 %v846_v33  ;;  %v830_v49 = vld [vmem:[#allocation8 + $0x548] sm:$0xff]  ;;  %v805_v15 = vld [vmem:[#allocation8 + $0x480] sm:$0xff] }
  0xc6   :  { %943 = vmatprep.subr.mxu0 %v714_v16  ;;  %1013 = vmatpush1.msra.mxu1 %v845_v35  ;;  %v786_v52 = vld [vmem:[#allocation8 + $0x3e8] sm:$0xff]  ;;  %v913_v31 = vld [vmem:[#allocation8 + $0x7e0] sm:$0xff] }
  0xc7   :  { %944 = vmatpush1.msra.mxu0 %v713_v17  ;;  %1014 = vmatprep.subr.mxu1 %v842_v37  ;;  %v826_v53 = vld [vmem:[#allocation8 + $0x528] sm:$0xff]  ;;  %v909_v35 = vld [vmem:[#allocation8 + $0x7c0] sm:$0xff] }
  0xc8   :  { %945 = vmatprep.subr.mxu0 %v710_v18  ;;  %1015 = vmatpush1.msra.mxu1 %v841_v39  ;;  %v782_v56 = vld [vmem:[#allocation8 + $0x3c8] sm:$0xff]  ;;  %v761_v18 = vld [vmem:[#allocation8 + $0x320] sm:$0xff] }
  0xc9   :  { %946 = vmatpush1.msra.mxu0 %v709_v63  ;;  %1016 = vmatprep.subr.mxu1 %v838_v41  ;;  %v822_v57 = vld [vmem:[#allocation8 + $0x508] sm:$0xff]  ;;  %v801_v63 = vld [vmem:[#allocation8 + $0x460] sm:$0xff] }
  0xca   :  { %947 = vmatprep.subr.mxu0 %v706_v19  ;;  %1017 = vmatpush1.msra.mxu1 %v837_v43  ;;  %v778_v60 = vld [vmem:[#allocation8 + $0x3a8] sm:$0xff]  ;;  %v905_v39 = vld [vmem:[#allocation8 + $0x7a0] sm:$0xff] }
  0xcb   :  { %948 = vmatpush1.msra.mxu0 %v705_v2  ;;  %1018 = vmatprep.subr.mxu1 %v834_v45  ;;  %v818_v61 = vld [vmem:[#allocation8 + $0x4e8] sm:$0xff]  ;;  %v901_v43 = vld [vmem:[#allocation8 + $0x780] sm:$0xff] }
  0xcc   :  { %949 = vmatprep.subr.mxu0 %v702_v20  ;;  %1019 = vmatpush1.msra.mxu1 %v833_v47  ;;  %v774_v3 = vld [vmem:[#allocation8 + $0x388] sm:$0xff]  ;;  %v757_v20 = vld [vmem:[#allocation8 + $0x300] sm:$0xff] }
  0xcd   :  { %950 = vmatpush1.msra.mxu0 %v701_v1  ;;  %1020 = vmatprep.subr.mxu1 %v830_v49  ;;  %v814_v4 = vld [vmem:[#allocation8 + $0x4c8] sm:$0xff]  ;;  %v797_v1 = vld [vmem:[#allocation8 + $0x440] sm:$0xff] }
  0xce   :  { %951 = vmatprep.subr.mxu0 %v698_v5  ;;  %1021 = vmatpush1.msra.mxu1 %v829_v51  ;;  %v770_v8 = vld [vmem:[#allocation8 + $0x368] sm:$0xff]  ;;  %v897_v47 = vld [vmem:[#allocation8 + $0x760] sm:$0xff]  ;;  %v724_v51 = vld [vmem:[#allocation8 + $0x1f8] sm:$0xff] }
  0xcf   :  { %952 = vmatpush1.msra.mxu0 %v697_v21  ;;  %1022 = vmatprep.subr.mxu1 %v826_v53  ;;  %v810_v9 = vld [vmem:[#allocation8 + $0x4a8] sm:$0xff] }
  0xd0   :  { %953 = vmatprep.subr.mxu0 %v694_v22  ;;  %1023 = vmatpush1.msra.mxu1 %v825_v55  ;;  %v766_v12 = vld [vmem:[#allocation8 + $0x348] sm:$0xff]  ;;  %v753_v22 = vld [vmem:[#allocation8 + $0x2e0] sm:$0xff] }
  0xd1   :  { %954 = vmatpush1.msra.mxu0 %v693_v23  ;;  %1024 = vmatprep.subr.mxu1 %v822_v57  ;;  %v806_v13 = vld [vmem:[#allocation8 + $0x488] sm:$0xff]  ;;  %v793_v23 = vld [vmem:[#allocation8 + $0x420] sm:$0xff] }
  0xd2   :  { %955 = vmatprep.subr.mxu0 %v690_v24  ;;  %1025 = vmatpush1.msra.mxu1 %v821_v59  ;;  %v762_v16 = vld [vmem:[#allocation8 + $0x328] sm:$0xff] }
  0xd3   :  { %956 = vmatpush1.msra.mxu0 %v689_v25  ;;  %1026 = vmatprep.subr.mxu1 %v818_v61  ;;  %v802_v17 = vld [vmem:[#allocation8 + $0x468] sm:$0xff] }
  0xd4   :  { %957 = vmatprep.subr.mxu0 %v686_v26  ;;  %1027 = vmatpush1.msra.mxu1 %v817_v0  ;;  %v758_v19 = vld [vmem:[#allocation8 + $0x308] sm:$0xff]  ;;  %v749_v26 = vld [vmem:[#allocation8 + $0x2c0] sm:$0xff] }
  0xd5   :  { %958 = vmatpush1.msra.mxu0 %v685_v27  ;;  %1028 = vmatprep.subr.mxu1 %v814_v4  ;;  %v798_v2 = vld [vmem:[#allocation8 + $0x448] sm:$0xff]  ;;  %v789_v27 = vld [vmem:[#allocation8 + $0x400] sm:$0xff] }
  0xd6   :  { %959 = vmatprep.subr.mxu0 %v682_v28  ;;  %1029 = vmatpush1.msra.mxu1 %v813_v7  ;;  %v754_v5 = vld [vmem:[#allocation8 + $0x2e8] sm:$0xff] }
  0xd7   :  { %960 = vmatpush1.msra.mxu0 %v681_v30  ;;  %1030 = vmatprep.subr.mxu1 %v810_v9  ;;  %v794_v21 = vld [vmem:[#allocation8 + $0x428] sm:$0xff]  ;;  %v745_v30 = vld [vmem:[#allocation8 + $0x2a0] sm:$0xff] }
  0xd8   :  { %961 = vmatprep.subr.mxu0 %v678_v32  ;;  %1031 = vmatpush1.msra.mxu1 %v809_v11  ;;  %v750_v24 = vld [vmem:[#allocation8 + $0x2c8] sm:$0xff] }
  0xd9   :  { %962 = vmatpush1.msra.mxu0 %v677_v34  ;;  %1032 = vmatprep.subr.mxu1 %v806_v13  ;;  %v790_v25 = vld [vmem:[#allocation8 + $0x408] sm:$0xff]  ;;  %v741_v34 = vld [vmem:[#allocation8 + $0x280] sm:$0xff]  ;;  %v852_v13 = vld [vmem:[#allocation8 + $0x5f8] sm:$0xff] }
  0xda   :  { %963 = vmatprep.subr.mxu0 %v674_v36  ;;  %1033 = vmatpush1.msra.mxu1 %v805_v15  ;;  %v746_v28 = vld [vmem:[#allocation8 + $0x2a8] sm:$0xff] }
  0xdb   :  { %964 = vmatpush1.msra.mxu0 %v673_v38  ;;  %1034 = vmatprep.subr.mxu1 %v802_v17  ;;  %v914_v29 = vld [vmem:[#allocation8 + $0x7e8] sm:$0xff]  ;;  %v737_v38 = vld [vmem:[#allocation8 + $0x260] sm:$0xff]  ;;  %v1768_v17 = vld [vmem:[#allocation7] sm:$0xf] }
  0xdc   :  { %965 = vmatprep.subr.mxu0 %v670_v40  ;;  %1035 = vmatpush1.msra.mxu1 %v801_v63  ;;  %v742_v32 = vld [vmem:[#allocation8 + $0x288] sm:$0xff] }
  0xdd   :  { %966 = vmatpush1.msra.mxu0 %v669_v42  ;;  %1036 = vmatprep.subr.mxu1 %v798_v2  ;;  %v910_v33 = vld [vmem:[#allocation8 + $0x7c8] sm:$0xff]  ;;  %v733_v42 = vld [vmem:[#allocation8 + $0x240] sm:$0xff] }
  0xde   :  { %967 = vmatprep.subr.mxu0 %v666_v44  ;;  %1037 = vmatpush1.msra.mxu1 %v797_v1  ;;  %v738_v36 = vld [vmem:[#allocation8 + $0x268] sm:$0xff] }
  0xdf   :  { %968 = vmatpush1.msra.mxu0 %v665_v46  ;;  %1038 = vmatprep.subr.mxu1 %v794_v21  ;;  %v906_v37 = vld [vmem:[#allocation8 + $0x7a8] sm:$0xff]  ;;  %v729_v46 = vld [vmem:[#allocation8 + $0x220] sm:$0xff] }
  0xe0   :  { %969 = vmatprep.subr.mxu0 %v662_v48  ;;  %1039 = vmatpush1.msra.mxu1 %v793_v23  ;;  %v734_v40 = vld [vmem:[#allocation8 + $0x248] sm:$0xff] }
  0xe1   :  { %970 = vmatpush1.msra.mxu0 %v661_v50  ;;  %1040 = vmatprep.subr.mxu1 %v790_v25  ;;  %v902_v41 = vld [vmem:[#allocation8 + $0x788] sm:$0xff]  ;;  %v725_v50 = vld [vmem:[#allocation8 + $0x200] sm:$0xff] }
  0xe2   :  { %971 = vmatprep.subr.mxu0 %v786_v52  ;;  %1041 = vmatpush1.msra.mxu1 %v789_v27  ;;  %v730_v44 = vld [vmem:[#allocation8 + $0x228] sm:$0xff]  ;;  %v893_v52 = vld [vmem:[#allocation8 + $0x740] sm:$0xff] }
  0xe3   :  { %972 = vmatpush2.msra.mxu0 %v785_v54  ;;  %1042 = vmatprep.subr.mxu1 %v914_v29  ;;  %v898_v45 = vld [vmem:[#allocation8 + $0x768] sm:$0xff]  ;;  %v889_v54 = vld [vmem:[#allocation8 + $0x720] sm:$0xff]  ;;  %v719_v29 = vld [vmem:[#allocation8 + $0x1d0] sm:$0xff] }
  0xe4   :  { %973 = vmatprep.subr.mxu0 %v782_v56  ;;  %1043 = vmatpush2.msra.mxu1 %v913_v31  ;;  %v726_v48 = vld [vmem:[#allocation8 + $0x208] sm:$0xff]  ;;  %v885_v56 = vld [vmem:[#allocation8 + $0x700] sm:$0xff]  ;;  %v715_v31 = vld [vmem:[#allocation8 + $0x1b0] sm:$0xff] }
  0xe5   :  { %974 = vmatpush2.msra.mxu0 %v781_v58  ;;  %1044 = vmatprep.subr.mxu1 %v910_v33  ;;  %v894_v49 = vld [vmem:[#allocation8 + $0x748] sm:$0xff]  ;;  %v881_v58 = vld [vmem:[#allocation8 + $0x6e0] sm:$0xff]  ;;  %v711_v33 = vld [vmem:[#allocation8 + $0x190] sm:$0xff] }
  0xe6   :  { %975 = vmatprep.subr.mxu0 %v778_v60  ;;  %1045 = vmatpush2.msra.mxu1 %v909_v35  ;;  %v890_v53 = vld [vmem:[#allocation8 + $0x728] sm:$0xff]  ;;  %v877_v60 = vld [vmem:[#allocation8 + $0x6c0] sm:$0xff]  ;;  %v707_v35 = vld [vmem:[#allocation8 + $0x170] sm:$0xff] }
  0xe7   :  { %976 = vmatpush2.msra.mxu0 %v777_v62  ;;  %1046 = vmatprep.subr.mxu1 %v906_v37  ;;  %v886_v55 = vld [vmem:[#allocation8 + $0x708] sm:$0xff]  ;;  %v873_v62 = vld [vmem:[#allocation8 + $0x6a0] sm:$0xff]  ;;  %v703_v37 = vld [vmem:[#allocation8 + $0x150] sm:$0xff] }
  0xe8   :  { %977 = vmatprep.subr.mxu0 %v774_v3  ;;  %1047 = vmatpush2.msra.mxu1 %v905_v39  ;;  %v882_v57 = vld [vmem:[#allocation8 + $0x6e8] sm:$0xff]  ;;  %v869_v3 = vld [vmem:[#allocation8 + $0x680] sm:$0xff]  ;;  %v699_v39 = vld [vmem:[#allocation8 + $0x130] sm:$0xff] }
  0xe9   :  { %978 = vmatpush2.msra.mxu0 %v773_v6  ;;  %1048 = vmatprep.subr.mxu1 %v902_v41  ;;  %v878_v59 = vld [vmem:[#allocation8 + $0x6c8] sm:$0xff]  ;;  %v865_v6 = vld [vmem:[#allocation8 + $0x660] sm:$0xff]  ;;  %v695_v41 = vld [vmem:[#allocation8 + $0x110] sm:$0xff] }
  0xea   :  { %979 = vmatprep.subr.mxu0 %v770_v8  ;;  %1049 = vmatpush2.msra.mxu1 %v901_v43  ;;  %v874_v61 = vld [vmem:[#allocation8 + $0x6a8] sm:$0xff]  ;;  %v861_v8 = vld [vmem:[#allocation8 + $0x640] sm:$0xff]  ;;  %v691_v43 = vld [vmem:[#allocation8 + $0xf0] sm:$0xff] }
  0xeb   :  { %980 = vmatpush2.msra.mxu0 %v769_v10  ;;  %1050 = vmatprep.subr.mxu1 %v898_v45  ;;  %v870_v0 = vld [vmem:[#allocation8 + $0x688] sm:$0xff]  ;;  %v857_v10 = vld [vmem:[#allocation8 + $0x620] sm:$0xff]  ;;  %v687_v45 = vld [vmem:[#allocation8 + $0xd0] sm:$0xff] }
  0xec   :  { %981 = vmatprep.subr.mxu0 %v766_v12  ;;  %1051 = vmatpush2.msra.mxu1 %v897_v47  ;;  %v866_v4 = vld [vmem:[#allocation8 + $0x668] sm:$0xff]  ;;  %v853_v12 = vld [vmem:[#allocation8 + $0x600] sm:$0xff]  ;;  %v683_v47 = vld [vmem:[#allocation8 + $0xb0] sm:$0xff] }
  0xed   :  { %982 = vmatpush2.msra.mxu0 %v765_v14  ;;  %1052 = vmatprep.subr.mxu1 %v894_v49  ;;  %v862_v7 = vld [vmem:[#allocation8 + $0x648] sm:$0xff]  ;;  %v353_v14 = vlaneseq  ;;  %v679_v49 = vld [vmem:[#allocation8 + $0x90] sm:$0xff] }
  0xee   :  { %983 = vmatprep.subr.mxu0 %v762_v16  ;;  %1053 = vmatpush2.msra.mxu1 %v893_v52  ;;  %v858_v9 = vld [vmem:[#allocation8 + $0x628] sm:$0xff]  ;;  %v672_v52 = vld [vmem:[#allocation8 + $0x58] sm:$0xff] }
  0xef   :  { %984 = vmatpush2.msra.mxu0 %v761_v18  ;;  %1054 = vmatprep.subr.mxu1 %v890_v53  ;;  %v854_v11 = vld [vmem:[#allocation8 + $0x608] sm:$0xff]  ;;  %v1765_v15 = vshrl.u32 %v353_v14, 7  ;;  %v671_v53 = vld [vmem:[#allocation8 + $0x50] sm:$0xff] }
  0xf0   :  { %985 = vmatprep.subr.mxu0 %v758_v19  ;;  %1055 = vmatpush2.msra.mxu1 %v889_v54  ;;  %v668_v54 = vld [vmem:[#allocation8 + $0x38] sm:$0xff]  ;;  %v763_v14 = vld [vmem:[#allocation8 + $0x330] sm:$0xff] }
  0xf1   :  { %986 = vmatpush2.msra.mxu0 %v757_v20  ;;  %1056 = vmatprep.subr.mxu1 %v886_v55  ;;  %v355_v16 = vsub.s32 0, %v1765_v15  ;;  %v359_v18 = vsub.s32 1, %v1765_v15  ;;  %v667_v55 = vld [vmem:[#allocation8 + $0x30] sm:$0xff] }
  0xf2   :  { %987 = vmatprep.subr.mxu0 %v754_v5  ;;  %1057 = vmatpush2.msra.mxu1 %v885_v56  ;;  %v664_v56 = vld [vmem:[#allocation8 + $0x18] sm:$0xff] }
  0xf3   :  { %988 = vmatpush2.msra.mxu0 %v753_v22  ;;  %1058 = vmatprep.subr.mxu1 %v882_v57  ;;  %v356_v63 = vrot.slane %v1768_v17, %v355_v16  ;;  %v360_v19 = vrot.slane %v1768_v17, %v359_v18  ;;  %v663_v57 = vld [vmem:[#allocation8 + $0x10] sm:$0xff] }
  0xf4   :  { %989 = vmatprep.subr.mxu0 %v750_v24  ;;  %1059 = vmatpush2.msra.mxu1 %v881_v58  ;;  %v788_v58 = vld [vmem:[#allocation8 + $0x3f8] sm:$0xff] }
  0xf5   :  { %990 = vmatpush2.msra.mxu0 %v749_v26  ;;  %1060 = vmatprep.subr.mxu1 %v878_v59  ;;  %v723_v26 = vld [vmem:[#allocation8 + $0x1f0] sm:$0xff] }
  0xf6   :  { %991 = vmatprep.subr.mxu0 %v746_v28  ;;  %1061 = vmatpush2.msra.mxu1 %v877_v60  ;;  %v720_v28 = vld [vmem:[#allocation8 + $0x1d8] sm:$0xff]  ;;  %v787_v59 = vld [vmem:[#allocation8 + $0x3f0] sm:$0xff] }
  0xf7   :  { %992 = vmatpush2.msra.mxu0 %v745_v30  ;;  %1062 = vmatprep.subr.mxu1 %v874_v61  ;;  %v716_v30 = vld [vmem:[#allocation8 + $0x1b8] sm:$0xff]  ;;  %v783_v61 = vld [vmem:[#allocation8 + $0x3d0] sm:$0xff] }
  0xf8   :  { %993 = vmatprep.subr.mxu0 %v742_v32  ;;  %1063 = vmatpush2.msra.mxu1 %v873_v62  ;;  %v712_v32 = vld [vmem:[#allocation8 + $0x198] sm:$0xff] }
  0xf9   :  { %994 = vmatpush2.msra.mxu0 %v741_v34  ;;  %1064 = vmatprep.subr.mxu1 %v870_v0  ;;  %v708_v34 = vld [vmem:[#allocation8 + $0x178] sm:$0xff]  ;;  %v779_v0 = vld [vmem:[#allocation8 + $0x3b0] sm:$0xff] }
  0xfa   :  { %995 = vmatprep.subr.mxu0 %v738_v36  ;;  %1065 = vmatpush2.msra.mxu1 %v869_v3  ;;  %v704_v36 = vld [vmem:[#allocation8 + $0x158] sm:$0xff] }
  0xfb   :  { %996 = vmatpush2.msra.mxu0 %v737_v38  ;;  %1066 = vmatprep.subr.mxu1 %v866_v4  ;;  %v700_v38 = vld [vmem:[#allocation8 + $0x138] sm:$0xff]  ;;  %v775_v4 = vld [vmem:[#allocation8 + $0x390] sm:$0xff] }
  0xfc   :  { %997 = vmatprep.subr.mxu0 %v734_v40  ;;  %1067 = vmatpush2.msra.mxu1 %v865_v6  ;;  %v696_v40 = vld [vmem:[#allocation8 + $0x118] sm:$0xff] }
  0xfd   :  { %998 = vmatpush2.msra.mxu0 %v733_v42  ;;  %1068 = vmatprep.subr.mxu1 %v862_v7  ;;  %v692_v42 = vld [vmem:[#allocation8 + $0xf8] sm:$0xff]  ;;  %v771_v7 = vld [vmem:[#allocation8 + $0x370] sm:$0xff] }
  0xfe   :  { %999 = vmatprep.subr.mxu0 %v730_v44  ;;  %1069 = vmatpush2.msra.mxu1 %v861_v8  ;;  %v688_v44 = vld [vmem:[#allocation8 + $0xd8] sm:$0xff]  ;;  %v363_v8 = vsub.s32 2, %v1765_v15 }
  0xff   :  { %1000 = vmatpush2.msra.mxu0 %v729_v46  ;;  %1070 = vmatprep.subr.mxu1 %v858_v9  ;;  %v684_v46 = vld [vmem:[#allocation8 + $0xb8] sm:$0xff] }
 0x100   :  { %1001 = vmatprep.subr.mxu0 %v726_v48  ;;  %1071 = vmatpush2.msra.mxu1 %v857_v10  ;;  %v680_v48 = vld [vmem:[#allocation8 + $0x98] sm:$0xff]  ;;  %v767_v10 = vld [vmem:[#allocation8 + $0x350] sm:$0xff] }
 0x101   :  { %1002 = vmatpush2.msra.mxu0 %v725_v50  ;;  %1072 = vmatprep.subr.mxu1 %v854_v11  ;;  %v676_v50 = vld [vmem:[#allocation8 + $0x78] sm:$0xff]  ;;  %v367_v11 = vsub.s32 3, %v1765_v15 }
 0x102   :  { %1081 = vmatprep.subr.mxu0 %v724_v51  ;;  %1073 = vmatpush2.msra.mxu1 %v853_v12  ;;  %v675_v51 = vld [vmem:[#allocation8 + $0x70] sm:$0xff]  ;;  %v784_v60 = vld [vmem:[#allocation8 + $0x3d8] sm:$0xff] }
 0x103   :  { %1152 = vmatprep.subr.mxu1 %v852_v13  ;;  %v780_v62 = vld [vmem:[#allocation8 + $0x3b8] sm:$0xff]  ;;  %v364_v13 = vrot.slane %v1768_v17, %v363_v8 }
 0x104   :  { %v776_v3 = vld [vmem:[#allocation8 + $0x398] sm:$0xff] }
 0x105   :  { %v772_v6 = vld [vmem:[#allocation8 + $0x378] sm:$0xff] }
 0x106   :  { %v768_v9 = vld [vmem:[#allocation8 + $0x358] sm:$0xff] }
 0x107   :  { %v764_v12 = vld [vmem:[#allocation8 + $0x338] sm:$0xff] }
 0x108   :  { %v1457_v15 = vld [vmem:[%s1816_s6] ss:$0 sm:$0xff] }
 0x13f   :  { %v439_v2 = vpop.f32.mrf.mxu0 }
 0x140   :  { %v440_v20 = vadd.f32 %v439_v2, %v356_v63  ;;  %v760_v63 = vld [vmem:[#allocation8 + $0x318] sm:$0xff]  ;;  %v759_v2 = vld [vmem:[#allocation8 + $0x310] sm:$0xff] }
 0x141   :  { %v510_v1 = vpop.f32.mrf.mxu1  ;;  %v441_v5 = vpop.f32.mrf.mxu0 }
 0x142   :  { %v442_v21 = vadd.f32 %v441_v5, %v360_v19  ;;  %v511_v22 = vadd.f32 %v510_v1, %v440_v20  ;;  %v368_v19 = vrot.slane %v1768_v17, %v367_v11  ;;  %v756_v5 = vld [vmem:[#allocation8 + $0x2f8] sm:$0xff]  ;;  %v747_v17 = vld [vmem:[#allocation8 + $0x2b0] sm:$0xff] }
 0x143   :  { %v512_v23 = vpop.f32.mrf.mxu1 }
 0x144   :  { %v513_v24 = vadd.f32 %v512_v23, %v442_v21 }
 0x146   :  { %1538 = vtanh.f32 %v513_v24  ;;  %v752_v24 = vld [vmem:[#allocation8 + $0x2d8] sm:$0xff] }
 0x147   :  { %1540 = vtanh.f32 %v511_v22  ;;  %v755_v22 = vld [vmem:[#allocation8 + $0x2f0] sm:$0xff] }
 0x153   :  { %v1539_v25 = vpop.eup %1538 }
 0x154   :  { %v1777_v27 = vpop.eup %1540  ;;  %1003 = vmatprep.mubr.f32.mxu0 %v1539_v25 }
 0x155   :  { %1004 = vmatmul.mubr.f32.vlgmr.msra.gmra.mxu0 %v1777_v27 }
 0x156   :  { %1082 = vmatpush1.msra.mxu0 %v723_v26  ;;  %1145 = vmatprep.mubr.f32.mxu0 %v1539_v25  ;;  %v751_v26 = vld [vmem:[#allocation8 + $0x2d0] sm:$0xff] }
 0x157   :  { %1083 = vmatprep.subr.mxu0 %v720_v28 }
 0x158   :  { %1084 = vmatpush1.msra.mxu0 %v719_v29 }
 0x159   :  { %1085 = vmatprep.subr.mxu0 %v716_v30  ;;  %v748_v30 = vld [vmem:[#allocation8 + $0x2b8] sm:$0xff] }
 0x15a   :  { %1086 = vmatpush1.msra.mxu0 %v715_v31 }
 0x15b   :  { %1087 = vmatprep.subr.mxu0 %v712_v32  ;;  %v744_v32 = vld [vmem:[#allocation8 + $0x298] sm:$0xff] }
 0x15c   :  { %1088 = vmatpush1.msra.mxu0 %v711_v33  ;;  %v743_v33 = vld [vmem:[#allocation8 + $0x290] sm:$0xff] }
 0x15d   :  { %1089 = vmatprep.subr.mxu0 %v708_v34  ;;  %v740_v34 = vld [vmem:[#allocation8 + $0x278] sm:$0xff] }
 0x15e   :  { %1090 = vmatpush1.msra.mxu0 %v707_v35  ;;  %v739_v35 = vld [vmem:[#allocation8 + $0x270] sm:$0xff] }
 0x15f   :  { %1091 = vmatprep.subr.mxu0 %v704_v36  ;;  %v736_v36 = vld [vmem:[#allocation8 + $0x258] sm:$0xff] }
 0x160   :  { %1092 = vmatpush1.msra.mxu0 %v703_v37  ;;  %v735_v37 = vld [vmem:[#allocation8 + $0x250] sm:$0xff] }
 0x161   :  { %1093 = vmatprep.subr.mxu0 %v700_v38  ;;  %v732_v38 = vld [vmem:[#allocation8 + $0x238] sm:$0xff] }
 0x162   :  { %1094 = vmatpush1.msra.mxu0 %v699_v39  ;;  %v731_v39 = vld [vmem:[#allocation8 + $0x230] sm:$0xff] }
 0x163   :  { %1095 = vmatprep.subr.mxu0 %v696_v40  ;;  %v728_v40 = vld [vmem:[#allocation8 + $0x218] sm:$0xff] }
 0x164   :  { %1096 = vmatpush1.msra.mxu0 %v695_v41  ;;  %v727_v41 = vld [vmem:[#allocation8 + $0x210] sm:$0xff] }
 0x165   :  { %1097 = vmatprep.subr.mxu0 %v692_v42 }
 0x166   :  { %1098 = vmatpush1.msra.mxu0 %v691_v43  ;;  %v851_v43 = vld [vmem:[#allocation8 + $0x5f0] sm:$0xff] }
 0x167   :  { %1099 = vmatprep.subr.mxu0 %v688_v44 }
 0x168   :  { %1100 = vmatpush1.msra.mxu0 %v687_v45  ;;  %v848_v45 = vld [vmem:[#allocation8 + $0x5d8] sm:$0xff] }
 0x169   :  { %1101 = vmatprep.subr.mxu0 %v684_v46  ;;  %v847_v46 = vld [vmem:[#allocation8 + $0x5d0] sm:$0xff] }
 0x16a   :  { %1102 = vmatpush1.msra.mxu0 %v683_v47  ;;  %v1258_v47 = vld [vmem:[#allocation10 + $0xf8] sm:$0xff] }
 0x16b   :  { %1103 = vmatprep.subr.mxu0 %v680_v48  ;;  %v1242_v48 = vld [vmem:[#allocation10 + $0x78] sm:$0xff] }
 0x16c   :  { %1104 = vmatpush1.msra.mxu0 %v679_v49  ;;  %v844_v49 = vld [vmem:[#allocation8 + $0x5b8] sm:$0xff] }
 0x16d   :  { %1105 = vmatprep.subr.mxu0 %v676_v50  ;;  %v1257_v50 = vld [vmem:[#allocation10 + $0xf0] sm:$0xff] }
 0x16e   :  { %1106 = vmatpush1.msra.mxu0 %v675_v51  ;;  %v843_v51 = vld [vmem:[#allocation8 + $0x5b0] sm:$0xff] }
 0x16f   :  { %1107 = vmatprep.subr.mxu0 %v672_v52  ;;  %v1241_v52 = vld [vmem:[#allocation10 + $0x70] sm:$0xff] }
 0x170   :  { %1108 = vmatpush1.msra.mxu0 %v671_v53  ;;  %v1256_v53 = vld [vmem:[#allocation10 + $0xe8] sm:$0xff] }
 0x171   :  { %1109 = vmatprep.subr.mxu0 %v668_v54  ;;  %v839_v54 = vld [vmem:[#allocation8 + $0x590] sm:$0xff] }
 0x172   :  { %1110 = vmatpush1.msra.mxu0 %v667_v55  ;;  %v1240_v55 = vld [vmem:[#allocation10 + $0x68] sm:$0xff] }
 0x173   :  { %1111 = vmatprep.subr.mxu0 %v664_v56  ;;  %v836_v56 = vld [vmem:[#allocation8 + $0x578] sm:$0xff] }
 0x174   :  { %1112 = vmatpush1.msra.mxu0 %v663_v57  ;;  %v1255_v57 = vld [vmem:[#allocation10 + $0xe0] sm:$0xff] }
 0x175   :  { %1113 = vmatprep.subr.mxu0 %v788_v58  ;;  %v835_v58 = vld [vmem:[#allocation8 + $0x570] sm:$0xff] }
 0x176   :  { %1114 = vmatpush2.msra.mxu0 %v787_v59  ;;  %v1239_v59 = vld [vmem:[#allocation10 + $0x60] sm:$0xff] }
 0x177   :  { %1115 = vmatprep.subr.mxu0 %v784_v60  ;;  %v832_v60 = vld [vmem:[#allocation8 + $0x558] sm:$0xff] }
 0x178   :  { %1116 = vmatpush2.msra.mxu0 %v783_v61  ;;  %v1254_v61 = vld [vmem:[#allocation10 + $0xd8] sm:$0xff] }
 0x179   :  { %1117 = vmatprep.subr.mxu0 %v780_v62  ;;  %v831_v62 = vld [vmem:[#allocation8 + $0x550] sm:$0xff] }
 0x17a   :  { %1118 = vmatpush2.msra.mxu0 %v779_v0  ;;  %v1238_v0 = vld [vmem:[#allocation10 + $0x58] sm:$0xff] }
 0x17b   :  { %1119 = vmatprep.subr.mxu0 %v776_v3  ;;  %v828_v3 = vld [vmem:[#allocation8 + $0x538] sm:$0xff] }
 0x17c   :  { %1120 = vmatpush2.msra.mxu0 %v775_v4  ;;  %v1253_v4 = vld [vmem:[#allocation10 + $0xd0] sm:$0xff] }
 0x17d   :  { %1121 = vmatprep.subr.mxu0 %v772_v6  ;;  %v827_v6 = vld [vmem:[#allocation8 + $0x530] sm:$0xff] }
 0x17e   :  { %1122 = vmatpush2.msra.mxu0 %v771_v7  ;;  %v824_v7 = vld [vmem:[#allocation8 + $0x518] sm:$0xff] }
 0x17f   :  { %1123 = vmatprep.subr.mxu0 %v768_v9  ;;  %v823_v9 = vld [vmem:[#allocation8 + $0x510] sm:$0xff] }
 0x180   :  { %1124 = vmatpush2.msra.mxu0 %v767_v10  ;;  %v820_v10 = vld [vmem:[#allocation8 + $0x4f8] sm:$0xff] }
 0x181   :  { %1125 = vmatprep.subr.mxu0 %v764_v12  ;;  %v581_v20 = vpop.f32.mrf.mxu0  ;;  %v819_v12 = vld [vmem:[#allocation8 + $0x4f0] sm:$0xff] }
 0x182   :  { %v652_v1 = vpop.f32.mrf.mxu1  ;;  %1126 = vmatpush2.msra.mxu0 %v763_v14  ;;  %v582_v21 = vadd.f32 %v581_v20, %v364_v13  ;;  %v816_v13 = vld [vmem:[#allocation8 + $0x4d8] sm:$0xff]  ;;  %v815_v14 = vld [vmem:[#allocation8 + $0x4d0] sm:$0xff] }
 0x183   :  { %1127 = vmatprep.subr.mxu0 %v760_v63  ;;  %v583_v23 = vpop.f32.mrf.mxu0  ;;  %v812_v63 = vld [vmem:[#allocation8 + $0x4b8] sm:$0xff]  ;;  %v807_v20 = vld [vmem:[#allocation8 + $0x490] sm:$0xff] }
 0x184   :  { %1128 = vmatpush2.msra.mxu0 %v759_v2  ;;  %v584_v25 = vadd.f32 %v583_v23, %v368_v19  ;;  %v653_v28 = vadd.f32 %v652_v1, %v582_v21  ;;  %v654_v29 = vpop.f32.mrf.mxu1  ;;  %v811_v19 = vld [vmem:[#allocation8 + $0x4b0] sm:$0xff]  ;;  %v808_v2 = vld [vmem:[#allocation8 + $0x498] sm:$0xff] }
 0x185   :  { %1129 = vmatprep.subr.mxu0 %v756_v5  ;;  %v804_v1 = vld [vmem:[#allocation8 + $0x478] sm:$0xff]  ;;  %v803_v5 = vld [vmem:[#allocation8 + $0x470] sm:$0xff] }
 0x186   :  { %1130 = vmatpush2.msra.mxu0 %v755_v22  ;;  %v655_v31 = vadd.f32 %v654_v29, %v584_v25  ;;  %v800_v21 = vld [vmem:[#allocation8 + $0x458] sm:$0xff]  ;;  %v799_v22 = vld [vmem:[#allocation8 + $0x450] sm:$0xff] }
 0x187   :  { %1131 = vmatprep.subr.mxu0 %v752_v24  ;;  %v796_v23 = vld [vmem:[#allocation8 + $0x438] sm:$0xff]  ;;  %v795_v24 = vld [vmem:[#allocation8 + $0x430] sm:$0xff] }
 0x188   :  { %1132 = vmatpush2.msra.mxu0 %v751_v26  ;;  %1542 = vtanh.f32 %v655_v31  ;;  %v792_v25 = vld [vmem:[#allocation8 + $0x418] sm:$0xff]  ;;  %v791_v26 = vld [vmem:[#allocation8 + $0x410] sm:$0xff] }
 0x189   :  { %1133 = vmatprep.subr.mxu0 %v748_v30  ;;  %1544 = vtanh.f32 %v653_v28  ;;  %v916_v28 = vld [vmem:[#allocation8 + $0x7f8] sm:$0xff]  ;;  %v915_v29 = vld [vmem:[#allocation8 + $0x7f0] sm:$0xff] }
 0x18a   :  { %1134 = vmatpush2.msra.mxu0 %v747_v17  ;;  %v912_v30 = vld [vmem:[#allocation8 + $0x7d8] sm:$0xff]  ;;  %v911_v31 = vld [vmem:[#allocation8 + $0x7d0] sm:$0xff] }
 0x18b   :  { %1135 = vmatprep.subr.mxu0 %v744_v32  ;;  %v908_v17 = vld [vmem:[#allocation8 + $0x7b8] sm:$0xff]  ;;  %v907_v32 = vld [vmem:[#allocation8 + $0x7b0] sm:$0xff] }
 0x18c   :  { %1136 = vmatpush2.msra.mxu0 %v743_v33  ;;  %v904_v33 = vld [vmem:[#allocation8 + $0x798] sm:$0xff] }
 0x18d   :  { %1137 = vmatprep.subr.mxu0 %v740_v34  ;;  %v903_v34 = vld [vmem:[#allocation8 + $0x790] sm:$0xff] }
 0x18e   :  { %1138 = vmatpush2.msra.mxu0 %v739_v35  ;;  %v900_v35 = vld [vmem:[#allocation8 + $0x778] sm:$0xff] }
 0x18f   :  { %1139 = vmatprep.subr.mxu0 %v736_v36  ;;  %v899_v36 = vld [vmem:[#allocation8 + $0x770] sm:$0xff] }
 0x190   :  { %1140 = vmatpush2.msra.mxu0 %v735_v37  ;;  %v896_v37 = vld [vmem:[#allocation8 + $0x758] sm:$0xff] }
 0x191   :  { %1141 = vmatprep.subr.mxu0 %v732_v38  ;;  %v895_v38 = vld [vmem:[#allocation8 + $0x750] sm:$0xff] }
 0x192   :  { %1142 = vmatpush2.msra.mxu0 %v731_v39  ;;  %v892_v39 = vld [vmem:[#allocation8 + $0x738] sm:$0xff] }
 0x193   :  { %1143 = vmatprep.subr.mxu0 %v728_v40  ;;  %v891_v40 = vld [vmem:[#allocation8 + $0x730] sm:$0xff] }
 0x194   :  { %1144 = vmatpush2.msra.mxu0 %v727_v41  ;;  %v888_v41 = vld [vmem:[#allocation8 + $0x718] sm:$0xff] }
 0x195   :  { %1146 = vmatmul.mubr.f32.vlgmr.msra.gmra.mxu0 %v1777_v27  ;;  %v1543_v42 = vpop.eup %1542  ;;  %1458 = vmatprep.subr.mxu0 %v1258_v47  ;;  %v840_v27 = vld [vmem:[#allocation8 + $0x598] sm:$0xff]  ;;  %v879_v47 = vld [vmem:[#allocation8 + $0x6d0] sm:$0xff] }
 0x196   :  { %v1789_v44 = vpop.eup %1544  ;;  %1074 = vmatprep.mubr.f32.mxu1 %v1543_v42  ;;  %1459 = vmatpush3.msra.mxu0 %v1242_v48  ;;  %v876_v48 = vld [vmem:[#allocation8 + $0x6b8] sm:$0xff] }
 0x197   :  { %1075 = vmatmul.mubr.f32.vlgmr.msra.gmra.mxu1 %v1789_v44  ;;  %1460 = vmatprep.subr.mxu0 %v1257_v50  ;;  %v872_v50 = vld [vmem:[#allocation8 + $0x698] sm:$0xff] }
 0x198   :  { %1153 = vmatpush1.msra.mxu1 %v851_v43  ;;  %1216 = vmatprep.mubr.f32.mxu1 %v1543_v42  ;;  %v887_v42 = vld [vmem:[#allocation8 + $0x710] sm:$0xff]  ;;  %v884_v43 = vld [vmem:[#allocation8 + $0x6f8] sm:$0xff] }
 0x199   :  { %1154 = vmatprep.subr.mxu1 %v848_v45  ;;  %1461 = vmatpush3.msra.mxu0 %v1241_v52  ;;  %v883_v45 = vld [vmem:[#allocation8 + $0x6f0] sm:$0xff]  ;;  %v868_v52 = vld [vmem:[#allocation8 + $0x678] sm:$0xff] }
 0x19a   :  { %1155 = vmatpush1.msra.mxu1 %v847_v46  ;;  %1462 = vmatprep.subr.mxu0 %v1256_v53  ;;  %v880_v46 = vld [vmem:[#allocation8 + $0x6d8] sm:$0xff] }
 0x19b   :  { %1156 = vmatprep.subr.mxu1 %v844_v49  ;;  %1463 = vmatpush3.msra.mxu0 %v1240_v55  ;;  %v875_v49 = vld [vmem:[#allocation8 + $0x6b0] sm:$0xff]  ;;  %v864_v53 = vld [vmem:[#allocation8 + $0x658] sm:$0xff] }
 0x19c   :  { %1157 = vmatpush1.msra.mxu1 %v843_v51  ;;  %1464 = vmatprep.subr.mxu0 %v1255_v57  ;;  %v871_v51 = vld [vmem:[#allocation8 + $0x690] sm:$0xff]  ;;  %v860_v55 = vld [vmem:[#allocation8 + $0x638] sm:$0xff] }
 0x19d   :  { %1158 = vmatprep.subr.mxu1 %v840_v27  ;;  %1465 = vmatpush3.msra.mxu0 %v1239_v59  ;;  %v867_v27 = vld [vmem:[#allocation8 + $0x670] sm:$0xff]  ;;  %v856_v57 = vld [vmem:[#allocation8 + $0x618] sm:$0xff] }
 0x19e   :  { %1159 = vmatpush1.msra.mxu1 %v839_v54  ;;  %1466 = vmatprep.subr.mxu0 %v1254_v61  ;;  %v863_v54 = vld [vmem:[#allocation8 + $0x650] sm:$0xff]  ;;  %v1236_v61 = vld [vmem:[#allocation10 + $0x48] sm:$0xff] }
 0x19f   :  { %1160 = vmatprep.subr.mxu1 %v836_v56  ;;  %1467 = vmatpush3.msra.mxu0 %v1238_v0  ;;  %v859_v56 = vld [vmem:[#allocation8 + $0x630] sm:$0xff]  ;;  %v1235_v0 = vld [vmem:[#allocation10 + $0x40] sm:$0xff] }
 0x1a0   :  { %1161 = vmatpush1.msra.mxu1 %v835_v58  ;;  %1468 = vmatprep.subr.mxu0 %v1253_v4  ;;  %v855_v58 = vld [vmem:[#allocation8 + $0x610] sm:$0xff]  ;;  %v1234_v4 = vld [vmem:[#allocation10 + $0x38] sm:$0xff] }
 0x1a1   :  { %1162 = vmatprep.subr.mxu1 %v832_v60  ;;  %v1237_v59 = vld [vmem:[#allocation10 + $0x50] sm:$0xff]  ;;  %v1252_v60 = vld [vmem:[#allocation10 + $0xc8] sm:$0xff] }
 0x1a2   :  { %1163 = vmatpush1.msra.mxu1 %v831_v62  ;;  %1469 = vmatpush3.msra.mxu0 %v1237_v59  ;;  %v1251_v62 = vld [vmem:[#allocation10 + $0xc0] sm:$0xff] }
 0x1a3   :  { %1164 = vmatprep.subr.mxu1 %v828_v3  ;;  %1470 = vmatprep.subr.mxu0 %v1252_v60  ;;  %v1250_v3 = vld [vmem:[#allocation10 + $0xb8] sm:$0xff] }
 0x1a4   :  { %1165 = vmatpush1.msra.mxu1 %v827_v6  ;;  %1471 = vmatpush3.msra.mxu0 %v1236_v61  ;;  %v1249_v6 = vld [vmem:[#allocation10 + $0xb0] sm:$0xff] }
 0x1a5   :  { %1166 = vmatprep.subr.mxu1 %v824_v7  ;;  %1472 = vmatprep.subr.mxu0 %v1251_v62  ;;  %v1233_v7 = vld [vmem:[#allocation10 + $0x30] sm:$0xff] }
 0x1a6   :  { %1167 = vmatpush1.msra.mxu1 %v823_v9  ;;  %1473 = vmatpush3.msra.mxu0 %v1235_v0  ;;  %v1248_v9 = vld [vmem:[#allocation10 + $0xa8] sm:$0xff] }
 0x1a7   :  { %1168 = vmatprep.subr.mxu1 %v820_v10  ;;  %1474 = vmatprep.subr.mxu0 %v1250_v3  ;;  %v1232_v10 = vld [vmem:[#allocation10 + $0x28] sm:$0xff] }
 0x1a8   :  { %1169 = vmatpush1.msra.mxu1 %v819_v12  ;;  %1475 = vmatpush3.msra.mxu0 %v1234_v4  ;;  %v1247_v12 = vld [vmem:[#allocation10 + $0xa0] sm:$0xff] }
 0x1a9   :  { %1170 = vmatprep.subr.mxu1 %v816_v13  ;;  %1476 = vmatprep.subr.mxu0 %v1249_v6  ;;  %v1246_v13 = vld [vmem:[#allocation10 + $0x98] sm:$0xff] }
 0x1aa   :  { %1171 = vmatpush1.msra.mxu1 %v815_v14  ;;  %1477 = vmatpush3.msra.mxu0 %v1233_v7  ;;  %v1230_v14 = vld [vmem:[#allocation10 + $0x18] sm:$0xff] }
 0x1ab   :  { %1172 = vmatprep.subr.mxu1 %v812_v63  ;;  %1478 = vmatprep.subr.mxu0 %v1248_v9  ;;  %v1245_v63 = vld [vmem:[#allocation10 + $0x90] sm:$0xff] }
 0x1ac   :  { %1173 = vmatpush1.msra.mxu1 %v811_v19  ;;  %1479 = vmatpush3.msra.mxu0 %v1232_v10  ;;  %v1229_v19 = vld [vmem:[#allocation10 + $0x10] sm:$0xff] }
 0x1ad   :  { %1174 = vmatprep.subr.mxu1 %v808_v2  ;;  %1480 = vmatprep.subr.mxu0 %v1247_v12  ;;  %v1244_v2 = vld [vmem:[#allocation10 + $0x88] sm:$0xff] }
 0x1ae   :  { %1175 = vmatpush1.msra.mxu1 %v807_v20  ;;  %v1228_v20 = vld [vmem:[#allocation10 + $0x8] sm:$0xff] }
 0x1af   :  { %1176 = vmatprep.subr.mxu1 %v804_v1  ;;  %v1243_v1 = vld [vmem:[#allocation10 + $0x80] sm:$0xff] }
 0x1b0   :  { %1177 = vmatpush1.msra.mxu1 %v803_v5  ;;  %v1227_v5 = vld [vmem:[#allocation10] sm:$0xff] }
 0x1b1   :  { %1178 = vmatprep.subr.mxu1 %v800_v21  ;;  %v1290_v21 = vld [vmem:[#allocation10 + $0x1f8] sm:$0xff] }
 0x1b2   :  { %1179 = vmatpush1.msra.mxu1 %v799_v22  ;;  %v1274_v22 = vld [vmem:[#allocation10 + $0x178] sm:$0xff] }
 0x1b3   :  { %1180 = vmatprep.subr.mxu1 %v796_v23  ;;  %v1289_v23 = vld [vmem:[#allocation10 + $0x1f0] sm:$0xff] }
 0x1b4   :  { %1181 = vmatpush1.msra.mxu1 %v795_v24  ;;  %v1273_v24 = vld [vmem:[#allocation10 + $0x170] sm:$0xff] }
 0x1b5   :  { %1182 = vmatprep.subr.mxu1 %v792_v25  ;;  %v1288_v25 = vld [vmem:[#allocation10 + $0x1e8] sm:$0xff] }
 0x1b6   :  { %1183 = vmatpush1.msra.mxu1 %v791_v26  ;;  %v1272_v26 = vld [vmem:[#allocation10 + $0x168] sm:$0xff] }
 0x1b7   :  { %1184 = vmatprep.subr.mxu1 %v916_v28  ;;  %v1287_v28 = vld [vmem:[#allocation10 + $0x1e0] sm:$0xff] }
 0x1b8   :  { %1185 = vmatpush2.msra.mxu1 %v915_v29  ;;  %v1271_v29 = vld [vmem:[#allocation10 + $0x160] sm:$0xff] }
 0x1b9   :  { %1186 = vmatprep.subr.mxu1 %v912_v30  ;;  %v1286_v30 = vld [vmem:[#allocation10 + $0x1d8] sm:$0xff] }
 0x1ba   :  { %1187 = vmatpush2.msra.mxu1 %v911_v31  ;;  %v1270_v31 = vld [vmem:[#allocation10 + $0x158] sm:$0xff] }
 0x1bb   :  { %1188 = vmatprep.subr.mxu1 %v908_v17  ;;  %v1285_v17 = vld [vmem:[#allocation10 + $0x1d0] sm:$0xff] }
 0x1bc   :  { %1189 = vmatpush2.msra.mxu1 %v907_v32  ;;  %v1269_v32 = vld [vmem:[#allocation10 + $0x150] sm:$0xff] }
 0x1bd   :  { %1190 = vmatprep.subr.mxu1 %v904_v33  ;;  %v1284_v33 = vld [vmem:[#allocation10 + $0x1c8] sm:$0xff] }
 0x1be   :  { %1191 = vmatpush2.msra.mxu1 %v903_v34  ;;  %v1268_v34 = vld [vmem:[#allocation10 + $0x148] sm:$0xff] }
 0x1bf   :  { %1192 = vmatprep.subr.mxu1 %v900_v35  ;;  %v1283_v35 = vld [vmem:[#allocation10 + $0x1c0] sm:$0xff] }
 0x1c0   :  { %1193 = vmatpush2.msra.mxu1 %v899_v36  ;;  %v1267_v36 = vld [vmem:[#allocation10 + $0x140] sm:$0xff] }
 0x1c1   :  { %1194 = vmatprep.subr.mxu1 %v896_v37  ;;  %v1282_v37 = vld [vmem:[#allocation10 + $0x1b8] sm:$0xff] }
 0x1c2   :  { %1195 = vmatpush2.msra.mxu1 %v895_v38  ;;  %v1266_v38 = vld [vmem:[#allocation10 + $0x138] sm:$0xff] }
 0x1c3   :  { %1196 = vmatprep.subr.mxu1 %v892_v39  ;;  %v1281_v39 = vld [vmem:[#allocation10 + $0x1b0] sm:$0xff] }
 0x1c4   :  { %1197 = vmatpush2.msra.mxu1 %v891_v40  ;;  %v1265_v40 = vld [vmem:[#allocation10 + $0x130] sm:$0xff] }
 0x1c5   :  { %1198 = vmatprep.subr.mxu1 %v888_v41  ;;  %v1280_v41 = vld [vmem:[#allocation10 + $0x1a8] sm:$0xff] }
 0x1c6   :  { %1199 = vmatpush2.msra.mxu1 %v887_v42  ;;  %v1264_v42 = vld [vmem:[#allocation10 + $0x128] sm:$0xff] }
 0x1c7   :  { %1200 = vmatprep.subr.mxu1 %v884_v43  ;;  %v1279_v43 = vld [vmem:[#allocation10 + $0x1a0] sm:$0xff] }
 0x1c8   :  { %1201 = vmatpush2.msra.mxu1 %v883_v45  ;;  %v1263_v45 = vld [vmem:[#allocation10 + $0x120] sm:$0xff] }
 0x1c9   :  { %1202 = vmatprep.subr.mxu1 %v880_v46  ;;  %v1278_v46 = vld [vmem:[#allocation10 + $0x198] sm:$0xff] }
 0x1ca   :  { %1203 = vmatpush2.msra.mxu1 %v879_v47  ;;  %v1262_v47 = vld [vmem:[#allocation10 + $0x118] sm:$0xff] }
 0x1cb   :  { %1204 = vmatprep.subr.mxu1 %v876_v48  ;;  %v1277_v48 = vld [vmem:[#allocation10 + $0x190] sm:$0xff] }
 0x1cc   :  { %1205 = vmatpush2.msra.mxu1 %v875_v49  ;;  %v1261_v49 = vld [vmem:[#allocation10 + $0x110] sm:$0xff] }
 0x1cd   :  { %1206 = vmatprep.subr.mxu1 %v872_v50  ;;  %v1276_v50 = vld [vmem:[#allocation10 + $0x188] sm:$0xff] }
 0x1ce   :  { %1207 = vmatpush2.msra.mxu1 %v871_v51  ;;  %v1260_v51 = vld [vmem:[#allocation10 + $0x108] sm:$0xff] }
 0x1cf   :  { %1208 = vmatprep.subr.mxu1 %v868_v52  ;;  %v1275_v52 = vld [vmem:[#allocation10 + $0x180] sm:$0xff] }
 0x1d0   :  { %1209 = vmatpush2.msra.mxu1 %v867_v27  ;;  %v1259_v27 = vld [vmem:[#allocation10 + $0x100] sm:$0xff] }
 0x1d1   :  { %1210 = vmatprep.subr.mxu1 %v864_v53  ;;  %v917_v53 = vld [vmem:[%s1814_s4] sm:$0xf] }
 0x1d2   :  { %1211 = vmatpush2.msra.mxu1 %v863_v54 }
 0x1d3   :  { %1212 = vmatprep.subr.mxu1 %v860_v55  ;;  %v922_v55 = vrot.slane %v917_v53, %v355_v16  ;;  %v930_v16 = vrot.slane %v917_v53, %v363_v8 }
 0x1d4   :  { %1213 = vmatpush2.msra.mxu1 %v859_v56  ;;  %v926_v56 = vrot.slane %v917_v53, %v359_v18  ;;  %v934_v18 = vrot.slane %v917_v53, %v367_v11 }
 0x1d5   :  { %1214 = vmatprep.subr.mxu1 %v856_v57 }
 0x1d6   :  { %1215 = vmatpush2.msra.mxu1 %v855_v58 }
 0x1d7   :  { %1217 = vmatmul.mubr.f32.vlgmr.msra.gmra.mxu1 %v1789_v44  ;;  %v1231_v44 = vld [vmem:[#allocation10 + $0x20] sm:$0xff]  ;;  %1493 = vmatprep.subr.mxu1 %v1290_v21 }
 0x1d8   :  { %1481 = vmatpush3.msra.mxu0 %v1231_v44  ;;  %1494 = vmatpush3.msra.mxu1 %v1274_v22 }
 0x1d9   :  { %1482 = vmatprep.subr.mxu0 %v1246_v13  ;;  %1495 = vmatprep.subr.mxu1 %v1289_v23 }
 0x1da   :  { %1483 = vmatpush3.msra.mxu0 %v1230_v14  ;;  %1496 = vmatpush3.msra.mxu1 %v1273_v24 }
 0x1db   :  { %1484 = vmatprep.subr.mxu0 %v1245_v63  ;;  %1497 = vmatprep.subr.mxu1 %v1288_v25 }
 0x1dc   :  { %1485 = vmatpush3.msra.mxu0 %v1229_v19  ;;  %1498 = vmatpush3.msra.mxu1 %v1272_v26 }
 0x1dd   :  { %1486 = vmatprep.subr.mxu0 %v1244_v2  ;;  %1499 = vmatprep.subr.mxu1 %v1287_v28 }
 0x1de   :  { %1487 = vmatpush3.msra.mxu0 %v1228_v20  ;;  %1500 = vmatpush3.msra.mxu1 %v1271_v29 }
 0x1df   :  { %1488 = vmatprep.subr.mxu0 %v1243_v1  ;;  %1501 = vmatprep.subr.mxu1 %v1286_v30 }
 0x1e0   :  { %1489 = vmatpush3.msra.mxu0 %v1227_v5  ;;  %1502 = vmatpush3.msra.mxu1 %v1270_v31 }
 0x1e1   :  { %1503 = vmatprep.subr.mxu1 %v1285_v17 }
 0x1e2   :  { %1504 = vmatpush3.msra.mxu1 %v1269_v32 }
 0x1e3   :  { %1505 = vmatprep.subr.mxu1 %v1284_v33 }
 0x1e4   :  { %1506 = vmatpush3.msra.mxu1 %v1268_v34 }
 0x1e5   :  { %1507 = vmatprep.subr.mxu1 %v1283_v35 }
 0x1e6   :  { %1508 = vmatpush3.msra.mxu1 %v1267_v36 }
 0x1e7   :  { %1509 = vmatprep.subr.mxu1 %v1282_v37 }
 0x1e8   :  { %1510 = vmatpush3.msra.mxu1 %v1266_v38 }
 0x1e9   :  { %1511 = vmatprep.subr.mxu1 %v1281_v39 }
 0x1ea   :  { %1512 = vmatpush3.msra.mxu1 %v1265_v40 }
 0x1eb   :  { %1513 = vmatprep.subr.mxu1 %v1280_v41 }
 0x1ec   :  { %1514 = vmatpush3.msra.mxu1 %v1264_v42 }
 0x1ed   :  { %1515 = vmatprep.subr.mxu1 %v1279_v43 }
 0x1ee   :  { %1516 = vmatpush3.msra.mxu1 %v1263_v45 }
 0x1ef   :  { %1517 = vmatprep.subr.mxu1 %v1278_v46 }
 0x1f0   :  { %1518 = vmatpush3.msra.mxu1 %v1262_v47 }
 0x1f1   :  { %1519 = vmatprep.subr.mxu1 %v1277_v48 }
 0x1f2   :  { %1520 = vmatpush3.msra.mxu1 %v1261_v49 }
 0x1f3   :  { %1521 = vmatprep.subr.mxu1 %v1276_v50 }
 0x1f4   :  { %1522 = vmatpush3.msra.mxu1 %v1260_v51 }
 0x1f5   :  { %1523 = vmatprep.subr.mxu1 %v1275_v52 }
 0x1f6   :  { %1524 = vmatpush3.msra.mxu1 %v1259_v27 }
 0x215   :  { %v1005_v54 = vpop.f32.mrf.mxu0 }
 0x216   :  { %v1006_v58 = vadd.f32 %v1005_v54, %v922_v55 }
 0x217   :  { %v1007_v57 = vpop.f32.mrf.mxu0 }
 0x218   :  { %v1008_v60 = vadd.f32 %v1007_v57, %v926_v56 }
 0x255   :  { %v1147_v6 = vpop.f32.mrf.mxu0 }
 0x256   :  { %v1148_v9 = vadd.f32 %v1147_v6, %v930_v16 }
 0x257   :  { %v1076_v59 = vpop.f32.mrf.mxu1  ;;  %v1149_v7 = vpop.f32.mrf.mxu0 }
 0x258   :  { %v1077_v61 = vadd.f32 %v1076_v59, %v1006_v58  ;;  %v1150_v12 = vadd.f32 %v1149_v7, %v934_v18 }
 0x259   :  { %v1078_v62 = vpop.f32.mrf.mxu1 }
 0x25a   :  { %v1079_v0 = vadd.f32 %v1078_v62, %v1008_v60 }
 0x25c   :  { %1546 = vtanh.f32 %v1079_v0 }
 0x25d   :  { %1548 = vtanh.f32 %v1077_v61 }
 0x269   :  { %v1547_v3 = vpop.eup %1546 }
 0x26a   :  { %v1549_v4 = vpop.eup %1548  ;;  %1362 = vmatprep.mubr.f32.mxu0 %v1547_v3 }
 0x26b   :  { %1363 = vmatmul.mubr.f32.vlgmr.msra.gmra.mxu0 %v1549_v4 }
 0x297   :  { %v1218_v10 = vpop.f32.mrf.mxu1 }
 0x298   :  { %v1219_v44 = vadd.f32 %v1218_v10, %v1148_v9 }
 0x299   :  { %v1220_v13 = vpop.f32.mrf.mxu1 }
 0x29a   :  { %v1221_v14 = vadd.f32 %v1220_v13, %v1150_v12 }
 0x29c   :  { %1550 = vtanh.f32 %v1221_v14 }
 0x29d   :  { %1552 = vtanh.f32 %v1219_v44 }
 0x2a9   :  { %v1551_v63 = vpop.eup %1550 }
 0x2aa   :  { %v1553_v19 = vpop.eup %1552  ;;  %1432 = vmatprep.mubr.f32.mxu1 %v1551_v63 }
 0x2ab   :  { %1433 = vmatmul.mubr.f32.vlgmr.msra.gmra.mxu1 %v1553_v19 }
 0x32b   :  { %v1490_v2 = vpop.f32.mrf.mxu0 }
 0x32d   :  { %v1491_v20 = vpop.f32.mrf.mxu0 }
 0x32e   :  { %v1492_v1 = vadd.f32 %v1491_v20, %v1490_v2 }
 0x330   :  { %v1365_v5 = vadd.f32 %v1492_v1, %v1457_v15 }
 0x36b   :  { %v1525_v8 = vpop.f32.mrf.mxu1 }
 0x36d   :  { %v1526_v11 = vpop.f32.mrf.mxu1 }
 0x36e   :  { %v1527_v21 = vadd.f32 %v1526_v11, %v1525_v8 }
 0x370   :  { %v1435_v22 = vadd.f32 %v1527_v21, %v1365_v5 }
 0x372   :  { %1554 = vtanh.f32 %v1435_v22 }
 0x37f   :  { %v1555_v23 = vpop.eup %1554 }
 0x380   :  { %1439 = vst [vmem:[#allocation11] sm:$0xff] %v1555_v23 }
 0x381   :  { %1667 = shalt.err (!%p1664_p1)
}
 0x382   :  { %1449 = dma.vmem_to_hbm [thread:$0]  %s1447_s29, 128, %s1817_s7, [#allocation4]  }
 0x383   :  { %1682 = dma.done.wait [#allocation4], 128  }
 0x384   :  { %1683 = vsyncadd [#allocation4], 4294967168 }
 0x385   :  { %1453 = vsyncpa [#allocation3], 1 }
 0x386   :  { %1454 = vsyncpa [#allocation6], 1 }
 0x387   :  { %1455 = vsyncpa [#allocation9], 1 }
 0x388   :  { %1456 = vsyncpa [#allocation4], 1 }

</bundles_post_ra>
